<compile_context>
chip_gen: v5e
topology: v5e:2x2
jax: 0.10.0
libtpu: 0.0.40
codegen_flags: <defaults>
</compile_context>

<pallas_src>
import functools
import math

import jax
import jax.numpy as jnp
from jax.experimental import pallas as pl
from jax.experimental.pallas import tpu as pltpu


def _fused_transformer_kernel(x_ref,
                              wqh_ref, bqh_ref,
                              wk_ref, wv_ref, wf_ref,
                              w1_ref, w2_ref,
                              bcol_ref, b1_ref,
                              o_ref,
                              act_ref, attn_ref,
                              *, n_heads):
    f32, bf16 = jnp.float32, jnp.bfloat16
    layer = pl.program_id(1)
    n_layers = pl.num_programs(1)

    def mm(a, b, dims=((1,), (0,))):
        # bf16 MXU operands, f32 accumulation.
        return jax.lax.dot_general(a, b, dimension_numbers=(dims, ((), ())),
                                   preferred_element_type=f32)

    # Load this batch slab into the carried activation only on the first layer
    # step; later layer steps consume the previous layer's output from VMEM.
    @pl.when(layer == 0)
    def _():
        act_ref[...] = x_ref[...].astype(f32)

    C, N = act_ref.shape
    hs = C // n_heads

    # Packed column biases (leading dim of a ref is freely indexable).
    bk = bcol_ref[0]          # (C, 1)
    bv = bcol_ref[1]
    bfc = bcol_ref[2]         # final_fc bias
    b2 = bcol_ref[3]          # fc2 bias

    # --- MultiHeadAttention -------------------------------------------------
    x32 = act_ref[...]                       # (C, N) f32, feature-major
    xb = x32.astype(bf16)                    # single bf16 cast for K/V proj
    xTb = x32.T.astype(bf16)                 # (N, C); ONE transpose per layer

    # Dense, full-MXU-width K / V projections; cast to bf16 exactly once.
    kpb = (mm(wk_ref[...], xb) + bk).astype(bf16)            # (C, N)
    vpb = (mm(wv_ref[...], xb) + bv).astype(bf16)            # (C, N)

    for h in range(n_heads):
        rows = slice(h * hs, (h + 1) * hs)
        # Per-head Q projection straight into sequence-major (N, hs).
        # 1/sqrt(hs) is already folded into wqh/bqh -> no score scaling here.
        q_hT = (mm(xTb, wqh_ref[h], ((1,), (1,))) + bqh_ref[h]).astype(bf16)
        k_h = kpb[rows, :]                                   # (hs, N) bf16
        v_h = vpb[rows, :]                                   # (hs, N) bf16

        s = mm(q_hT, k_h)                                    # (N, N) f32
        s = s - jnp.max(s, axis=-1, keepdims=True)           # f32 on VPU/XLU
        p = jnp.exp(s)
        p = p * pl.reciprocal(jnp.sum(p, axis=-1, keepdims=True), approx=True)

        # attn_h[d, i] = sum_j v_h[d, j] * p[i, j]  (transposed-RHS matmul --
        # the natively supported trans_b MXU form, no vxpose of p).
        attn_ref[rows, :] = mm(v_h, p.astype(bf16), ((1,), (1,))).astype(bf16)

    attn = mm(wf_ref[...], attn_ref[...]) + bfc              # final_fc, (C, N)

    # --- residual 1 (Normalization is the identity in the reference) --------
    q2 = act_ref[...] + attn                                 # re-read VMEM, f32

    # --- FeedForward: Linear(C->H) -> ReLU -> Linear(H->C) ------------------
    hid = jnp.maximum(mm(w1_ref[...], q2.astype(bf16)) + b1_ref[...], 0.0)
    ff = mm(w2_ref[...], hid.astype(bf16)) + b2              # (C, N) f32

    # --- residual 2 (norm2 identity); carry the layer output in VMEM --------
    y = q2 + ff
    act_ref[...] = y

    @pl.when(layer == n_layers - 1)
    def _():
        o_ref[...] = y.astype(o_ref.dtype)


def ariel_transformer_core(x, layer_params, n_heads):
    """selfAtt_1/2/3 of ArielNetwork, fused into one pallas_call.

    x: (B, C, N) float32; self-attention (the same tensor is Q, K and V).
    """
    B, C, N = x.shape
    L = len(layer_params)
    H = layer_params[0]["w1"].shape[0]
    assert C % n_heads == 0
    hs = C // n_heads
    scale = 1.0 / math.sqrt(hs)
    bf16 = jnp.bfloat16

    stack = lambda k: jnp.stack([p[k] for p in layer_params])

    # Weights are only ever MXU operands -> ship them bf16 (halves weight DMA).
    # Fold the 1/sqrt(head_size) score scale into the Q projection.
    wqh = (stack("wq") * scale).reshape(L, n_heads, hs, C).astype(bf16)
    bqh = (stack("bq") * scale).reshape(L, n_heads, 1, hs)            # f32
    wk = stack("wk").astype(bf16)                                     # (L, C, C)
    wv = stack("wv").astype(bf16)
    wf = stack("wf").astype(bf16)
    w1 = stack("w1").astype(bf16)                                     # (L, H, C)
    w2 = stack("w2").astype(bf16)                                     # (L, C, H)
    # Column biases packed: [bk, bv, bf, b2] -> one operand; b1 separate (H!=C ok).
    bcol = jnp.stack([stack("bk"), stack("bv"), stack("bf"), stack("b2")],
                     axis=1).reshape(L, 4, C, 1)
    b1 = stack("b1").reshape(L, H, 1)

    kernel = functools.partial(_fused_transformer_kernel, n_heads=n_heads)

    return pl.pallas_call(
        kernel,
        out_shape=jax.ShapeDtypeStruct((B, C, N), x.dtype),
        grid_spec=pltpu.PrefetchScalarGridSpec(
            num_scalar_prefetch=0,
            grid=(B, L),                     # batch (parallel) x layer (carried)
            in_specs=[
                pl.BlockSpec((None, C, N), lambda b, l: (b, 0, 0)),            # x
                pl.BlockSpec((None, n_heads, hs, C), lambda b, l: (l, 0, 0, 0)),  # Wq/head
                pl.BlockSpec((None, n_heads, 1, hs), lambda b, l: (l, 0, 0, 0)),  # bq/head
                pl.BlockSpec((None, C, C), lambda b, l: (l, 0, 0)),            # Wk
                pl.BlockSpec((None, C, C), lambda b, l: (l, 0, 0)),            # Wv
                pl.BlockSpec((None, C, C), lambda b, l: (l, 0, 0)),            # Wf (final_fc)
                pl.BlockSpec((None, H, C), lambda b, l: (l, 0, 0)),            # W1 (fc1)
                pl.BlockSpec((None, C, H), lambda b, l: (l, 0, 0)),            # W2 (fc2)
                pl.BlockSpec((None, 4, C, 1), lambda b, l: (l, 0, 0, 0)),      # bk/bv/bf/b2
                pl.BlockSpec((None, H, 1), lambda b, l: (l, 0, 0)),            # b1
            ],
            out_specs=pl.BlockSpec((None, C, N), lambda b, l: (b, 0, 0)),
            scratch_shapes=[
                pltpu.VMEM((C, N), jnp.float32),    # carried activation
                pltpu.VMEM((C, N), jnp.bfloat16),   # per-head attention concat
            ],
        ),
        compiler_params=pltpu.CompilerParams(
            dimension_semantics=("parallel", "arbitrary")),
    )(x, wqh, bqh, wk, wv, wf, w1, w2, bcol, b1)


def transformer_layer_ref(Q, K, V, p, n_heads):
    """Pure-JAX f32 reference mirroring the PyTorch forward (norms == identity)."""
    B, C, N = Q.shape
    hs = C // n_heads
    lin = lambda x, w, b: x @ w.T + b
    Qt = jnp.swapaxes(Q, 1, 2)
    Kt = jnp.swapaxes(K, 1, 2)
    Vt = jnp.swapaxes(V, 1, 2)
    qp = lin(Qt, p["wq"], p["bq"])
    kp = lin(Kt, p["wk"], p["bk"])
    vp = lin(Vt, p["wv"], p["bv"])
    split = lambda t: t.reshape(B, N, n_heads, hs).transpose(0, 2, 1, 3)
    qh, kh, vh = split(qp), split(kp), split(vp)
    s = jnp.einsum("bhqd,bhkd->bhqk", qh, kh) / math.sqrt(hs)
    w = jax.nn.softmax(s, axis=-1)
    a = jnp.einsum("bhqk,bhkd->bhqd", w, vh)
    a = a.transpose(0, 2, 1, 3).reshape(B, N, C)
    a = lin(a, p["wf"], p["bf"])
    attn = jnp.swapaxes(a, 1, 2)               # MultiHeadAttention returns (B, C, N)
    Q2 = Q + attn                              # norm1 == identity (reference bug)
    x = jnp.swapaxes(Q2, 1, 2)
    hmid = jax.nn.relu(lin(x, p["w1"], p["b1"]))
    ff = jnp.swapaxes(lin(hmid, p["w2"], p["b2"]), 1, 2)
    return Q2 + ff                             # norm2 == identity


def init_layer_params(key, C, H):
    """Deterministic PyTorch-Linear-style init: U(-1/sqrt(fan_in), 1/sqrt(fan_in))."""
    ks = jax.random.split(key, 12)

    def lin(kw, kb, out_f, in_f):
        s = 1.0 / math.sqrt(in_f)
        w = jax.random.uniform(kw, (out_f, in_f), jnp.float32, -s, s)
        b = jax.random.uniform(kb, (out_f,), jnp.float32, -s, s)
        return w, b

    wq, bq = lin(ks[0], ks[1], C, C)
    wk, bk = lin(ks[2], ks[3], C, C)
    wv, bv = lin(ks[4], ks[5], C, C)
    wf, bf = lin(ks[6], ks[7], C, C)
    w1, b1 = lin(ks[8], ks[9], H, C)
    w2, b2 = lin(ks[10], ks[11], C, H)
    return dict(wq=wq, bq=bq, wk=wk, bk=bk, wv=wv, bv=bv, wf=wf, bf=bf,
                w1=w1, b1=b1, w2=w2, b2=b2)


if __name__ == "__main__":
    # ArielNetwork's transformer core runs at feat_size = hidden_dim = 128.
    B, C, N, H, NH = 2, 128, 128, 128, 4   # batch, feat_size, seq, ffn hidden, heads
    key = jax.random.PRNGKey(0)
    kx, k1, k2, k3 = jax.random.split(key, 4)

    x = jax.random.normal(kx, (B, C, N), jnp.float32)
    layer_params = [init_layer_params(k, C, H) for k in (k1, k2, k3)]

    # TODO(synk): the ResidualNet conv backbone, the positionalencoding2d table
    # and the conv/linear output head of ArielNetwork are not translated here;
    # this kernel covers the fused transformer core (selfAtt_1/2/3).
    out = jax.block_until_ready(ariel_transformer_core(x, layer_params, NH))

    ref = x
    for p in layer_params:
        ref = transformer_layer_ref(ref, ref, ref, p, NH)

    assert out.shape == (B, C, N), out.shape
    err = float(jnp.max(jnp.abs(out - ref)))
    ref_scale = float(jnp.max(jnp.abs(ref)))
    # bf16 MXU operands (f32 accumulation), host-side scale fold into bf16 Wq,
    # and approx reciprocal in the softmax => looser tolerance than pure f32.
    assert err <= 4e-2 * max(1.0, ref_scale), f"max abs err {err} (ref max {ref_scale})"
    print("KERNEL_OK")
</pallas_src>

<mosaic_0001>
module attributes {stable_mosaic.version = 11 : i64} {
  func.func @_fused_transformer_kernel(%arg0: i32, %arg1: i32, %arg2: memref<1x128x128xf32, #tpu.memory_space<vmem>>, %arg3: memref<1x4x32x128xbf16, #tpu.memory_space<vmem>>, %arg4: memref<1x4x1x32xf32, #tpu.memory_space<vmem>>, %arg5: memref<1x128x128xbf16, #tpu.memory_space<vmem>>, %arg6: memref<1x128x128xbf16, #tpu.memory_space<vmem>>, %arg7: memref<1x128x128xbf16, #tpu.memory_space<vmem>>, %arg8: memref<1x128x128xbf16, #tpu.memory_space<vmem>>, %arg9: memref<1x128x128xbf16, #tpu.memory_space<vmem>>, %arg10: memref<1x4x128x1xf32, #tpu.memory_space<vmem>>, %arg11: memref<1x128x1xf32, #tpu.memory_space<vmem>>, %arg12: memref<1x128x128xf32, #tpu.memory_space<vmem>>, %arg13: memref<128x128xf32, #tpu.memory_space<vmem>>, %arg14: memref<128x128xbf16, #tpu.memory_space<vmem>>) attributes {dimension_semantics = [#tpu.dimension_semantics<parallel>, #tpu.dimension_semantics<arbitrary>], iteration_bounds = array<i64: 2, 3>, scalar_prefetch = 0 : i64, scratch_operands = 2 : i64, tpu.core_type = #tpu.core_type<tc>, window_params = [{transform_indices = @transform_0, window_bounds = array<i64: 1, 128, 128>}, {transform_indices = @transform_1, window_bounds = array<i64: 1, 4, 32, 128>}, {transform_indices = @transform_2, window_bounds = array<i64: 1, 4, 1, 32>}, {transform_indices = @transform_3, window_bounds = array<i64: 1, 128, 128>}, {transform_indices = @transform_4, window_bounds = array<i64: 1, 128, 128>}, {transform_indices = @transform_5, window_bounds = array<i64: 1, 128, 128>}, {transform_indices = @transform_6, window_bounds = array<i64: 1, 128, 128>}, {transform_indices = @transform_7, window_bounds = array<i64: 1, 128, 128>}, {transform_indices = @transform_8, window_bounds = array<i64: 1, 4, 128, 1>}, {transform_indices = @transform_9, window_bounds = array<i64: 1, 128, 1>}, {transform_indices = @transform_10, window_bounds = array<i64: 1, 128, 128>}]} {
    %c0_i32 = arith.constant 0 : i32
    %0 = arith.cmpi eq, %arg1, %c0_i32 : i32
    %1 = arith.extui %0 : i1 to i32
    %c0_i32_0 = arith.constant 0 : i32
    %2 = arith.cmpi ne, %1, %c0_i32_0 : i32
    scf.if %2 {
      %c0_102 = arith.constant 0 : index
      %c0_103 = arith.constant 0 : index
      %c0_104 = arith.constant 0 : index
      %156 = vector.load %arg2[%c0_102, %c0_103, %c0_104] : memref<1x128x128xf32, #tpu.memory_space<vmem>>, vector<1x128x128xf32>
      %157 = vector.shape_cast %156 : vector<1x128x128xf32> to vector<128x128xf32>
      %c0_105 = arith.constant 0 : index
      %c0_106 = arith.constant 0 : index
      %158 = vector.load %arg13[%c0_105, %c0_106] : memref<128x128xf32, #tpu.memory_space<vmem>>, vector<128x128xf32>
      tpu.vector_store %arg13[%c0_105, %c0_106], %157 {strides = array<i32>} : memref<128x128xf32, #tpu.memory_space<vmem>>, vector<128x128xf32>,
    } else {
    }
    %c0 = arith.constant 0 : index
    %c0_1 = arith.constant 0 : index
    %c0_2 = arith.constant 0 : index
    %c0_3 = arith.constant 0 : index
    %3 = vector.load %arg10[%c0, %c0_1, %c0_2, %c0_3] : memref<1x4x128x1xf32, #tpu.memory_space<vmem>>, vector<1x1x128x1xf32>
    %4 = vector.shape_cast %3 : vector<1x1x128x1xf32> to vector<128x1xf32>
    %c0_4 = arith.constant 0 : index
    %c1 = arith.constant 1 : index
    %c0_5 = arith.constant 0 : index
    %c0_6 = arith.constant 0 : index
    %5 = vector.load %arg10[%c0_4, %c1, %c0_5, %c0_6] : memref<1x4x128x1xf32, #tpu.memory_space<vmem>>, vector<1x1x128x1xf32>
    %6 = vector.shape_cast %5 : vector<1x1x128x1xf32> to vector<128x1xf32>
    %c0_7 = arith.constant 0 : index
    %c2 = arith.constant 2 : index
    %c0_8 = arith.constant 0 : index
    %c0_9 = arith.constant 0 : index
    %7 = vector.load %arg10[%c0_7, %c2, %c0_8, %c0_9] : memref<1x4x128x1xf32, #tpu.memory_space<vmem>>, vector<1x1x128x1xf32>
    %8 = vector.shape_cast %7 : vector<1x1x128x1xf32> to vector<128x1xf32>
    %c0_10 = arith.constant 0 : index
    %c3 = arith.constant 3 : index
    %c0_11 = arith.constant 0 : index
    %c0_12 = arith.constant 0 : index
    %9 = vector.load %arg10[%c0_10, %c3, %c0_11, %c0_12] : memref<1x4x128x1xf32, #tpu.memory_space<vmem>>, vector<1x1x128x1xf32>
    %10 = vector.shape_cast %9 : vector<1x1x128x1xf32> to vector<128x1xf32>
    %c0_13 = arith.constant 0 : index
    %c0_14 = arith.constant 0 : index
    %11 = vector.load %arg13[%c0_13, %c0_14] : memref<128x128xf32, #tpu.memory_space<vmem>>, vector<128x128xf32>
    %12 = arith.truncf %11 : vector<128x128xf32> to vector<128x128xbf16>
    %13 = tpu.transpose %11, [1, 0] : vector<128x128xf32> -> vector<128x128xf32>
    %14 = arith.truncf %13 : vector<128x128xf32> to vector<128x128xbf16>
    %c0_15 = arith.constant 0 : index
    %c0_16 = arith.constant 0 : index
    %c0_17 = arith.constant 0 : index
    %15 = vector.load %arg5[%c0_15, %c0_16, %c0_17] : memref<1x128x128xbf16, #tpu.memory_space<vmem>>, vector<1x128x128xbf16>
    %16 = vector.shape_cast %15 : vector<1x128x128xbf16> to vector<128x128xbf16>
    %cst = arith.constant dense<0.000000e+00> : vector<128x128xf32>
    %17 = tpu.matmul %16, %12, %cst {dimension_numbers = #tpu.dot_dimension_numbers<[1], [0], [0], [1], [0, 0, 1, 1], [], []>} : vector<128x128xbf16>, vector<128x128xbf16>, vector<128x128xf32> -> vector<128x128xf32>
    %18 = vector.broadcast %4 : vector<128x1xf32> to vector<128x128xf32>
    %19 = arith.addf %17, %18 : vector<128x128xf32>
    %20 = arith.truncf %19 : vector<128x128xf32> to vector<128x128xbf16>
    %c0_18 = arith.constant 0 : index
    %c0_19 = arith.constant 0 : index
    %c0_20 = arith.constant 0 : index
    %21 = vector.load %arg6[%c0_18, %c0_19, %c0_20] : memref<1x128x128xbf16, #tpu.memory_space<vmem>>, vector<1x128x128xbf16>
    %22 = vector.shape_cast %21 : vector<1x128x128xbf16> to vector<128x128xbf16>
    %cst_21 = arith.constant dense<0.000000e+00> : vector<128x128xf32>
    %23 = tpu.matmul %22, %12, %cst_21 {dimension_numbers = #tpu.dot_dimension_numbers<[1], [0], [0], [1], [0, 0, 1, 1], [], []>} : vector<128x128xbf16>, vector<128x128xbf16>, vector<128x128xf32> -> vector<128x128xf32>
    %24 = vector.broadcast %6 : vector<128x1xf32> to vector<128x128xf32>
    %25 = arith.addf %23, %24 : vector<128x128xf32>
    %26 = arith.truncf %25 : vector<128x128xf32> to vector<128x128xbf16>
    %c0_22 = arith.constant 0 : index
    %c0_23 = arith.constant 0 : index
    %c0_24 = arith.constant 0 : index
    %c0_25 = arith.constant 0 : index
    %27 = vector.load %arg3[%c0_22, %c0_23, %c0_24, %c0_25] : memref<1x4x32x128xbf16, #tpu.memory_space<vmem>>, vector<1x1x32x128xbf16>
    %28 = vector.shape_cast %27 : vector<1x1x32x128xbf16> to vector<32x128xbf16>
    %cst_26 = arith.constant dense<0.000000e+00> : vector<128x32xf32>
    %29 = tpu.matmul %14, %28, %cst_26 {dimension_numbers = #tpu.dot_dimension_numbers<[1], [1], [0], [0], [0, 0, 1, 0], [], []>} : vector<128x128xbf16>, vector<32x128xbf16>, vector<128x32xf32> -> vector<128x32xf32>
    %c0_27 = arith.constant 0 : index
    %c0_28 = arith.constant 0 : index
    %c0_29 = arith.constant 0 : index
    %c0_30 = arith.constant 0 : index
    %30 = vector.load %arg4[%c0_27, %c0_28, %c0_29, %c0_30] : memref<1x4x1x32xf32, #tpu.memory_space<vmem>>, vector<1x1x1x32xf32>
    %31 = vector.shape_cast %30 : vector<1x1x1x32xf32> to vector<1x32xf32>
    %32 = vector.broadcast %31 : vector<1x32xf32> to vector<128x32xf32>
    %33 = arith.addf %29, %32 : vector<128x32xf32>
    %34 = arith.truncf %33 : vector<128x32xf32> to vector<128x32xbf16>
    %35 = vector.extract_strided_slice %20 {offsets = [0, 0], sizes = [32, 128], strides = [1, 1]} : vector<128x128xbf16> to vector<32x128xbf16>
    %36 = vector.extract_strided_slice %26 {offsets = [0, 0], sizes = [32, 128], strides = [1, 1]} : vector<128x128xbf16> to vector<32x128xbf16>
    %cst_31 = arith.constant dense<0.000000e+00> : vector<128x128xf32>
    %37 = tpu.matmul %34, %35, %cst_31 {dimension_numbers = #tpu.dot_dimension_numbers<[1], [0], [0], [1], [0, 0, 1, 1], [], []>} : vector<128x32xbf16>, vector<32x128xbf16>, vector<128x128xf32> -> vector<128x128xf32>
    %cst_32 = arith.constant dense<0xFF800000> : vector<128xf32>
    %38 = vector.multi_reduction <maximumf>, %37, %cst_32 [1] : vector<128x128xf32> to vector<128xf32>
    %39 = vector.shape_cast %38 : vector<128xf32> to vector<128x1xf32>
    %40 = vector.broadcast %39 : vector<128x1xf32> to vector<128x128xf32>
    %41 = arith.subf %37, %40 : vector<128x128xf32>
    %42 = math.exp %41 : vector<128x128xf32>
    %cst_33 = arith.constant dense<0.000000e+00> : vector<128xf32>
    %43 = vector.multi_reduction <add>, %42, %cst_33 [1] : vector<128x128xf32> to vector<128xf32>
    %44 = vector.shape_cast %43 : vector<128xf32> to vector<128x1xf32>
    %45 = tpu.reciprocal %44 {approx = true} : vector<128x1xf32> -> vector<128x1xf32>
    %46 = vector.broadcast %45 : vector<128x1xf32> to vector<128x128xf32>
    %47 = arith.mulf %42, %46 : vector<128x128xf32>
    %48 = arith.truncf %47 : vector<128x128xf32> to vector<128x128xbf16>
    %cst_34 = arith.constant dense<0.000000e+00> : vector<32x128xf32>
    %49 = tpu.matmul %36, %48, %cst_34 {dimension_numbers = #tpu.dot_dimension_numbers<[1], [1], [0], [0], [0, 0, 1, 0], [], []>} : vector<32x128xbf16>, vector<128x128xbf16>, vector<32x128xf32> -> vector<32x128xf32>
    %50 = arith.truncf %49 : vector<32x128xf32> to vector<32x128xbf16>
    %c0_35 = arith.constant 0 : index
    %c0_36 = arith.constant 0 : index
    %51 = vector.load %arg14[%c0_35, %c0_36] : memref<128x128xbf16, #tpu.memory_space<vmem>>, vector<32x128xbf16>
    tpu.vector_store %arg14[%c0_35, %c0_36], %50 {strides = array<i32>} : memref<128x128xbf16, #tpu.memory_space<vmem>>, vector<32x128xbf16>,
    %c0_37 = arith.constant 0 : index
    %c1_38 = arith.constant 1 : index
    %c0_39 = arith.constant 0 : index
    %c0_40 = arith.constant 0 : index
    %52 = vector.load %arg3[%c0_37, %c1_38, %c0_39, %c0_40] : memref<1x4x32x128xbf16, #tpu.memory_space<vmem>>, vector<1x1x32x128xbf16>
    %53 = vector.shape_cast %52 : vector<1x1x32x128xbf16> to vector<32x128xbf16>
    %cst_41 = arith.constant dense<0.000000e+00> : vector<128x32xf32>
    %54 = tpu.matmul %14, %53, %cst_41 {dimension_numbers = #tpu.dot_dimension_numbers<[1], [1], [0], [0], [0, 0, 1, 0], [], []>} : vector<128x128xbf16>, vector<32x128xbf16>, vector<128x32xf32> -> vector<128x32xf32>
    %c0_42 = arith.constant 0 : index
    %c1_43 = arith.constant 1 : index
    %c0_44 = arith.constant 0 : index
    %c0_45 = arith.constant 0 : index
    %55 = vector.load %arg4[%c0_42, %c1_43, %c0_44, %c0_45] : memref<1x4x1x32xf32, #tpu.memory_space<vmem>>, vector<1x1x1x32xf32>
    %56 = vector.shape_cast %55 : vector<1x1x1x32xf32> to vector<1x32xf32>
    %57 = vector.broadcast %56 : vector<1x32xf32> to vector<128x32xf32>
    %58 = arith.addf %54, %57 : vector<128x32xf32>
    %59 = arith.truncf %58 : vector<128x32xf32> to vector<128x32xbf16>
    %60 = vector.extract_strided_slice %20 {offsets = [32, 0], sizes = [32, 128], strides = [1, 1]} : vector<128x128xbf16> to vector<32x128xbf16>
    %61 = vector.extract_strided_slice %26 {offsets = [32, 0], sizes = [32, 128], strides = [1, 1]} : vector<128x128xbf16> to vector<32x128xbf16>
    %cst_46 = arith.constant dense<0.000000e+00> : vector<128x128xf32>
    %62 = tpu.matmul %59, %60, %cst_46 {dimension_numbers = #tpu.dot_dimension_numbers<[1], [0], [0], [1], [0, 0, 1, 1], [], []>} : vector<128x32xbf16>, vector<32x128xbf16>, vector<128x128xf32> -> vector<128x128xf32>
    %cst_47 = arith.constant dense<0xFF800000> : vector<128xf32>
    %63 = vector.multi_reduction <maximumf>, %62, %cst_47 [1] : vector<128x128xf32> to vector<128xf32>
    %64 = vector.shape_cast %63 : vector<128xf32> to vector<128x1xf32>
    %65 = vector.broadcast %64 : vector<128x1xf32> to vector<128x128xf32>
    %66 = arith.subf %62, %65 : vector<128x128xf32>
    %67 = math.exp %66 : vector<128x128xf32>
    %cst_48 = arith.constant dense<0.000000e+00> : vector<128xf32>
    %68 = vector.multi_reduction <add>, %67, %cst_48 [1] : vector<128x128xf32> to vector<128xf32>
    %69 = vector.shape_cast %68 : vector<128xf32> to vector<128x1xf32>
    %70 = tpu.reciprocal %69 {approx = true} : vector<128x1xf32> -> vector<128x1xf32>
    %71 = vector.broadcast %70 : vector<128x1xf32> to vector<128x128xf32>
    %72 = arith.mulf %67, %71 : vector<128x128xf32>
    %73 = arith.truncf %72 : vector<128x128xf32> to vector<128x128xbf16>
    %cst_49 = arith.constant dense<0.000000e+00> : vector<32x128xf32>
    %74 = tpu.matmul %61, %73, %cst_49 {dimension_numbers = #tpu.dot_dimension_numbers<[1], [1], [0], [0], [0, 0, 1, 0], [], []>} : vector<32x128xbf16>, vector<128x128xbf16>, vector<32x128xf32> -> vector<32x128xf32>
    %75 = arith.truncf %74 : vector<32x128xf32> to vector<32x128xbf16>
    %c32 = arith.constant 32 : index
    %c0_50 = arith.constant 0 : index
    %76 = vector.load %arg14[%c32, %c0_50] : memref<128x128xbf16, #tpu.memory_space<vmem>>, vector<32x128xbf16>
    tpu.vector_store %arg14[%c32, %c0_50], %75 {strides = array<i32>} : memref<128x128xbf16, #tpu.memory_space<vmem>>, vector<32x128xbf16>,
    %c0_51 = arith.constant 0 : index
    %c2_52 = arith.constant 2 : index
    %c0_53 = arith.constant 0 : index
    %c0_54 = arith.constant 0 : index
    %77 = vector.load %arg3[%c0_51, %c2_52, %c0_53, %c0_54] : memref<1x4x32x128xbf16, #tpu.memory_space<vmem>>, vector<1x1x32x128xbf16>
    %78 = vector.shape_cast %77 : vector<1x1x32x128xbf16> to vector<32x128xbf16>
    %cst_55 = arith.constant dense<0.000000e+00> : vector<128x32xf32>
    %79 = tpu.matmul %14, %78, %cst_55 {dimension_numbers = #tpu.dot_dimension_numbers<[1], [1], [0], [0], [0, 0, 1, 0], [], []>} : vector<128x128xbf16>, vector<32x128xbf16>, vector<128x32xf32> -> vector<128x32xf32>
    %c0_56 = arith.constant 0 : index
    %c2_57 = arith.constant 2 : index
    %c0_58 = arith.constant 0 : index
    %c0_59 = arith.constant 0 : index
    %80 = vector.load %arg4[%c0_56, %c2_57, %c0_58, %c0_59] : memref<1x4x1x32xf32, #tpu.memory_space<vmem>>, vector<1x1x1x32xf32>
    %81 = vector.shape_cast %80 : vector<1x1x1x32xf32> to vector<1x32xf32>
    %82 = vector.broadcast %81 : vector<1x32xf32> to vector<128x32xf32>
    %83 = arith.addf %79, %82 : vector<128x32xf32>
    %84 = arith.truncf %83 : vector<128x32xf32> to vector<128x32xbf16>
    %85 = vector.extract_strided_slice %20 {offsets = [64, 0], sizes = [32, 128], strides = [1, 1]} : vector<128x128xbf16> to vector<32x128xbf16>
    %86 = vector.extract_strided_slice %26 {offsets = [64, 0], sizes = [32, 128], strides = [1, 1]} : vector<128x128xbf16> to vector<32x128xbf16>
    %cst_60 = arith.constant dense<0.000000e+00> : vector<128x128xf32>
    %87 = tpu.matmul %84, %85, %cst_60 {dimension_numbers = #tpu.dot_dimension_numbers<[1], [0], [0], [1], [0, 0, 1, 1], [], []>} : vector<128x32xbf16>, vector<32x128xbf16>, vector<128x128xf32> -> vector<128x128xf32>
    %cst_61 = arith.constant dense<0xFF800000> : vector<128xf32>
    %88 = vector.multi_reduction <maximumf>, %87, %cst_61 [1] : vector<128x128xf32> to vector<128xf32>
    %89 = vector.shape_cast %88 : vector<128xf32> to vector<128x1xf32>
    %90 = vector.broadcast %89 : vector<128x1xf32> to vector<128x128xf32>
    %91 = arith.subf %87, %90 : vector<128x128xf32>
    %92 = math.exp %91 : vector<128x128xf32>
    %cst_62 = arith.constant dense<0.000000e+00> : vector<128xf32>
    %93 = vector.multi_reduction <add>, %92, %cst_62 [1] : vector<128x128xf32> to vector<128xf32>
    %94 = vector.shape_cast %93 : vector<128xf32> to vector<128x1xf32>
    %95 = tpu.reciprocal %94 {approx = true} : vector<128x1xf32> -> vector<128x1xf32>
    %96 = vector.broadcast %95 : vector<128x1xf32> to vector<128x128xf32>
    %97 = arith.mulf %92, %96 : vector<128x128xf32>
    %98 = arith.truncf %97 : vector<128x128xf32> to vector<128x128xbf16>
    %cst_63 = arith.constant dense<0.000000e+00> : vector<32x128xf32>
    %99 = tpu.matmul %86, %98, %cst_63 {dimension_numbers = #tpu.dot_dimension_numbers<[1], [1], [0], [0], [0, 0, 1, 0], [], []>} : vector<32x128xbf16>, vector<128x128xbf16>, vector<32x128xf32> -> vector<32x128xf32>
    %100 = arith.truncf %99 : vector<32x128xf32> to vector<32x128xbf16>
    %c64 = arith.constant 64 : index
    %c0_64 = arith.constant 0 : index
    %101 = vector.load %arg14[%c64, %c0_64] : memref<128x128xbf16, #tpu.memory_space<vmem>>, vector<32x128xbf16>
    tpu.vector_store %arg14[%c64, %c0_64], %100 {strides = array<i32>} : memref<128x128xbf16, #tpu.memory_space<vmem>>, vector<32x128xbf16>,
    %c0_65 = arith.constant 0 : index
    %c3_66 = arith.constant 3 : index
    %c0_67 = arith.constant 0 : index
    %c0_68 = arith.constant 0 : index
    %102 = vector.load %arg3[%c0_65, %c3_66, %c0_67, %c0_68] : memref<1x4x32x128xbf16, #tpu.memory_space<vmem>>, vector<1x1x32x128xbf16>
    %103 = vector.shape_cast %102 : vector<1x1x32x128xbf16> to vector<32x128xbf16>
    %cst_69 = arith.constant dense<0.000000e+00> : vector<128x32xf32>
    %104 = tpu.matmul %14, %103, %cst_69 {dimension_numbers = #tpu.dot_dimension_numbers<[1], [1], [0], [0], [0, 0, 1, 0], [], []>} : vector<128x128xbf16>, vector<32x128xbf16>, vector<128x32xf32> -> vector<128x32xf32>
    %c0_70 = arith.constant 0 : index
    %c3_71 = arith.constant 3 : index
    %c0_72 = arith.constant 0 : index
    %c0_73 = arith.constant 0 : index
    %105 = vector.load %arg4[%c0_70, %c3_71, %c0_72, %c0_73] : memref<1x4x1x32xf32, #tpu.memory_space<vmem>>, vector<1x1x1x32xf32>
    %106 = vector.shape_cast %105 : vector<1x1x1x32xf32> to vector<1x32xf32>
    %107 = vector.broadcast %106 : vector<1x32xf32> to vector<128x32xf32>
    %108 = arith.addf %104, %107 : vector<128x32xf32>
    %109 = arith.truncf %108 : vector<128x32xf32> to vector<128x32xbf16>
    %110 = vector.extract_strided_slice %20 {offsets = [96, 0], sizes = [32, 128], strides = [1, 1]} : vector<128x128xbf16> to vector<32x128xbf16>
    %111 = vector.extract_strided_slice %26 {offsets = [96, 0], sizes = [32, 128], strides = [1, 1]} : vector<128x128xbf16> to vector<32x128xbf16>
    %cst_74 = arith.constant dense<0.000000e+00> : vector<128x128xf32>
    %112 = tpu.matmul %109, %110, %cst_74 {dimension_numbers = #tpu.dot_dimension_numbers<[1], [0], [0], [1], [0, 0, 1, 1], [], []>} : vector<128x32xbf16>, vector<32x128xbf16>, vector<128x128xf32> -> vector<128x128xf32>
    %cst_75 = arith.constant dense<0xFF800000> : vector<128xf32>
    %113 = vector.multi_reduction <maximumf>, %112, %cst_75 [1] : vector<128x128xf32> to vector<128xf32>
    %114 = vector.shape_cast %113 : vector<128xf32> to vector<128x1xf32>
    %115 = vector.broadcast %114 : vector<128x1xf32> to vector<128x128xf32>
    %116 = arith.subf %112, %115 : vector<128x128xf32>
    %117 = math.exp %116 : vector<128x128xf32>
    %cst_76 = arith.constant dense<0.000000e+00> : vector<128xf32>
    %118 = vector.multi_reduction <add>, %117, %cst_76 [1] : vector<128x128xf32> to vector<128xf32>
    %119 = vector.shape_cast %118 : vector<128xf32> to vector<128x1xf32>
    %120 = tpu.reciprocal %119 {approx = true} : vector<128x1xf32> -> vector<128x1xf32>
    %121 = vector.broadcast %120 : vector<128x1xf32> to vector<128x128xf32>
    %122 = arith.mulf %117, %121 : vector<128x128xf32>
    %123 = arith.truncf %122 : vector<128x128xf32> to vector<128x128xbf16>
    %cst_77 = arith.constant dense<0.000000e+00> : vector<32x128xf32>
    %124 = tpu.matmul %111, %123, %cst_77 {dimension_numbers = #tpu.dot_dimension_numbers<[1], [1], [0], [0], [0, 0, 1, 0], [], []>} : vector<32x128xbf16>, vector<128x128xbf16>, vector<32x128xf32> -> vector<32x128xf32>
    %125 = arith.truncf %124 : vector<32x128xf32> to vector<32x128xbf16>
    %c96 = arith.constant 96 : index
    %c0_78 = arith.constant 0 : index
    %126 = vector.load %arg14[%c96, %c0_78] : memref<128x128xbf16, #tpu.memory_space<vmem>>, vector<32x128xbf16>
    tpu.vector_store %arg14[%c96, %c0_78], %125 {strides = array<i32>} : memref<128x128xbf16, #tpu.memory_space<vmem>>, vector<32x128xbf16>,
    %c0_79 = arith.constant 0 : index
    %c0_80 = arith.constant 0 : index
    %c0_81 = arith.constant 0 : index
    %127 = vector.load %arg7[%c0_79, %c0_80, %c0_81] : memref<1x128x128xbf16, #tpu.memory_space<vmem>>, vector<1x128x128xbf16>
    %128 = vector.shape_cast %127 : vector<1x128x128xbf16> to vector<128x128xbf16>
    %c0_82 = arith.constant 0 : index
    %c0_83 = arith.constant 0 : index
    %129 = vector.load %arg14[%c0_82, %c0_83] : memref<128x128xbf16, #tpu.memory_space<vmem>>, vector<128x128xbf16>
    %cst_84 = arith.constant dense<0.000000e+00> : vector<128x128xf32>
    %130 = tpu.matmul %128, %129, %cst_84 {dimension_numbers = #tpu.dot_dimension_numbers<[1], [0], [0], [1], [0, 0, 1, 1], [], []>} : vector<128x128xbf16>, vector<128x128xbf16>, vector<128x128xf32> -> vector<128x128xf32>
    %131 = vector.broadcast %8 : vector<128x1xf32> to vector<128x128xf32>
    %132 = arith.addf %130, %131 : vector<128x128xf32>
    %c0_85 = arith.constant 0 : index
    %c0_86 = arith.constant 0 : index
    %133 = vector.load %arg13[%c0_85, %c0_86] : memref<128x128xf32, #tpu.memory_space<vmem>>, vector<128x128xf32>
    %134 = arith.addf %133, %132 : vector<128x128xf32>
    %c0_87 = arith.constant 0 : index
    %c0_88 = arith.constant 0 : index
    %c0_89 = arith.constant 0 : index
    %135 = vector.load %arg8[%c0_87, %c0_88, %c0_89] : memref<1x128x128xbf16, #tpu.memory_space<vmem>>, vector<1x128x128xbf16>
    %136 = vector.shape_cast %135 : vector<1x128x128xbf16> to vector<128x128xbf16>
    %137 = arith.truncf %134 : vector<128x128xf32> to vector<128x128xbf16>
    %cst_90 = arith.constant dense<0.000000e+00> : vector<128x128xf32>
    %138 = tpu.matmul %136, %137, %cst_90 {dimension_numbers = #tpu.dot_dimension_numbers<[1], [0], [0], [1], [0, 0, 1, 1], [], []>} : vector<128x128xbf16>, vector<128x128xbf16>, vector<128x128xf32> -> vector<128x128xf32>
    %c0_91 = arith.constant 0 : index
    %c0_92 = arith.constant 0 : index
    %c0_93 = arith.constant 0 : index
    %139 = vector.load %arg11[%c0_91, %c0_92, %c0_93] : memref<1x128x1xf32, #tpu.memory_space<vmem>>, vector<1x128x1xf32>
    %140 = vector.shape_cast %139 : vector<1x128x1xf32> to vector<128x1xf32>
    %141 = vector.broadcast %140 : vector<128x1xf32> to vector<128x128xf32>
    %142 = arith.addf %138, %141 : vector<128x128xf32>
    %cst_94 = arith.constant 0.000000e+00 : f32
    %143 = vector.broadcast %cst_94 : f32 to vector<128x128xf32>
    %144 = arith.maximumf %142, %143 : vector<128x128xf32>
    %c0_95 = arith.constant 0 : index
    %c0_96 = arith.constant 0 : index
    %c0_97 = arith.constant 0 : index
    %145 = vector.load %arg9[%c0_95, %c0_96, %c0_97] : memref<1x128x128xbf16, #tpu.memory_space<vmem>>, vector<1x128x128xbf16>
    %146 = vector.shape_cast %145 : vector<1x128x128xbf16> to vector<128x128xbf16>
    %147 = arith.truncf %144 : vector<128x128xf32> to vector<128x128xbf16>
    %cst_98 = arith.constant dense<0.000000e+00> : vector<128x128xf32>
    %148 = tpu.matmul %146, %147, %cst_98 {dimension_numbers = #tpu.dot_dimension_numbers<[1], [0], [0], [1], [0, 0, 1, 1], [], []>} : vector<128x128xbf16>, vector<128x128xbf16>, vector<128x128xf32> -> vector<128x128xf32>
    %149 = vector.broadcast %10 : vector<128x1xf32> to vector<128x128xf32>
    %150 = arith.addf %148, %149 : vector<128x128xf32>
    %151 = arith.addf %134, %150 : vector<128x128xf32>
    %c0_99 = arith.constant 0 : index
    %c0_100 = arith.constant 0 : index
    %152 = vector.load %arg13[%c0_99, %c0_100] : memref<128x128xf32, #tpu.memory_space<vmem>>, vector<128x128xf32>
    tpu.vector_store %arg13[%c0_99, %c0_100], %151 {strides = array<i32>} : memref<128x128xf32, #tpu.memory_space<vmem>>, vector<128x128xf32>,
    %c2_i32 = arith.constant 2 : i32
    %153 = arith.cmpi eq, %arg1, %c2_i32 : i32
    %154 = arith.extui %153 : i1 to i32
    %c0_i32_101 = arith.constant 0 : i32
    %155 = arith.cmpi ne, %154, %c0_i32_101 : i32
    scf.if %155 {
      %c0_102 = arith.constant 0 : index
      %c0_103 = arith.constant 0 : index
      %c0_104 = arith.constant 0 : index
      %156 = vector.load %arg12[%c0_102, %c0_103, %c0_104] : memref<1x128x128xf32, #tpu.memory_space<vmem>>, vector<1x128x128xf32>
      %157 = vector.shape_cast %156 : vector<1x128x128xf32> to vector<128x128xf32>
      %158 = vector.shape_cast %151 : vector<128x128xf32> to vector<1x128x128xf32>
      tpu.vector_store %arg12[%c0_102, %c0_103, %c0_104], %158 {strides = array<i32>} : memref<1x128x128xf32, #tpu.memory_space<vmem>>, vector<1x128x128xf32>,
    } else {
    }
    return
  }
  func.func @transform_0(%arg0: i32, %arg1: i32) -> (i32, i32, i32) {
    %c0_i32 = arith.constant 0 : i32
    %c0_i32_0 = arith.constant 0 : i32
    %c0_i32_1 = arith.constant 0 : i32
    return %arg0, %c0_i32, %c0_i32_0 : i32, i32, i32
  }
  func.func @transform_1(%arg0: i32, %arg1: i32) -> (i32, i32, i32, i32) {
    %c0_i32 = arith.constant 0 : i32
    %c0_i32_0 = arith.constant 0 : i32
    %c0_i32_1 = arith.constant 0 : i32
    %c0_i32_2 = arith.constant 0 : i32
    return %arg1, %c0_i32, %c0_i32_0, %c0_i32_1 : i32, i32, i32, i32
  }
  func.func @transform_2(%arg0: i32, %arg1: i32) -> (i32, i32, i32, i32) {
    %c0_i32 = arith.constant 0 : i32
    %c0_i32_0 = arith.constant 0 : i32
    %c0_i32_1 = arith.constant 0 : i32
    %c0_i32_2 = arith.constant 0 : i32
    return %arg1, %c0_i32, %c0_i32_0, %c0_i32_1 : i32, i32, i32, i32
  }
  func.func @transform_3(%arg0: i32, %arg1: i32) -> (i32, i32, i32) {
    %c0_i32 = arith.constant 0 : i32
    %c0_i32_0 = arith.constant 0 : i32
    %c0_i32_1 = arith.constant 0 : i32
    return %arg1, %c0_i32, %c0_i32_0 : i32, i32, i32
  }
  func.func @transform_4(%arg0: i32, %arg1: i32) -> (i32, i32, i32) {
    %c0_i32 = arith.constant 0 : i32
    %c0_i32_0 = arith.constant 0 : i32
    %c0_i32_1 = arith.constant 0 : i32
    return %arg1, %c0_i32, %c0_i32_0 : i32, i32, i32
  }
  func.func @transform_5(%arg0: i32, %arg1: i32) -> (i32, i32, i32) {
    %c0_i32 = arith.constant 0 : i32
    %c0_i32_0 = arith.constant 0 : i32
    %c0_i32_1 = arith.constant 0 : i32
    return %arg1, %c0_i32, %c0_i32_0 : i32, i32, i32
  }
  func.func @transform_6(%arg0: i32, %arg1: i32) -> (i32, i32, i32) {
    %c0_i32 = arith.constant 0 : i32
    %c0_i32_0 = arith.constant 0 : i32
    %c0_i32_1 = arith.constant 0 : i32
    return %arg1, %c0_i32, %c0_i32_0 : i32, i32, i32
  }
  func.func @transform_7(%arg0: i32, %arg1: i32) -> (i32, i32, i32) {
    %c0_i32 = arith.constant 0 : i32
    %c0_i32_0 = arith.constant 0 : i32
    %c0_i32_1 = arith.constant 0 : i32
    return %arg1, %c0_i32, %c0_i32_0 : i32, i32, i32
  }
  func.func @transform_8(%arg0: i32, %arg1: i32) -> (i32, i32, i32, i32) {
    %c0_i32 = arith.constant 0 : i32
    %c0_i32_0 = arith.constant 0 : i32
    %c0_i32_1 = arith.constant 0 : i32
    %c0_i32_2 = arith.constant 0 : i32
    return %arg1, %c0_i32, %c0_i32_0, %c0_i32_1 : i32, i32, i32, i32
  }
  func.func @transform_9(%arg0: i32, %arg1: i32) -> (i32, i32, i32) {
    %c0_i32 = arith.constant 0 : i32
    %c0_i32_0 = arith.constant 0 : i32
    %c0_i32_1 = arith.constant 0 : i32
    return %arg1, %c0_i32, %c0_i32_0 : i32, i32, i32
  }
  func.func @transform_10(%arg0: i32, %arg1: i32) -> (i32, i32, i32) {
    %c0_i32 = arith.constant 0 : i32
    %c0_i32_0 = arith.constant 0 : i32
    %c0_i32_1 = arith.constant 0 : i32
    return %arg0, %c0_i32, %c0_i32_0 : i32, i32, i32
  }
}

</mosaic_0001>

<bundles_post_ra>
// kernel: tpu_custom_call.1
= control target key start
LH: loop header
LB: loop body
LE: loop exit
PB: predicated region body
PF: predicated region fallthrough
CT: control target
= control target key end

     0   :  { %s5593_s0 = inlined_call_operand.vmem [shape: f32[2,128,128], index: 0, kind: input, shape index: {}]   ;;  %s5594_s1 = inlined_call_operand.vmem [shape: bf16[3,4,32,128], index: 1, kind: input, shape index: {}]   ;;  %s5595_s2 = inlined_call_operand.vmem [shape: f32[3,4,1,32], index: 2, kind: input, shape index: {}]   ;;  %s5596_s3 = inlined_call_operand.vmem [shape: bf16[3,128,128], index: 3, kind: input, shape index: {}]   ;;  %s5597_s4 = inlined_call_operand.vmem [shape: bf16[3,128,128], index: 4, kind: input, shape index: {}]   ;;  %s5598_s5 = inlined_call_operand.vmem [shape: bf16[3,128,128], index: 5, kind: input, shape index: {}]   ;;  %s5599_s6 = inlined_call_operand.vmem [shape: bf16[3,128,128], index: 6, kind: input, shape index: {}]   ;;  %s5600_s7 = inlined_call_operand.vmem [shape: bf16[3,128,128], index: 7, kind: input, shape index: {}]   ;;  %s5601_s8 = inlined_call_operand.vmem [shape: f32[3,4,128,1], index: 8, kind: input, shape index: {}]   ;;  %s5602_s9 = inlined_call_operand.vmem [shape: f32[3,128,1], index: 9, kind: input, shape index: {}]   ;;  %s5603_s10 = inlined_call_operand.hbm [shape: f32[2,128,128], index: 10, kind: output, shape index: {}]  }
   0x1   :  { %5616 = sst [smem:[#allocation17_spill]] %s5593_s0 }
   0x2   :  { %5617 = sst [smem:[#allocation18_spill]] %s5594_s1 }
   0x3   :  { %5618 = sst [smem:[#allocation19_spill]] %s5595_s2 }
   0x4   :  { %5619 = sst [smem:[#allocation20_spill]] %s5596_s3 }
   0x5   :  { %5620 = sst [smem:[#allocation21_spill]] %s5597_s4 }
   0x6   :  { %5621 = sst [smem:[#allocation22_spill]] %s5603_s10 }
   0x7   :  { %15 = vsyncpa [#allocation5], 0 }
   0x8   :  { %17 = vsyncpa [#allocation5 + $0x1], 0  ;;  %s4481_s13 = smov 0   ;;  %s4483_s14 = smov 0  }
   0x9   :  { %s4485_s15 = smov 0   ;;  %s4487_s16 = smov 0  }
   0xa   :  { %s4489_s17 = smov 0   ;;  %s4491_s18 = smov 0  }
   0xb   :  { %s4493_s19 = smov 0   ;;  %s4495_s20 = smov 0  }
   0xc LB: > { %5622 = sst [smem:[#allocation7_spill]] %s4393_s13  ;;  %s3524_s21 = sadd.s32 4294967295, %s4421_s20   ;;  %s4421_s20 = sphi %s4495_s20, %s23_s20   ;;  %s4417_s19 = sphi %s4493_s19, %s5650_s19   ;;  %s4413_s18 = sphi %s4491_s18, %s5649_s18   ;;  %s4409_s17 = sphi %s4489_s17, %s5648_s17   ;;  %s4405_s16 = sphi %s4487_s16, %s5647_s16   ;;  %s4401_s15 = sphi %s4485_s15, %s5646_s15   ;;  %s4397_s14 = sphi %s4483_s14, %s5652_s14   ;;  %s4393_s13 = sphi %s4481_s13, %s5651_s13  }
   0xd   : > { %5623 = sst [smem:[#allocation8_spill]] %s4401_s15  ;;  %s3525_s22 = sadd.s32 4294967294, %s4421_s20  }
   0xe   : > { %5624 = sst [smem:[#allocation9_spill]] %s4413_s18  ;;  %s32_s23 = sadd.s32 1, %s4413_s18 }
   0xf   : > { %5625 = sst [smem:[#allocation10_spill]] %s4417_s19  ;;  %p33_p0 = scmp.ge.s32.totalorder %s32_s23, 3 }
  0x10   : > { %5626 = sst [smem:[#allocation11_spill]] %s4421_s20  ;;  %s35_s24 = sadd.s32 1, %s4417_s19 }
  0x11   : > { %p312_p1 = scmp.ne.s32.totalorder %s4401_s15, %s4397_s14  ;;  %p313_p2 = scmp.eq.s32.totalorder %s3524_s21, 5 }
  0x12   : > { %s5654_s23 = smov (%p33_p0, %s32_s23), 0  ;;  %s5656_s24 = smov (!%p33_p0, %s35_s24), %s4417_s19 }
  0x13   : > { %5627 = sst [smem:[#allocation12_spill]] %s5654_s23  ;;  %p4530_p3 = por %p313_p2, %p312_p1 }
  0x14   : > { %p318_p4 = scmp.ne.s32.totalorder %s4397_s14, %s4393_s13  ;;  %p37_p5 = scmp.ge.s32.totalorder %s5656_s24, 2 }
  0x15   : > { %s5628_s25 = scalar_select %p4530_p3, 1, 0 }
  0x16   : > { %p319_p6 = scmp.eq.s32.totalorder %s3525_s22, 5  ;;  %p3528_p7 = scmp.ge.s32.totalorder %s4421_s20, 1 }
  0x17   : > { %5629 = sst [smem:[#allocation13_spill]] %s5628_s25  ;;  %p416_p8 = scmp.lt.s32.totalorder %s4421_s20, 7 }
  0x18   : > { %s5658_s24 = smov (%p37_p5, %s5656_s24), 0  ;;  %p4540_p9 = por %p319_p6, %p318_p4 }
  0x19   : > { %5630 = sst [smem:[#allocation14_spill]] %s5658_s24  ;;  %p417_p10 = pnand %p3528_p7, %p416_p8 }
  0x1a   : > { %s5631_s26 = scalar_select %p4540_p9, 1, 0 }
  0x1b   : > { %s299_s27 = ssub.s32 %s4417_s19, %s5658_s24  ;;  %s302_s28 = sadd.s32 1, %s4401_s15 }
  0x1c   : > { %5632 = sst [smem:[#allocation15_spill]] %s5631_s26  ;;  %p300_p11 = scmp.eq.s32.totalorder %s299_s27, 0 }
  0x1d   : > { %420 = sbr.rel (%p417_p10) target bundleno = 3504 (0xdb0), region = 60  ;;  %s5610_s30 = sand.u32 (!%p417_p10), 1, %s4397_s14  }
  0x1e   : > { %s4548_s29 = scalar_select %p300_p11, %s4401_s15, %s302_s28  }
  0x1f   : > { %p498_p12 = scmp.lt.s32.totalorder (!%p417_p10), %s4409_s17, 1  ;;  %s3529_s11 = sshll.u32 (!%p417_p10), %s5610_s30, 7 }
  0x20   : > { %5633 = sst [smem:[#allocation16_spill]] %s4548_s29  ;;  %p503_p13 = scmp.lt.s32.totalorder (!%p417_p10), %s4405_s16, 2 }
  0x21   : > { %s5634_s0 = sld [smem:[#allocation17_spill]] (!%p417_p10)  ;;  %p3549_p0 = scmp.ne.s32.totalorder (!%p417_p10), %s4405_s16, 0 }
  0x22   : > { %s499_s12 = scalar_select %p498_p12, %s4409_s17, 1 }
  0x23   : > { %s504_s21 = scalar_select %p503_p13, %s4405_s16, 2 }
  0x24   : > { %s3875_s22 = sshll.u32 %s499_s12, 7  ;;  %s5635_s1 = sld [smem:[#allocation18_spill]] }
  0x25   : > { %s3876_s28 = sshll.u32 %s504_s21, 6  ;;  %s3534_s15 = sshll.u32 %s504_s21, 2 }
  0x26   : > { %s5636_s2 = sld [smem:[#allocation19_spill]]  ;;  %s4585_s19 = scalar_lea.vmem %s5598_s5, %s3876_s28 }
  0x27   : > { %s4560_s27 = scalar_lea.vmem %s5634_s0, %s3875_s22  ;;  %s5637_s3 = sld [smem:[#allocation20_spill]] }
  0x28   : > { %s5638_s4 = sld [smem:[#allocation21_spill]]  ;;  %s4590_s13 = scalar_lea.vmem %s5599_s6, %s3876_s28 }
  0x29   : > { %s4595_s10 = scalar_lea.vmem %s5600_s7, %s3876_s28  ;;  %s3882_s20 = sshll.u32 %s504_s21, 9 }
  0x2a   : > { %s4565_s29 = scalar_lea.vmem %s5635_s1, %s3876_s28  ;;  %s4607_s1 = scalar_lea.vmem [#allocation4], %s3529_s11 }
  0x2b   : > { %551 = sbr.rel (%p3549_p0) target bundleno = 65 (0x41), region = 64 }
  0x2c   : > { %s4570_s30 = scalar_lea.vmem %s5636_s2, %s3534_s15  ;;  %s3883_s2 = sshll.u32 %s504_s21, 7 }
  0x2d   : > { %s4575_s12 = scalar_lea.vmem %s5637_s3, %s3876_s28  ;;  %s4600_s3 = scalar_lea.vmem %s5601_s8, %s3882_s20 }
  0x2e   : > { %s4580_s22 = scalar_lea.vmem %s5638_s4, %s3876_s28  ;;  %s4605_s4 = scalar_lea.vmem %s5602_s9, %s3883_s2 }
  0x30   : > { %v552_v0 = vld [vmem:[%s4560_s27] sm:$0xff]  ;;  %v553_v1 = vld [vmem:[%s4560_s27 + $0x8] sm:$0xff]  ;;  %v554_v2 = vld [vmem:[%s4560_s27 + $0x10] sm:$0xff] }
  0x31   : > { %568 = vst [vmem:[#allocation2 + $0x30] sm:$0xff] %v552_v0  ;;  %v555_v3 = vld [vmem:[%s4560_s27 + $0x18] sm:$0xff]  ;;  %v556_v4 = vld [vmem:[%s4560_s27 + $0x20] sm:$0xff]  ;;  %v557_v5 = vld [vmem:[%s4560_s27 + $0x28] sm:$0xff] }
  0x32   : > { %569 = vst [vmem:[#allocation2] sm:$0xff] %v553_v1  ;;  %v558_v6 = vld [vmem:[%s4560_s27 + $0x30] sm:$0xff]  ;;  %v559_v7 = vld [vmem:[%s4560_s27 + $0x38] sm:$0xff]  ;;  %v560_v8 = vld [vmem:[%s4560_s27 + $0x40] sm:$0xff] }
  0x33   : > { %570 = vst [vmem:[#allocation2 + $0x58] sm:$0xff] %v554_v2  ;;  %v561_v9 = vld [vmem:[%s4560_s27 + $0x48] sm:$0xff]  ;;  %v562_v10 = vld [vmem:[%s4560_s27 + $0x50] sm:$0xff]  ;;  %v563_v11 = vld [vmem:[%s4560_s27 + $0x58] sm:$0xff] }
  0x34   : > { %571 = vst [vmem:[#allocation2 + $0x18] sm:$0xff] %v555_v3  ;;  %v564_v12 = vld [vmem:[%s4560_s27 + $0x60] sm:$0xff]  ;;  %v565_v13 = vld [vmem:[%s4560_s27 + $0x68] sm:$0xff]  ;;  %v566_v14 = vld [vmem:[%s4560_s27 + $0x70] sm:$0xff] }
  0x35   : > { %572 = vst [vmem:[#allocation2 + $0x50] sm:$0xff] %v556_v4  ;;  %v567_v15 = vld [vmem:[%s4560_s27 + $0x78] sm:$0xff] }
  0x36   : > { %573 = vst [vmem:[#allocation2 + $0x68] sm:$0xff] %v557_v5 }
  0x37   : > { %574 = vst [vmem:[#allocation2 + $0x8] sm:$0xff] %v558_v6 }
  0x38   : > { %575 = vst [vmem:[#allocation2 + $0x48] sm:$0xff] %v559_v7 }
  0x39   : > { %576 = vst [vmem:[#allocation2 + $0x40] sm:$0xff] %v560_v8 }
  0x3a   : > { %577 = vst [vmem:[#allocation2 + $0x20] sm:$0xff] %v561_v9 }
  0x3b   : > { %578 = vst [vmem:[#allocation2 + $0x10] sm:$0xff] %v562_v10 }
  0x3c   : > { %579 = vst [vmem:[#allocation2 + $0x38] sm:$0xff] %v563_v11 }
  0x3d   : > { %580 = vst [vmem:[#allocation2 + $0x60] sm:$0xff] %v564_v12 }
  0x3e   : > { %581 = vst [vmem:[#allocation2 + $0x70] sm:$0xff] %v565_v13 }
  0x3f   : > { %582 = vst [vmem:[#allocation2 + $0x78] sm:$0xff] %v566_v14 }
  0x40   : > { %583 = vst [vmem:[#allocation2 + $0x28] sm:$0xff] %v567_v15 }
  0x41 PF: > { %v651_v16 = vld [vmem:[#allocation2 + $0x30] sm:$0xff]  ;;  %v652_v17 = vld [vmem:[#allocation2] sm:$0xff]  ;;  %v653_v18 = vld [vmem:[#allocation2 + $0x58] sm:$0xff]  ;;  %v4423_v41 = vmov 0   ;;  %vm1222_vm0 = vcmask 261120   ;;  %p3869_p1 = scmp.ne.s32.totalorder %s4405_s16, 2 }
  0x42   : > { %675 = vxpose.xlu0.b32.start [1/16] %v651_v16, 128  ;;  %v654_v19 = vld [vmem:[#allocation2 + $0x18] sm:$0xff]  ;;  %v655_v20 = vld [vmem:[#allocation2 + $0x50] sm:$0xff]  ;;  %v656_v21 = vld [vmem:[#allocation2 + $0x68] sm:$0xff]  ;;  %v667_v39 = vpack.c.bf16 %v652_v17, %v651_v16  ;;  %4064 = vset.pattern.permute.xlu1 %v4423_v41 }
  0x43   : > { %v657_v22 = vld [vmem:[#allocation2 + $0x8] sm:$0xff]  ;;  %v659_v27 = vld [vmem:[#allocation2 + $0x40] sm:$0xff]  ;;  %v661_v31 = vld [vmem:[#allocation2 + $0x10] sm:$0xff]  ;;  %v669_v37 = vpack.c.bf16 %v656_v21, %v655_v20  ;;  %v668_v38 = vpack.c.bf16 %v654_v19, %v653_v18  ;;  %4065 = vset.pattern.permute.xlu2 %v4423_v41 }
  0x44   : > { %v658_v23 = vld [vmem:[#allocation2 + $0x48] sm:$0xff]  ;;  %v663_v28 = vld [vmem:[#allocation2 + $0x60] sm:$0xff]  ;;  %v662_v32 = vld [vmem:[#allocation2 + $0x38] sm:$0xff] }
  0x45   : > { %v664_v29 = vld [vmem:[#allocation2 + $0x70] sm:$0xff]  ;;  %v672_v33 = vpack.c.bf16 %v662_v32, %v661_v31  ;;  %v660_v34 = vld [vmem:[#allocation2 + $0x20] sm:$0xff]  ;;  %v670_v36 = vpack.c.bf16 %v658_v23, %v657_v22  ;;  %v3901_v42 = vld [vmem:[%s4565_s29 + $0x8] sm:$0xff] }
  0x46   : > { %v665_v24 = vld [vmem:[#allocation2 + $0x78] sm:$0xff]  ;;  %v673_v30 = vpack.c.bf16 %v664_v29, %v663_v28  ;;  %v671_v35 = vpack.c.bf16 %v660_v34, %v659_v27  ;;  %v586_v40 = vld [vmem:[%s4600_s3 + $0x10] sm:$0xff]  ;;  %v3884_v43 = vld [vmem:[%s4575_s12] sm:$0xff]  ;;  %1159 = vmatpush.bf16.xpose.msra.mxu2 %v3901_v42 }
  0x47   : > { %v666_v25 = vld [vmem:[#allocation2 + $0x28] sm:$0xff]  ;;  %743 = vperm.xlu1 %4064, %v586_v40   ;;  %v587_v44 = vld [vmem:[%s4600_s3 + $0x18] sm:$0xff]  ;;  %v3900_v46 = vld [vmem:[%s4565_s29] sm:$0xff] }
  0x48   : > { %v674_v26 = vpack.c.bf16 %v666_v25, %v665_v24  ;;  %v3885_v45 = vld [vmem:[%s4575_s12 + $0x8] sm:$0xff]  ;;  %v584_v47 = vld [vmem:[%s4600_s3] sm:$0xff] }
  0x49   : > { %733 = vperm.xlu2 %4065, %v584_v47   ;;  %v585_v48 = vld [vmem:[%s4600_s3 + $0x8] sm:$0xff] }
  0x4a   : > { %676 = vxpose.xlu0.b32.cont [2/16] %v652_v17, 128  ;;  %859 = vmatpush.bf16.msra.mxu0 %v674_v26 }
  0x4b   : > { %1068 = vmatpush.bf16.msra.mxu1 %v674_v26 }
  0x4e   : > { %860 = vmatpush.bf16.msra.mxu0 %v673_v30  ;;  %1160 = vmatpush.bf16.xpose.msra.mxu2 %v3900_v46 }
  0x4f   : > { %1069 = vmatpush.bf16.msra.mxu1 %v673_v30  ;;  %748 = vperm.xlu1 %4064, %v587_v44  }
  0x51   : > { %738 = vperm.xlu2 %4065, %v585_v48  }
  0x52   : > { %677 = vxpose.xlu0.b32.cont [3/16] %v653_v18, 128  ;;  %861 = vmatpush.bf16.msra.mxu0 %v672_v33 }
  0x53   : > { %1070 = vmatpush.bf16.msra.mxu1 %v672_v33 }
  0x56   : > { %862 = vmatpush.bf16.msra.mxu0 %v671_v35 }
  0x57   : > { %1071 = vmatpush.bf16.msra.mxu1 %v671_v35 }
  0x5a   : > { %678 = vxpose.xlu0.b32.cont [4/16] %v654_v19, 128  ;;  %863 = vmatpush.bf16.msra.mxu0 %v670_v36 }
  0x5b   : > { %1072 = vmatpush.bf16.msra.mxu1 %v670_v36 }
  0x5e   : > { %864 = vmatpush.bf16.msra.mxu0 %v669_v37 }
  0x5f   : > { %1073 = vmatpush.bf16.msra.mxu1 %v669_v37 }
  0x62   : > { %679 = vxpose.xlu0.b32.cont [5/16] %v655_v20, 128  ;;  %865 = vmatpush.bf16.msra.mxu0 %v668_v38 }
  0x63   : > { %1074 = vmatpush.bf16.msra.mxu1 %v668_v38 }
  0x66   : > { %866 = vmatpush.bf16.msra.mxu0 %v667_v39 }
  0x67   : > { %1075 = vmatpush.bf16.msra.mxu1 %v667_v39 }
  0x69   : > { %867 = vmatmul.bf16.vlgmr.msra.gmra.mxu0 %v3884_v43 }
  0x6a   : > { %680 = vxpose.xlu0.b32.cont [6/16] %v656_v21, 128 }
  0x72   : > { %681 = vxpose.xlu0.b32.cont [7/16] %v657_v22, 128 }
  0x79   : > { %872 = vmatmul.bf16.gmra.mxu0 %v3885_v45 }
  0x7a   : > { %682 = vxpose.xlu0.b32.cont [8/16] %v658_v23, 128 }
  0x82   : > { %683 = vxpose.xlu0.b32.cont [9/16] %v659_v27, 128 }
  0x8a   : > { %684 = vxpose.xlu0.b32.cont [10/16] %v660_v34, 128 }
  0x92   : > { %685 = vxpose.xlu0.b32.cont [11/16] %v661_v31, 128 }
  0x9a   : > { %686 = vxpose.xlu0.b32.cont [12/16] %v662_v32, 128  ;;  %v4067_v32 = vld [vmem:[%s4570_s30] ss:$0 sm:$0xff] }
  0xa2   : > { %687 = vxpose.xlu0.b32.cont [13/16] %v663_v28, 128 }
  0xa3   : > { %v734_v4 = vpop.permute.xlu2 %733 }
  0xaa   : > { %688 = vxpose.xlu0.b32.cont [14/16] %v664_v29, 128 }
  0xab   : > { %v739_v14 = vpop.permute.xlu2 %738 }
  0xb2   : > { %689 = vxpose.xlu0.b32.cont [15/16] %v665_v24, 128 }
  0xb9   : > { %v744_v0 = vpop.permute.xlu1 %743 }
  0xba   : > { %690 = vxpose.xlu0.b32.end [16/16] %v666_v25, 128 }
  0xc1   : > { %v749_v6 = vpop.permute.xlu1 %748 }
  0xe6   : > { %v691_v49 = vpop.trf.xlu0  ;;  %v868_v59 = vpop.f32.mrf.mxu0 }
  0xe7   : > { %v869_v7 = vadd.f32 %v868_v59, %v734_v4 }
  0xe9   : > { %v908_v12 = vpack.c.bf16 %v869_v7, %v869_v7 }
  0xeb   : > { %v1214_v18 = vunpack.c.l.b16 %v908_v12 }
  0xee   : > { %v692_v50 = vpop.trf.xlu0  ;;  %v870_v62 = vpop.f32.mrf.mxu0 }
  0xef   : > { %v4634_v51 = vpack.c.bf16 %v692_v50, %v691_v49  ;;  %v871_v15 = vadd.f32 %v870_v62, %v739_v14 }
  0xf1   : > { %1161 = vmatmul.bf16.vlgmr.msra.gmra.mxu2 %v4634_v51  ;;  %v909_v19 = vpack.c.bf16 %v871_v15, %v871_v15 }
  0xf3   : > { %v1215_v22 = vunpack.c.l.b16 %v909_v19 }
  0xf5   : > { %v1218_v24 = vpack.c.b16 %v1215_v22, %v1214_v18 }
  0xf6   : > { %v693_v52 = vpop.trf.xlu0  ;;  %v873_v1 = vpop.f32.mrf.mxu0 }
  0xf7   : > { %v874_v5 = vadd.f32 %v873_v1, %v744_v0 }
  0xf9   : > { %v910_v10 = vpack.c.bf16 %v874_v5, %v874_v5 }
  0xfb   : > { %v1216_v16 = vunpack.c.l.b16 %v910_v10 }
  0xfe   : > { %v694_v53 = vpop.trf.xlu0  ;;  %v875_v8 = vpop.f32.mrf.mxu0 }
  0xff   : > { %v4637_v54 = vpack.c.bf16 %v694_v53, %v693_v52  ;;  %v876_v11 = vadd.f32 %v875_v8, %v749_v6 }
 0x101   : > { %1166 = vmatmul.bf16.gmra.mxu2 %v4637_v54  ;;  %v911_v13 = vpack.c.bf16 %v876_v11, %v876_v11 }
 0x103   : > { %v1217_v17 = vunpack.c.l.b16 %v911_v13 }
 0x105   : > { %v1219_v20 = vpack.c.b16 %v1217_v17, %v1216_v16 }
 0x106   : > { %v695_v55 = vpop.trf.xlu0 }
 0x107   : > { %1253 = vmatpush.bf16.msra.mxu3 %v1219_v20 }
 0x10b   : > { %1254 = vmatpush.bf16.msra.mxu3 %v1218_v24 }
 0x10e   : > { %v696_v56 = vpop.trf.xlu0 }
 0x10f   : > { %v4640_v57 = vpack.c.bf16 %v696_v56, %v695_v55 }
 0x111   : > { %1171 = vmatmul.bf16.gmra.mxu2 %v4640_v57 }
 0x116   : > { %v697_v58 = vpop.trf.xlu0 }
 0x11e   : > { %v698_v60 = vpop.trf.xlu0 }
 0x11f   : > { %v4643_v61 = vpack.c.bf16 %v698_v60, %v697_v58 }
 0x121   : > { %1176 = vmatmul.bf16.gmra.mxu2 %v4643_v61  ;;  %4066 = vset.pattern.permute.xlu0 %v4423_v41 }
 0x126   : > { %v699_v63 = vpop.trf.xlu0 }
 0x12e   : > { %v700_v2 = vpop.trf.xlu0 }
 0x12f   : > { %v4646_v3 = vpack.c.bf16 %v700_v2, %v699_v63 }
 0x131   : > { %1181 = vmatmul.bf16.gmra.mxu2 %v4646_v3 }
 0x136   : > { %v701_v9 = vpop.trf.xlu0 }
 0x13e   : > { %v702_v21 = vpop.trf.xlu0 }
 0x13f   : > { %v4649_v23 = vpack.c.bf16 %v702_v21, %v701_v9 }
 0x141   : > { %1186 = vmatmul.bf16.gmra.mxu2 %v4649_v23 }
 0x146   : > { %v703_v25 = vpop.trf.xlu0 }
 0x14e   : > { %v704_v26 = vpop.trf.xlu0 }
 0x14f   : > { %v4652_v27 = vpack.c.bf16 %v704_v26, %v703_v25 }
 0x151   : > { %1191 = vmatmul.bf16.gmra.mxu2 %v4652_v27 }
 0x156   : > { %v705_v28 = vpop.trf.xlu0 }
 0x15e   : > { %v706_v29 = vpop.trf.xlu0 }
 0x15f   : > { %v4655_v30 = vpack.c.bf16 %v706_v29, %v705_v28 }
 0x161   : > { %1196 = vmatmul.bf16.gmra.mxu2 %v4655_v30 }
 0x174   : > { %v1162_v31 = vpop.f32.mrf.mxu2 }
 0x175   : > { %v1163_v34 = vadd.f32 %v4067_v32, %v1162_v31 }
 0x17c   : > { %v1164_v33 = vpop.f32.mrf.mxu2 }
 0x17d   : > { %v1165_v35 = vadd.f32 %v4067_v32, %v1164_v33 }
 0x17f   : > { %v1202_v36 = vpack.c.bf16 %v1165_v35, %v1163_v34 }
 0x181   : > { %3670 = vmatmul.msk.bf16.vlgmr.msra.gmra.mxu3 %vm1222_vm0, %v1202_v36 }
 0x184   : > { %v1167_v37 = vpop.f32.mrf.mxu2 }
 0x185   : > { %v1168_v39 = vadd.f32 %v4067_v32, %v1167_v37 }
 0x18c   : > { %v1169_v38 = vpop.f32.mrf.mxu2 }
 0x18d   : > { %v1170_v40 = vadd.f32 %v4067_v32, %v1169_v38 }
 0x18f   : > { %v1203_v41 = vpack.c.bf16 %v1170_v40, %v1168_v39 }
 0x191   : > { %3671 = vmatmul.msk.bf16.gmra.mxu3 %vm1222_vm0, %v1203_v41 }
 0x194   : > { %v1172_v42 = vpop.f32.mrf.mxu2 }
 0x195   : > { %v1173_v44 = vadd.f32 %v4067_v32, %v1172_v42 }
 0x19c   : > { %v1174_v43 = vpop.f32.mrf.mxu2 }
 0x19d   : > { %v1175_v45 = vadd.f32 %v4067_v32, %v1174_v43 }
 0x19f   : > { %v1204_v46 = vpack.c.bf16 %v1175_v45, %v1173_v44 }
 0x1a1   : > { %3672 = vmatmul.msk.bf16.gmra.mxu3 %vm1222_vm0, %v1204_v46 }
 0x1a4   : > { %v1177_v47 = vpop.f32.mrf.mxu2 }
 0x1a5   : > { %v1178_v49 = vadd.f32 %v4067_v32, %v1177_v47 }
 0x1ac   : > { %v1179_v48 = vpop.f32.mrf.mxu2 }
 0x1ad   : > { %v1180_v50 = vadd.f32 %v4067_v32, %v1179_v48 }
 0x1af   : > { %v1205_v52 = vpack.c.bf16 %v1180_v50, %v1178_v49 }
 0x1b1   : > { %3673 = vmatmul.msk.bf16.gmra.mxu3 %vm1222_vm0, %v1205_v52 }
 0x1b4   : > { %v1182_v53 = vpop.f32.mrf.mxu2 }
 0x1b5   : > { %v1183_v56 = vadd.f32 %v4067_v32, %v1182_v53 }
 0x1bc   : > { %v1184_v55 = vpop.f32.mrf.mxu2 }
 0x1bd   : > { %v1185_v58 = vadd.f32 %v4067_v32, %v1184_v55 }
 0x1bf   : > { %v1206_v59 = vpack.c.bf16 %v1185_v58, %v1183_v56 }
 0x1c1   : > { %3674 = vmatmul.msk.bf16.gmra.mxu3 %vm1222_vm0, %v1206_v59  ;;  %v3892_v59 = vld [vmem:[%s4580_s22] sm:$0xff] }
 0x1c2   : > { %1076 = vmatmul.bf16.vlgmr.msra.gmra.mxu1 %v3892_v59 }
 0x1c4   : > { %v1187_v60 = vpop.f32.mrf.mxu2 }
 0x1c5   : > { %v1188_v63 = vadd.f32 %v4067_v32, %v1187_v60 }
 0x1cc   : > { %v1189_v62 = vpop.f32.mrf.mxu2 }
 0x1cd   : > { %v1190_v0 = vadd.f32 %v4067_v32, %v1189_v62 }
 0x1cf   : > { %v1207_v1 = vpack.c.bf16 %v1190_v0, %v1188_v63  ;;  %v3886_v63 = vld [vmem:[%s4575_s12 + $0x10] sm:$0xff] }
 0x1d0   : > { %877 = vmatmul.bf16.gmra.mxu0 %v3886_v63 }
 0x1d1   : > { %3675 = vmatmul.msk.bf16.gmra.mxu3 %vm1222_vm0, %v1207_v1 }
 0x1d4   : > { %v1192_v2 = vpop.f32.mrf.mxu2 }
 0x1d5   : > { %v1193_v5 = vadd.f32 %v4067_v32, %v1192_v2 }
 0x1dc   : > { %v1194_v4 = vpop.f32.mrf.mxu2 }
 0x1dd   : > { %v1195_v6 = vadd.f32 %v4067_v32, %v1194_v4 }
 0x1df   : > { %v1208_v7 = vpack.c.bf16 %v1195_v6, %v1193_v5  ;;  %v3893_v6 = vld [vmem:[%s4580_s22 + $0x8] sm:$0xff] }
 0x1e0   : > { %1081 = vmatmul.bf16.gmra.mxu1 %v3893_v6 }
 0x1e1   : > { %3676 = vmatmul.msk.bf16.gmra.mxu3 %vm1222_vm0, %v1208_v7 }
 0x1e4   : > { %v1197_v8 = vpop.f32.mrf.mxu2 }
 0x1e5   : > { %v1198_v10 = vadd.f32 %v4067_v32, %v1197_v8 }
 0x1ec   : > { %v1199_v9 = vpop.f32.mrf.mxu2 }
 0x1ed   : > { %v1200_v11 = vadd.f32 %v4067_v32, %v1199_v9 }
 0x1ef   : > { %v1209_v12 = vpack.c.bf16 %v1200_v11, %v1198_v10 }
 0x1f1   : > { %3677 = vmatmul.msk.bf16.gmra.mxu3 %vm1222_vm0, %v1209_v12 }
 0x204   : > { %v4667_v13 = vpop.f32.mrf.mxu3 }
 0x20c   : > { %v4669_v14 = vpop.f32.mrf.mxu3 }
 0x214   : > { %v4671_v15 = vpop.f32.mrf.mxu3 }
 0x21c   : > { %v4673_v16 = vpop.f32.mrf.mxu3 }
 0x224   : > { %v4675_v17 = vpop.f32.mrf.mxu3 }
 0x225   : > { %1304 = vmax.xlane.f32.xlu2 %v4675_v17 }
 0x22c   : > { %v4678_v18 = vpop.f32.mrf.mxu3 }
 0x234   : > { %v4680_v19 = vpop.f32.mrf.mxu3 }
 0x235   : > { %1308 = vmax.xlane.f32.xlu2 %v4680_v19 }
 0x23c   : > { %v4683_v20 = vpop.f32.mrf.mxu3 }
 0x23d   : > { %1310 = vmax.xlane.f32.xlu1 %v4683_v20 }
 0x244   : > { %v1276_v21 = vpop.f32.mrf.mxu3 }
 0x245   : > { %1312 = vmax.xlane.f32.xlu2 %v1276_v21 }
 0x24c   : > { %v1278_v22 = vpop.f32.mrf.mxu3 }
 0x24d   : > { %1314 = vmax.xlane.f32.xlu1 %v1278_v22 }
 0x254   : > { %v1281_v24 = vpop.f32.mrf.mxu3 }
 0x255   : > { %1316 = vmax.xlane.f32.xlu2 %v1281_v24 }
 0x25c   : > { %v1283_v25 = vpop.f32.mrf.mxu3 }
 0x25d   : > { %1318 = vmax.xlane.f32.xlu1 %v1283_v25 }
 0x264   : > { %v1286_v26 = vpop.f32.mrf.mxu3 }
 0x265   : > { %1320 = vmax.xlane.f32.xlu2 %v1286_v26 }
 0x26c   : > { %v1288_v28 = vpop.f32.mrf.mxu3 }
 0x26d   : > { %1322 = vmax.xlane.f32.xlu1 %v1288_v28 }
 0x274   : > { %v1291_v29 = vpop.f32.mrf.mxu3 }
 0x275   : > { %1324 = vmax.xlane.f32.xlu1 %v1291_v29 }
 0x27c   : > { %v1293_v31 = vpop.f32.mrf.mxu3 }
 0x27d   : > { %1306 = vmax.xlane.f32.xlu1 %v4678_v18  ;;  %1326 = vmax.xlane.f32.xlu2 %v1293_v31 }
 0x285   : > { %1302 = vmax.xlane.f32.xlu1 %v4673_v16  ;;  %1300 = vmax.xlane.f32.xlu2 %v4671_v15 }
 0x28d   : > { %1298 = vmax.xlane.f32.xlu1 %v4669_v14  ;;  %1296 = vmax.xlane.f32.xlu2 %v4667_v13 }
 0x298   : > { %v4691_v32 = vpop.xlane.xlu2 %1304 }
 0x2a8   : > { %v4693_v33 = vpop.xlane.xlu2 %1308 }
 0x2b0   : > { %v1311_v34 = vpop.xlane.xlu1 %1310 }
 0x2b1   : > { %v1335_v5 = vsub.f32 %v4683_v20, %v1311_v34 }
 0x2b3   : > { %v1358_v9 = vmul.f32 1.442695, %v1335_v5 }
 0x2b8   : > { %v1313_v35 = vpop.xlane.xlu2 %1312 }
 0x2b9   : > { %v1336_v36 = vsub.f32 %v1276_v21, %v1313_v35 }
 0x2bb   : > { %v1360_v37 = vmul.f32 1.442695, %v1336_v36 }
 0x2bd   : > { %4071 = vpow2.f32 %v1360_v37 }
 0x2c0   : > { %v1315_v38 = vpop.xlane.xlu1 %1314 }
 0x2c1   : > { %v1337_v39 = vsub.f32 %v1278_v22, %v1315_v38  ;;  %v3887_v22 = vld [vmem:[%s4575_s12 + $0x18] sm:$0xff] }
 0x2c2   : > { %882 = vmatmul.bf16.gmra.mxu0 %v3887_v22 }
 0x2c3   : > { %v4695_v40 = vpop.eup %4071  ;;  %v1362_v41 = vmul.f32 1.442695, %v1337_v39 }
 0x2c4   : > { %1392 = vadd.xlane.f32.xlu1 %v4695_v40 }
 0x2c5   : > { %4073 = vpow2.f32 %v1362_v41 }
 0x2c8   : > { %v1317_v42 = vpop.xlane.xlu2 %1316 }
 0x2c9   : > { %v1338_v43 = vsub.f32 %v1281_v24, %v1317_v42  ;;  %v1334_v24 = vsub.f32 %v4680_v19, %v4693_v33 }
 0x2cb   : > { %v4698_v44 = vpop.eup %4073  ;;  %v1364_v45 = vmul.f32 1.442695, %v1338_v43 }
 0x2cc   : > { %1394 = vadd.xlane.f32.xlu2 %v4698_v44 }
 0x2cd   : > { %4075 = vpow2.f32 %v1364_v45 }
 0x2d0   : > { %v1319_v46 = vpop.xlane.xlu1 %1318 }
 0x2d1   : > { %v1339_v47 = vsub.f32 %v1283_v25, %v1319_v46 }
 0x2d3   : > { %v4701_v48 = vpop.eup %4075  ;;  %v1366_v49 = vmul.f32 1.442695, %v1339_v47  ;;  %v3551_v47 = vld [vmem:[%s4600_s3 + $0x88] sm:$0xff] }
 0x2d4   : > { %1396 = vadd.xlane.f32.xlu0 %v4701_v48 }
 0x2d5   : > { %4077 = vpow2.f32 %v1366_v49  ;;  %v3550_v49 = vld [vmem:[%s4600_s3 + $0x80] sm:$0xff] }
 0x2d8   : > { %v1321_v50 = vpop.xlane.xlu2 %1320 }
 0x2d9   : > { %v1340_v52 = vsub.f32 %v1286_v26, %v1321_v50  ;;  %v1356_v26 = vmul.f32 1.442695, %v1334_v24  ;;  %v591_v50 = vld [vmem:[%s4600_s3 + $0x38] sm:$0xff] }
 0x2db   : > { %v4704_v53 = vpop.eup %4077  ;;  %v1368_v55 = vmul.f32 1.442695, %v1340_v52  ;;  %v3552_v52 = vld [vmem:[%s4600_s3 + $0x90] sm:$0xff] }
 0x2dc   : > { %1398 = vadd.xlane.f32.xlu2 %v4704_v53 }
 0x2dd   : > { %4079 = vpow2.f32 %v1368_v55  ;;  %v589_v55 = vld [vmem:[%s4600_s3 + $0x28] sm:$0xff] }
 0x2e0   : > { %v1323_v56 = vpop.xlane.xlu1 %1322 }
 0x2e1   : > { %v1341_v58 = vsub.f32 %v1288_v28, %v1323_v56  ;;  %v590_v56 = vld [vmem:[%s4600_s3 + $0x30] sm:$0xff] }
 0x2e3   : > { %v4708_v60 = vpop.eup %4079  ;;  %v1370_v62 = vmul.f32 1.442695, %v1341_v58  ;;  %v588_v58 = vld [vmem:[%s4600_s3 + $0x20] sm:$0xff] }
 0x2e4   : > { %1400 = vadd.xlane.f32.xlu2 %v4708_v60 }
 0x2e5   : > { %4081 = vpow2.f32 %v1370_v62 }
 0x2e8   : > { %v1325_v0 = vpop.xlane.xlu1 %1324 }
 0x2e9   : > { %v1342_v1 = vsub.f32 %v1291_v29, %v1325_v0 }
 0x2eb   : > { %v4712_v2 = vpop.eup %4081  ;;  %v1372_v4 = vmul.f32 1.442695, %v1342_v1 }
 0x2ec   : > { %1402 = vadd.xlane.f32.xlu1 %v4712_v2 }
 0x2ed   : > { %4083 = vpow2.f32 %v1372_v4 }
 0x2ee   : > { %4085 = vpow2.f32 %v1358_v9 }
 0x2f0   : > { %v1307_v7 = vpop.xlane.xlu1 %1306  ;;  %v1327_v8 = vpop.xlane.xlu2 %1326 }
 0x2f1   : > { %v1343_v10 = vsub.f32 %v1293_v31, %v1327_v8  ;;  %v1333_v21 = vsub.f32 %v4678_v18, %v1307_v7  ;;  %v1332_v18 = vsub.f32 %v4675_v17, %v4691_v32 }
 0x2f3   : > { %v4717_v11 = vpop.eup %4083  ;;  %v1374_v12 = vmul.f32 1.442695, %v1343_v10  ;;  %v1354_v25 = vmul.f32 1.442695, %v1333_v21  ;;  %v1352_v34 = vmul.f32 1.442695, %v1332_v18 }
 0x2f4   : > { %1404 = vadd.xlane.f32.xlu2 %v4717_v11  ;;  %v4724_v28 = vpop.eup %4085 }
 0x2f5   : > { %4087 = vpow2.f32 %v1374_v12 }
 0x2f6   : > { %4089 = vpow2.f32 %v1354_v25 }
 0x2f7   : > { %4091 = vpow2.f32 %v1356_v26 }
 0x2f8   : > { %v1303_v20 = vpop.xlane.xlu1 %1302  ;;  %v1301_v33 = vpop.xlane.xlu2 %1300 }
 0x2f9   : > { %v1331_v31 = vsub.f32 %v4673_v16, %v1303_v20  ;;  %v1330_v16 = vsub.f32 %v4671_v15, %v1301_v33 }
 0x2fb   : > { %v4726_v29 = vpop.eup %4087  ;;  %v1350_v19 = vmul.f32 1.442695, %v1331_v31  ;;  %v1348_v32 = vmul.f32 1.442695, %v1330_v16 }
 0x2fc   : > { %1390 = vadd.xlane.f32.xlu2 %v4724_v28  ;;  %1406 = vadd.xlane.f32.xlu1 %v4726_v29  ;;  %v4733_v36 = vpop.eup %4089 }
 0x2fd   : > { %v4735_v37 = vpop.eup %4091  ;;  %4093 = vpow2.f32 %v1350_v19 }
 0x2fe   : > { %4095 = vpow2.f32 %v1352_v34 }
 0x300   : > { %v1299_v35 = vpop.xlane.xlu1 %1298  ;;  %v1297_v41 = vpop.xlane.xlu2 %1296 }
 0x301   : > { %v1329_v38 = vsub.f32 %v4669_v14, %v1299_v35  ;;  %v1328_v14 = vsub.f32 %v4667_v13, %v1297_v41  ;;  %v3553_v13 = vld [vmem:[%s4600_s3 + $0x98] sm:$0xff] }
 0x303   : > { %v1346_v17 = vmul.f32 1.442695, %v1329_v38  ;;  %v4741_v39 = vpop.eup %4093  ;;  %v1344_v15 = vmul.f32 1.442695, %v1328_v14 }
 0x304   : > { %1386 = vadd.xlane.f32.xlu2 %v4733_v36  ;;  %1388 = vadd.xlane.f32.xlu1 %v4735_v37  ;;  %v4743_v42 = vpop.eup %4095 }
 0x305   : > { %4097 = vpow2.f32 %v1346_v17 }
 0x306   : > { %4099 = vpow2.f32 %v1348_v32 }
 0x307   : > { %4101 = vpow2.f32 %v1344_v15  ;;  %v4773_v15 = vpop.f32.mrf.mxu0 }
 0x30b   : > { %v4748_v43 = vpop.eup %4097 }
 0x30c   : > { %1382 = vadd.xlane.f32.xlu2 %v4741_v39  ;;  %1384 = vadd.xlane.f32.xlu1 %v4743_v42  ;;  %v4750_v45 = vpop.eup %4099 }
 0x30d   : > { %v4754_v46 = vpop.eup %4101 }
 0x314   : > { %1378 = vadd.xlane.f32.xlu2 %v4748_v43  ;;  %1380 = vadd.xlane.f32.xlu1 %v4750_v45 }
 0x31c   : > { %1376 = vadd.xlane.f32.xlu1 %v4754_v46 }
 0x32c   : > { %947 = vperm.xlu2 %4065, %v3551_v47  }
 0x334   : > { %957 = vperm.xlu2 %4065, %v3553_v13  }
 0x335   : > { %942 = vperm.xlu1 %4064, %v3550_v49  }
 0x337   : > { %v1393_v63 = vpop.xlane.xlu1 %1392 }
 0x33c   : > { %768 = vperm.xlu2 %4065, %v591_v50  }
 0x33d   : > { %952 = vperm.xlu1 %4064, %v3552_v52  }
 0x33f   : > { %v1395_v59 = vpop.xlane.xlu2 %1394 }
 0x344   : > { %758 = vperm.xlu2 %4065, %v589_v55   ;;  %v880_v55 = vpop.f32.mrf.mxu0 }
 0x345   : > { %763 = vperm.xlu1 %4064, %v590_v56  }
 0x347   : > { %v1397_v22 = vpop.xlane.xlu0 %1396 }
 0x34d   : > { %753 = vperm.xlu1 %4064, %v588_v58  }
 0x34f   : > { %v1399_v62 = vpop.xlane.xlu2 %1398 }
 0x357   : > { %v1401_v0 = vpop.xlane.xlu2 %1400 }
 0x35f   : > { %v1403_v1 = vpop.xlane.xlu1 %1402 }
 0x367   : > { %v1405_v4 = vpop.xlane.xlu2 %1404 }
 0x368   : > { %4103 = vrcp.f32 %v1405_v4  ;;  %v883_v4 = vpop.f32.mrf.mxu0 }
 0x36e   : > { %v4104_v7 = vpop.eup %4103 }
 0x36f   : > { %v1407_v5 = vpop.xlane.xlu1 %1406  ;;  %v1391_v6 = vpop.xlane.xlu2 %1390  ;;  %v1438_v9 = vmul.f32 %v4104_v7, %v4717_v11 }
 0x370   : > { %4105 = vrcp.f32 %v1407_v5 }
 0x371   : > { %4107 = vrcp.f32 %v1403_v1 }
 0x372   : > { %4109 = vrcp.f32 %v1401_v0 }
 0x373   : > { %4111 = vrcp.f32 %v1399_v62 }
 0x374   : > { %4113 = vrcp.f32 %v1397_v22 }
 0x375   : > { %4115 = vrcp.f32 %v1395_v59 }
 0x376   : > { %v4106_v8 = vpop.eup %4105  ;;  %4117 = vrcp.f32 %v1393_v63 }
 0x377   : > { %v1439_v10 = vmul.f32 %v4106_v8, %v4726_v29  ;;  %v4108_v21 = vpop.eup %4107  ;;  %v1387_v20 = vpop.xlane.xlu2 %1386 }
 0x378   : > { %v4110_v24 = vpop.eup %4109  ;;  %v1437_v25 = vmul.f32 %v4108_v21, %v4712_v2  ;;  %v1389_v31 = vpop.xlane.xlu1 %1388 }
 0x379   : > { %v1447_v12 = vpack.c.bf16 %v1439_v10, %v1438_v9  ;;  %v1436_v26 = vmul.f32 %v4110_v24, %v4708_v60  ;;  %v4112_v19 = vpop.eup %4111  ;;  %4119 = vrcp.f32 %v1389_v31  ;;  %v3903_v24 = vld [vmem:[%s4565_s29 + $0x18] sm:$0xff] }
 0x37a   : > { %v4114_v33 = vpop.eup %4113  ;;  %v1435_v11 = vmul.f32 %v4112_v19, %v4704_v53  ;;  %4121 = vrcp.f32 %v1391_v6 }
 0x37b   : > { %1460 = vmatpush.bf16.xpose.msrb.mxu2 %v1447_v12  ;;  %v1446_v18 = vpack.c.bf16 %v1437_v25, %v1436_v26  ;;  %v1434_v34 = vmul.f32 %v4114_v33, %v4701_v48  ;;  %v4116_v38 = vpop.eup %4115  ;;  %v885_v25 = vpop.f32.mrf.mxu0 }
 0x37c   : > { %v4118_v2 = vpop.eup %4117  ;;  %v1433_v60 = vmul.f32 %v4116_v38, %v4698_v44 }
 0x37d   : > { %v1445_v35 = vpack.c.bf16 %v1435_v11, %v1434_v34  ;;  %v1432_v17 = vmul.f32 %v4118_v2, %v4695_v40  ;;  %v1077_v40 = vpop.f32.mrf.mxu1  ;;  %v3902_v34 = vld [vmem:[%s4565_s29 + $0x10] sm:$0xff] }
 0x37f   : > { %v1383_v29 = vpop.xlane.xlu2 %1382  ;;  %v1444_v41 = vpack.c.bf16 %v1433_v60, %v1432_v17  ;;  %v4120_v14 = vpop.eup %4119 }
 0x380   : > { %v1385_v16 = vpop.xlane.xlu1 %1384  ;;  %v4122_v53 = vpop.eup %4121  ;;  %v1430_v47 = vmul.f32 %v4120_v14, %v4735_v37 }
 0x381   : > { %4123 = vrcp.f32 %v1385_v16  ;;  %v1431_v13 = vmul.f32 %v4122_v53, %v4724_v28 }
 0x382   : > { %4125 = vrcp.f32 %v1387_v20 }
 0x383   : > { %1461 = vmatpush.bf16.xpose.msrb.mxu2 %v1446_v18  ;;  %v1443_v49 = vpack.c.bf16 %v1431_v13, %v1430_v47 }
 0x385   : > { %v1079_v1 = vpop.f32.mrf.mxu1 }
 0x387   : > { %v1379_v32 = vpop.xlane.xlu2 %1378  ;;  %v4124_v50 = vpop.eup %4123 }
 0x388   : > { %v1381_v48 = vpop.xlane.xlu1 %1380  ;;  %v4126_v52 = vpop.eup %4125  ;;  %v1428_v56 = vmul.f32 %v4124_v50, %v4743_v42 }
 0x389   : > { %4127 = vrcp.f32 %v1381_v48  ;;  %v1429_v59 = vmul.f32 %v4126_v52, %v4733_v36 }
 0x38a   : > { %4129 = vrcp.f32 %v1383_v29 }
 0x38b   : > { %1462 = vmatpush.bf16.xpose.msrb.mxu2 %v1445_v35  ;;  %v1442_v62 = vpack.c.bf16 %v1429_v59, %v1428_v56  ;;  %v3890_v59 = vld [vmem:[%s4575_s12 + $0x30] sm:$0xff] }
 0x38d   : > { %v1082_v20 = vpop.f32.mrf.mxu1 }
 0x38f   : > { %v948_v44 = vpop.permute.xlu2 %947  ;;  %v4128_v63 = vpop.eup %4127 }
 0x390   : > { %v1377_v58 = vpop.xlane.xlu1 %1376  ;;  %v4130_v37 = vpop.eup %4129  ;;  %v1426_v0 = vmul.f32 %v4128_v63, %v4750_v45  ;;  %v1080_v10 = vadd.f32 %v1079_v1, %v948_v44 }
 0x391   : > { %4131 = vrcp.f32 %v1377_v58  ;;  %v1427_v6 = vmul.f32 %v4130_v37, %v4741_v39  ;;  %v3889_v58 = vld [vmem:[%s4575_s12 + $0x28] sm:$0xff] }
 0x392   : > { %4133 = vrcp.f32 %v1379_v32  ;;  %v1118_v31 = vpack.c.bf16 %v1080_v10, %v1080_v10 }
 0x393   : > { %1463 = vmatpush.bf16.xpose.msrb.mxu2 %v1444_v41  ;;  %v1441_v42 = vpack.c.bf16 %v1427_v6, %v1426_v0  ;;  %v4068_v6 = vld [vmem:[%s4570_s30 + $0x1] ss:$0 sm:$0xff] }
 0x394   : > { %v1453_v19 = vunpack.c.l.b16 %v1118_v31 }
 0x397   : > { %v958_v28 = vpop.permute.xlu2 %957  ;;  %v4132_v7 = vpop.eup %4131 }
 0x398   : > { %v4134_v8 = vpop.eup %4133  ;;  %v1424_v9 = vmul.f32 %v4132_v7, %v4754_v46 }
 0x399   : > { %v1425_v22 = vmul.f32 %v4134_v8, %v4748_v43  ;;  %v1084_v43 = vpop.f32.mrf.mxu1 }
 0x39a   : > { %v1085_v32 = vadd.f32 %v1084_v43, %v958_v28 }
 0x39b   : > { %1464 = vmatpush.bf16.xpose.msrb.mxu2 %v1443_v49  ;;  %v1440_v26 = vpack.c.bf16 %v1425_v22, %v1424_v9 }
 0x39c   : > { %v1120_v13 = vpack.c.bf16 %v1085_v32, %v1085_v32 }
 0x39f   : > { %v769_v12 = vpop.permute.xlu2 %768 }
 0x3a0   : > { %v886_v39 = vadd.f32 %v885_v25, %v769_v12 }
 0x3a2   : > { %v915_v11 = vpack.c.bf16 %v886_v39, %v886_v39 }
 0x3a3   : > { %1465 = vmatpush.bf16.xpose.msrb.mxu2 %v1442_v62  ;;  %v3891_v62 = vld [vmem:[%s4575_s12 + $0x38] sm:$0xff] }
 0x3a4   : > { %v1573_v16 = vunpack.c.l.b16 %v915_v11 }
 0x3a7   : > { %v943_v5 = vpop.permute.xlu1 %942  ;;  %v759_v35 = vpop.permute.xlu2 %758 }
 0x3a8   : > { %v1078_v36 = vadd.f32 %v1077_v40, %v943_v5  ;;  %v881_v2 = vadd.f32 %v880_v55, %v759_v35  ;;  %v1455_v40 = vunpack.c.l.b16 %v1120_v13 }
 0x3aa   : > { %v1117_v45 = vpack.c.bf16 %v1078_v36, %v1078_v36  ;;  %v913_v53 = vpack.c.bf16 %v881_v2, %v881_v2 }
 0x3ab   : > { %1466 = vmatpush.bf16.xpose.msrb.mxu2 %v1441_v42 }
 0x3ac   : > { %v1452_v18 = vunpack.c.l.b16 %v1117_v45  ;;  %v1571_v50 = vunpack.c.l.b16 %v913_v53  ;;  %v3907_v45 = vld [vmem:[%s4565_s29 + $0x38] sm:$0xff]  ;;  %v3904_v53 = vld [vmem:[%s4565_s29 + $0x20] sm:$0xff] }
 0x3ae   : > { %v1456_v29 = vpack.c.b16 %v1453_v19, %v1452_v18 }
 0x3af   : > { %v953_v21 = vpop.permute.xlu1 %952 }
 0x3b0   : > { %v1083_v60 = vadd.f32 %v1082_v20, %v953_v21  ;;  %v3906_v20 = vld [vmem:[%s4565_s29 + $0x30] sm:$0xff] }
 0x3b2   : > { %v1119_v48 = vpack.c.bf16 %v1083_v60, %v1083_v60 }
 0x3b3   : > { %1467 = vmatpush.bf16.xpose.msrb.mxu2 %v1440_v26 }
 0x3b4   : > { %v1454_v44 = vunpack.c.l.b16 %v1119_v48 }
 0x3b6   : > { %v1457_v56 = vpack.c.b16 %v1455_v40, %v1454_v44 }
 0x3b7   : > { %v764_v33 = vpop.permute.xlu1 %763 }
 0x3b8   : > { %v884_v46 = vadd.f32 %v883_v4, %v764_v33 }
 0x3ba   : > { %v914_v38 = vpack.c.bf16 %v884_v46, %v884_v46  ;;  %1468 = vmatmul.bf16.vlgmr.msrb.gmra.mxu2 %v1456_v29 }
 0x3bb   : > { %1515 = vmatpush.bf16.xpose.msra.mxu2 %v3903_v24 }
 0x3bc   : > { %v1572_v17 = vunpack.c.l.b16 %v914_v38 }
 0x3be   : > { %v1575_v41 = vpack.c.b16 %v1573_v16, %v1572_v17 }
 0x3bf   : > { %v754_v14 = vpop.permute.xlu1 %753 }
 0x3c0   : > { %v879_v47 = vadd.f32 %v4773_v15, %v754_v14  ;;  %1608 = vmatpush.bf16.msrb.mxu0 %v1575_v41  ;;  %3988 = vmatpush.bf16.msrb.mxu3 %v1575_v41  ;;  %v3888_v15 = vld [vmem:[%s4575_s12 + $0x20] sm:$0xff]  ;;  %v3905_v41 = vld [vmem:[%s4565_s29 + $0x28] sm:$0xff] }
 0x3c1   : > { %887 = vmatmul.bf16.gmra.mxu0 %v3888_v15 }
 0x3c2   : > { %v912_v49 = vpack.c.bf16 %v879_v47, %v879_v47 }
 0x3c3   : > { %1516 = vmatpush.bf16.xpose.msra.mxu2 %v3902_v34 }
 0x3c4   : > { %v1570_v52 = vunpack.c.l.b16 %v912_v49 }
 0x3c6   : > { %v1574_v55 = vpack.c.b16 %v1571_v50, %v1570_v52 }
 0x3c8   : > { %1609 = vmatpush.bf16.msrb.mxu0 %v1574_v55  ;;  %3989 = vmatpush.bf16.msrb.mxu3 %v1574_v55 }
 0x3ca   : > { %1473 = vmatmul.bf16.gmra.mxu2 %v1457_v56 }
 0x3cc   : > { %2225 = vmatpush.bf16.xpose.msra.mxu0 %v3907_v45  ;;  %1870 = vmatpush.bf16.xpose.msra.mxu3 %v3905_v41 }
 0x3d1   : > { %892 = vmatmul.bf16.gmra.mxu0 %v3889_v58 }
 0x3d4   : > { %2226 = vmatpush.bf16.xpose.msra.mxu0 %v3906_v20  ;;  %1871 = vmatpush.bf16.xpose.msra.mxu3 %v3904_v53 }
 0x3da   : > { %1517 = vmatmul.bf16.vlgmr.msra.gmra.mxu2 %v4634_v51 }
 0x3e1   : > { %897 = vmatmul.bf16.gmra.mxu0 %v3890_v59 }
 0x3ea   : > { %1522 = vmatmul.bf16.gmra.mxu2 %v4637_v54 }
 0x3f1   : > { %902 = vmatmul.bf16.gmra.mxu0 %v3891_v62 }
 0x3fa   : > { %1527 = vmatmul.bf16.gmra.mxu2 %v4640_v57 }
 0x40a   : > { %1532 = vmatmul.bf16.gmra.mxu2 %v4643_v61 }
 0x41a   : > { %1537 = vmatmul.bf16.gmra.mxu2 %v4646_v3 }
 0x42a   : > { %1542 = vmatmul.bf16.gmra.mxu2 %v4649_v23 }
 0x43a   : > { %1547 = vmatmul.bf16.gmra.mxu2 %v4652_v27 }
 0x43d   : > { %v1469_v63 = vpop.f32.mrf.mxu2 }
 0x43e   : > { %v4813_v44 = vpop.f32.mrf.mxu0 }
 0x445   : > { %v1471_v37 = vpop.f32.mrf.mxu2 }
 0x446   : > { %v3944_v28 = vpack.c.bf16 %v1471_v37, %v1469_v63  ;;  %v4817_v15 = vpop.f32.mrf.mxu0 }
 0x448   : > { %3945 = vst [vmem:[#allocation3 + $0x28] sm:$0xff] %v3944_v28  }
 0x44a   : > { %1552 = vmatmul.bf16.gmra.mxu2 %v4655_v30 }
 0x44d   : > { %v1474_v0 = vpop.f32.mrf.mxu2 }
 0x44e   : > { %v4819_v58 = vpop.f32.mrf.mxu0 }
 0x455   : > { %v1476_v1 = vpop.f32.mrf.mxu2 }
 0x456   : > { %v3949_v4 = vpack.c.bf16 %v1476_v1, %v1474_v0  ;;  %v4823_v59 = vpop.f32.mrf.mxu0 }
 0x458   : > { %3981 = vst [vmem:[#allocation3] sm:$0xff] %v3949_v4  }
 0x45d   : > { %v1518_v5 = vpop.f32.mrf.mxu2 }
 0x45e   : > { %v1519_v7 = vadd.f32 %v4068_v6, %v1518_v5  ;;  %v4827_v62 = vpop.f32.mrf.mxu0 }
 0x465   : > { %v1520_v42 = vpop.f32.mrf.mxu2 }
 0x466   : > { %v1521_v8 = vadd.f32 %v4068_v6, %v1520_v42  ;;  %v4829_v63 = vpop.f32.mrf.mxu0 }
 0x468   : > { %v1558_v36 = vpack.c.bf16 %v1521_v8, %v1519_v7 }
 0x46a   : > { %3691 = vmatmul.msk.bf16.vlgmr.msrb.gmra.mxu0 %vm1222_vm0, %v1558_v36 }
 0x46d   : > { %v1523_v9 = vpop.f32.mrf.mxu2 }
 0x46e   : > { %v1524_v12 = vadd.f32 %v4068_v6, %v1523_v9  ;;  %v4833_v37 = vpop.f32.mrf.mxu0 }
 0x475   : > { %v1525_v10 = vpop.f32.mrf.mxu2 }
 0x476   : > { %v1526_v21 = vadd.f32 %v4068_v6, %v1525_v10  ;;  %v4835_v28 = vpop.f32.mrf.mxu0 }
 0x478   : > { %v1559_v22 = vpack.c.bf16 %v1526_v21, %v1524_v12 }
 0x47a   : > { %3692 = vmatmul.msk.bf16.gmra.mxu0 %vm1222_vm0, %v1559_v22  ;;  %v3894_v22 = vld [vmem:[%s4580_s22 + $0x10] sm:$0xff] }
 0x47b   : > { %1086 = vmatmul.bf16.gmra.mxu1 %v3894_v22 }
 0x47d   : > { %v1528_v24 = vpop.f32.mrf.mxu2 }
 0x47e   : > { %v1529_v26 = vadd.f32 %v4068_v6, %v1528_v24 }
 0x485   : > { %v1530_v25 = vpop.f32.mrf.mxu2 }
 0x486   : > { %v1531_v31 = vadd.f32 %v4068_v6, %v1530_v25 }
 0x488   : > { %v1560_v39 = vpack.c.bf16 %v1531_v31, %v1529_v26 }
 0x48a   : > { %3693 = vmatmul.msk.bf16.gmra.mxu0 %vm1222_vm0, %v1560_v39 }
 0x48d   : > { %v1533_v18 = vpop.f32.mrf.mxu2 }
 0x48e   : > { %v1534_v33 = vadd.f32 %v4068_v6, %v1533_v18 }
 0x495   : > { %v1535_v19 = vpop.f32.mrf.mxu2 }
 0x496   : > { %v1536_v11 = vadd.f32 %v4068_v6, %v1535_v19 }
 0x498   : > { %v1561_v46 = vpack.c.bf16 %v1536_v11, %v1534_v33 }
 0x49a   : > { %3694 = vmatmul.msk.bf16.gmra.mxu0 %vm1222_vm0, %v1561_v46 }
 0x49d   : > { %v1538_v29 = vpop.f32.mrf.mxu2 }
 0x49e   : > { %v1539_v35 = vadd.f32 %v4068_v6, %v1538_v29 }
 0x4a5   : > { %v1540_v34 = vpop.f32.mrf.mxu2 }
 0x4a6   : > { %v1541_v38 = vadd.f32 %v4068_v6, %v1540_v34 }
 0x4a8   : > { %v1562_v43 = vpack.c.bf16 %v1541_v38, %v1539_v35  ;;  %v3895_v35 = vld [vmem:[%s4580_s22 + $0x18] sm:$0xff] }
 0x4a9   : > { %1091 = vmatmul.bf16.gmra.mxu1 %v3895_v35  ;;  %v593_v35 = vld [vmem:[%s4600_s3 + $0x48] sm:$0xff] }
 0x4aa   : > { %3695 = vmatmul.msk.bf16.vlgmr.msrb.gmra.mxu3 %vm1222_vm0, %v1562_v43  ;;  %2227 = vmatmul.bf16.vlgmr.msra.gmra.mxu0 %v4634_v51 }
 0x4ad   : > { %v1543_v16 = vpop.f32.mrf.mxu2 }
 0x4ae   : > { %v1544_v60 = vadd.f32 %v4068_v6, %v1543_v16 }
 0x4b5   : > { %v1545_v2 = vpop.f32.mrf.mxu2 }
 0x4b6   : > { %v1546_v17 = vadd.f32 %v4068_v6, %v1545_v2 }
 0x4b8   : > { %v1563_v32 = vpack.c.bf16 %v1546_v17, %v1544_v60 }
 0x4ba   : > { %3696 = vmatmul.msk.bf16.gmra.mxu3 %vm1222_vm0, %v1563_v32  ;;  %2232 = vmatmul.bf16.gmra.mxu0 %v4637_v54 }
 0x4bd   : > { %v1548_v14 = vpop.f32.mrf.mxu2 }
 0x4be   : > { %v1549_v47 = vadd.f32 %v4068_v6, %v1548_v14 }
 0x4c5   : > { %v1550_v48 = vpop.f32.mrf.mxu2 }
 0x4c6   : > { %v1551_v13 = vadd.f32 %v4068_v6, %v1550_v48 }
 0x4c8   : > { %v1564_v49 = vpack.c.bf16 %v1551_v13, %v1549_v47 }
 0x4ca   : > { %3697 = vmatmul.msk.bf16.gmra.mxu3 %vm1222_vm0, %v1564_v49  ;;  %2237 = vmatmul.bf16.gmra.mxu0 %v4640_v57 }
 0x4cd   : > { %v1553_v50 = vpop.f32.mrf.mxu2 }
 0x4ce   : > { %v1554_v40 = vadd.f32 %v4068_v6, %v1553_v50 }
 0x4d5   : > { %v1555_v52 = vpop.f32.mrf.mxu2 }
 0x4d6   : > { %v1556_v55 = vadd.f32 %v4068_v6, %v1555_v52 }
 0x4d8   : > { %v1565_v56 = vpack.c.bf16 %v1556_v55, %v1554_v40 }
 0x4da   : > { %3698 = vmatmul.msk.bf16.gmra.mxu3 %vm1222_vm0, %v1565_v56  ;;  %2242 = vmatmul.bf16.gmra.mxu0 %v4643_v61 }
 0x4ea   : > { %1872 = vmatmul.bf16.vlgmr.msra.gmra.mxu3 %v4634_v51  ;;  %2247 = vmatmul.bf16.gmra.mxu0 %v4646_v3  ;;  %v4839_v51 = vpop.f32.mrf.mxu0 }
 0x4f2   : > { %v4842_v0 = vpop.f32.mrf.mxu0 }
 0x4fa   : > { %1877 = vmatmul.bf16.gmra.mxu3 %v4637_v54  ;;  %2252 = vmatmul.bf16.gmra.mxu0 %v4649_v23 }
 0x50a   : > { %1882 = vmatmul.bf16.gmra.mxu3 %v4640_v57  ;;  %2257 = vmatmul.bf16.gmra.mxu0 %v4652_v27  ;;  %v4847_v57 = vpop.f32.mrf.mxu0 }
 0x512   : > { %v4849_v5 = vpop.f32.mrf.mxu0 }
 0x51a   : > { %1887 = vmatmul.bf16.gmra.mxu3 %v4643_v61  ;;  %2262 = vmatmul.bf16.gmra.mxu0 %v4655_v30  ;;  %v4854_v42 = vpop.f32.mrf.mxu0 }
 0x522   : > { %v4856_v7 = vpop.f32.mrf.mxu0 }
 0x52a   : > { %1892 = vmatmul.bf16.gmra.mxu3 %v4646_v3  ;;  %v4859_v8 = vpop.f32.mrf.mxu0 }
 0x52d   : > { %v1631_v54 = vpop.f32.mrf.mxu3 }
 0x535   : > { %v4844_v1 = vpop.f32.mrf.mxu3 }
 0x53a   : > { %1897 = vmatmul.bf16.gmra.mxu3 %v4649_v23 }
 0x53d   : > { %v1636_v4 = vpop.f32.mrf.mxu3 }
 0x545   : > { %v4851_v6 = vpop.f32.mrf.mxu3 }
 0x54a   : > { %1902 = vmatmul.bf16.gmra.mxu3 %v4652_v27  ;;  %v1628_v27 = vpop.f32.mrf.mxu0 }
 0x54d   : > { %v1641_v61 = vpop.f32.mrf.mxu3 }
 0x54e   : > { %1675 = vmax.xlane.f32.xlu0 %v1641_v61 }
 0x555   : > { %v1643_v3 = vpop.f32.mrf.mxu3 }
 0x556   : > { %1677 = vmax.xlane.f32.xlu0 %v1643_v3 }
 0x55a   : > { %1907 = vmatmul.bf16.gmra.mxu3 %v4655_v30 }
 0x55d   : > { %v1646_v23 = vpop.f32.mrf.mxu3 }
 0x55e   : > { %1671 = vmax.xlane.f32.xlu0 %v1636_v4  ;;  %1679 = vmax.xlane.f32.xlu1 %v1646_v23 }
 0x565   : > { %v1648_v36 = vpop.f32.mrf.mxu3 }
 0x566   : > { %1667 = vmax.xlane.f32.xlu0 %v1631_v54  ;;  %1673 = vmax.xlane.f32.xlu1 %v4851_v6 }
 0x567   : > { %1681 = vmax.xlane.f32.xlu2 %v1648_v36 }
 0x56e   : > { %1663 = vmax.xlane.f32.xlu1 %v4859_v8  ;;  %1665 = vmax.xlane.f32.xlu0 %v1628_v27 }
 0x56f   : > { %1669 = vmax.xlane.f32.xlu2 %v4844_v1 }
 0x576   : > { %1661 = vmax.xlane.f32.xlu1 %v4856_v7  ;;  %1655 = vmax.xlane.f32.xlu0 %v4847_v57 }
 0x577   : > { %1659 = vmax.xlane.f32.xlu2 %v4854_v42 }
 0x57e   : > { %1653 = vmax.xlane.f32.xlu1 %v4842_v0 }
 0x57f   : > { %1657 = vmax.xlane.f32.xlu2 %v4849_v5 }
 0x587   : > { %1651 = vmax.xlane.f32.xlu2 %v4839_v51 }
 0x5c1   : > { %v1676_v30 = vpop.xlane.xlu0 %1675 }
 0x5c2   : > { %v1695_v9 = vsub.f32 %v1641_v61, %v1676_v30 }
 0x5c4   : > { %v1723_v10 = vmul.f32 1.442695, %v1695_v9 }
 0x5c6   : > { %4135 = vpow2.f32 %v1723_v10 }
 0x5c9   : > { %v1678_v12 = vpop.xlane.xlu0 %1677 }
 0x5ca   : > { %v1696_v21 = vsub.f32 %v1643_v3, %v1678_v12 }
 0x5cc   : > { %v4871_v45 = vpop.eup %4135  ;;  %v1725_v24 = vmul.f32 1.442695, %v1696_v21 }
 0x5cd   : > { %1755 = vadd.xlane.f32.xlu0 %v4871_v45 }
 0x5ce   : > { %4137 = vpow2.f32 %v1725_v24 }
 0x5d1   : > { %v1672_v20 = vpop.xlane.xlu0 %1671  ;;  %v1680_v25 = vpop.xlane.xlu1 %1679 }
 0x5d2   : > { %v1693_v26 = vsub.f32 %v1636_v4, %v1672_v20  ;;  %v1697_v18 = vsub.f32 %v1646_v23, %v1680_v25 }
 0x5d4   : > { %v4874_v31 = vpop.eup %4137  ;;  %v1719_v39 = vmul.f32 1.442695, %v1693_v26  ;;  %v1727_v19 = vmul.f32 1.442695, %v1697_v18  ;;  %v3554_v18 = vld [vmem:[%s4600_s3 + $0xa0] sm:$0xff] }
 0x5d5   : > { %1757 = vadd.xlane.f32.xlu2 %v4874_v31 }
 0x5d6   : > { %4139 = vpow2.f32 %v1719_v39  ;;  %v3556_v39 = vld [vmem:[%s4600_s3 + $0xb0] sm:$0xff] }
 0x5d7   : > { %4141 = vpow2.f32 %v1727_v19  ;;  %v3555_v19 = vld [vmem:[%s4600_s3 + $0xa8] sm:$0xff] }
 0x5d9   : > { %v1668_v33 = vpop.xlane.xlu0 %1667  ;;  %v1674_v11 = vpop.xlane.xlu1 %1673 }
 0x5da   : > { %v1691_v46 = vsub.f32 %v1631_v54, %v1668_v33  ;;  %v1682_v29 = vpop.xlane.xlu2 %1681  ;;  %v1694_v2 = vsub.f32 %v4851_v6, %v1674_v11  ;;  %v598_v33 = vld [vmem:[%s4600_s3 + $0x70] sm:$0xff]  ;;  %v3557_v11 = vld [vmem:[%s4600_s3 + $0xb8] sm:$0xff] }
 0x5db   : > { %v1698_v34 = vsub.f32 %v1648_v36, %v1682_v29  ;;  %v596_v29 = vld [vmem:[%s4600_s3 + $0x60] sm:$0xff] }
 0x5dc   : > { %v4878_v38 = vpop.eup %4139  ;;  %v1715_v43 = vmul.f32 1.442695, %v1691_v46  ;;  %v1721_v32 = vmul.f32 1.442695, %v1694_v2  ;;  %v594_v46 = vld [vmem:[%s4600_s3 + $0x50] sm:$0xff]  ;;  %v592_v2 = vld [vmem:[%s4600_s3 + $0x40] sm:$0xff] }
 0x5dd   : > { %v1729_v16 = vmul.f32 1.442695, %v1698_v34  ;;  %1751 = vadd.xlane.f32.xlu1 %v4878_v38  ;;  %v4882_v53 = vpop.eup %4141  ;;  %v599_v34 = vld [vmem:[%s4600_s3 + $0x78] sm:$0xff] }
 0x5de   : > { %4143 = vpow2.f32 %v1715_v43  ;;  %v595_v43 = vld [vmem:[%s4600_s3 + $0x58] sm:$0xff] }
 0x5df   : > { %4145 = vpow2.f32 %v1729_v16  ;;  %v597_v16 = vld [vmem:[%s4600_s3 + $0x68] sm:$0xff] }
 0x5e0   : > { %4147 = vpow2.f32 %v1721_v32 }
 0x5e1   : > { %v1664_v60 = vpop.xlane.xlu1 %1663  ;;  %v1666_v17 = vpop.xlane.xlu0 %1665 }
 0x5e2   : > { %v1670_v41 = vpop.xlane.xlu2 %1669  ;;  %v1690_v14 = vsub.f32 %v1628_v27, %v1666_v17  ;;  %v1689_v52 = vsub.f32 %v4859_v8, %v1664_v60  ;;  %v3896_v60 = vld [vmem:[%s4580_s22 + $0x20] sm:$0xff] }
 0x5e3   : > { %v1692_v48 = vsub.f32 %v4844_v1, %v1670_v41  ;;  %1096 = vmatmul.bf16.gmra.mxu1 %v3896_v60 }
 0x5e4   : > { %v4885_v47 = vpop.eup %4143  ;;  %v1713_v13 = vmul.f32 1.442695, %v1690_v14  ;;  %v1711_v56 = vmul.f32 1.442695, %v1689_v52  ;;  %v3897_v14 = vld [vmem:[%s4580_s22 + $0x28] sm:$0xff] }
 0x5e5   : > { %v1717_v49 = vmul.f32 1.442695, %v1692_v48  ;;  %1747 = vadd.xlane.f32.xlu2 %v4885_v47  ;;  %1759 = vadd.xlane.f32.xlu1 %v4882_v53  ;;  %v4889_v50 = vpop.eup %4145 }
 0x5e6   : > { %1761 = vadd.xlane.f32.xlu0 %v4889_v50  ;;  %v4895_v6 = vpop.eup %4147 }
 0x5e7   : > { %4149 = vpow2.f32 %v1717_v49 }
 0x5e8   : > { %4151 = vpow2.f32 %v1713_v13 }
 0x5e9   : > { %v1662_v40 = vpop.xlane.xlu1 %1661  ;;  %v1656_v55 = vpop.xlane.xlu0 %1655  ;;  %4153 = vpow2.f32 %v1711_v56 }
 0x5ea   : > { %v1660_v54 = vpop.xlane.xlu2 %1659  ;;  %v1685_v1 = vsub.f32 %v4847_v57, %v1656_v55  ;;  %v1688_v57 = vsub.f32 %v4856_v7, %v1662_v40 }
 0x5eb   : > { %v1687_v4 = vsub.f32 %v4854_v42, %v1660_v54 }
 0x5ec   : > { %v1703_v61 = vmul.f32 1.442695, %v1685_v1  ;;  %v1709_v10 = vmul.f32 1.442695, %v1688_v57 }
 0x5ed   : > { %v4897_v3 = vpop.eup %4149  ;;  %v1707_v23 = vmul.f32 1.442695, %v1687_v4 }
 0x5ee   : > { %v4899_v36 = vpop.eup %4151  ;;  %1749 = vadd.xlane.f32.xlu1 %v4897_v3  ;;  %1753 = vadd.xlane.f32.xlu0 %v4895_v6 }
 0x5ef   : > { %4155 = vpow2.f32 %v1707_v23  ;;  %1745 = vadd.xlane.f32.xlu2 %v4899_v36  ;;  %v4907_v9 = vpop.eup %4153 }
 0x5f0   : > { %4157 = vpow2.f32 %v1703_v61  ;;  %v3898_v61 = vld [vmem:[%s4580_s22 + $0x30] sm:$0xff] }
 0x5f1   : > { %v1654_v42 = vpop.xlane.xlu1 %1653 }
 0x5f2   : > { %v1658_v8 = vpop.xlane.xlu2 %1657  ;;  %v1684_v27 = vsub.f32 %v4842_v0, %v1654_v42 }
 0x5f3   : > { %v1686_v30 = vsub.f32 %v4849_v5, %v1658_v8  ;;  %1101 = vmatmul.bf16.gmra.mxu1 %v3897_v14 }
 0x5f4   : > { %v1701_v12 = vmul.f32 1.442695, %v1684_v27 }
 0x5f5   : > { %v4909_v21 = vpop.eup %4155  ;;  %v1705_v22 = vmul.f32 1.442695, %v1686_v30 }
 0x5f6   : > { %v4911_v24 = vpop.eup %4157  ;;  %4159 = vpow2.f32 %v1701_v12  ;;  %1739 = vadd.xlane.f32.xlu1 %v4909_v21  ;;  %1743 = vadd.xlane.f32.xlu0 %v4907_v9 }
 0x5f7   : > { %4161 = vpow2.f32 %v1705_v22  ;;  %1735 = vadd.xlane.f32.xlu2 %v4911_v24 }
 0x5f8   : > { %4163 = vpow2.f32 %v1709_v10 }
 0x5fa   : > { %v1652_v0 = vpop.xlane.xlu2 %1651 }
 0x5fb   : > { %v1683_v5 = vsub.f32 %v4839_v51, %v1652_v0 }
 0x5fc   : > { %v4917_v7 = vpop.eup %4159 }
 0x5fd   : > { %v4919_v20 = vpop.eup %4161  ;;  %v1699_v25 = vmul.f32 1.442695, %v1683_v5 }
 0x5fe   : > { %v4921_v26 = vpop.eup %4163  ;;  %1737 = vadd.xlane.f32.xlu1 %v4919_v20 }
 0x5ff   : > { %4165 = vpow2.f32 %v1699_v25  ;;  %1741 = vadd.xlane.f32.xlu0 %v4921_v26  ;;  %1733 = vadd.xlane.f32.xlu2 %v4917_v7 }
 0x603   : > { %1106 = vmatmul.bf16.gmra.mxu1 %v3898_v61 }
 0x605   : > { %v4926_v51 = vpop.eup %4165 }
 0x607   : > { %1731 = vadd.xlane.f32.xlu0 %v4926_v51 }
 0x617   : > { %972 = vperm.xlu2 %4065, %v3556_v39   ;;  %962 = vperm.xlu1 %4064, %v3554_v18  }
 0x61b   : > { %967 = vperm.xlu0 %4066, %v3555_v19  }
 0x61f   : > { %803 = vperm.xlu2 %4065, %v598_v33   ;;  %977 = vperm.xlu1 %4064, %v3557_v11  }
 0x623   : > { %783 = vperm.xlu0 %4066, %v594_v46   ;;  %v4955_v46 = vpop.f32.mrf.mxu0 }
 0x627   : > { %793 = vperm.xlu2 %4065, %v596_v29   ;;  %808 = vperm.xlu1 %4064, %v599_v34  }
 0x62b   : > { %778 = vperm.xlu0 %4066, %v593_v35  }
 0x62f   : > { %788 = vperm.xlu2 %4065, %v595_v43   ;;  %798 = vperm.xlu1 %4064, %v597_v16  }
 0x637   : > { %773 = vperm.xlu1 %4064, %v592_v2  }
 0x640   : > { %v1756_v41 = vpop.xlane.xlu0 %1755 }
 0x648   : > { %v1758_v17 = vpop.xlane.xlu2 %1757 }
 0x650   : > { %v1752_v32 = vpop.xlane.xlu1 %1751 }
 0x658   : > { %v1748_v48 = vpop.xlane.xlu2 %1747  ;;  %v1760_v13 = vpop.xlane.xlu1 %1759 }
 0x659   : > { %4167 = vrcp.f32 %v1760_v13  ;;  %v1762_v49 = vpop.xlane.xlu0 %1761 }
 0x65a   : > { %4169 = vrcp.f32 %v1762_v49 }
 0x65b   : > { %4171 = vrcp.f32 %v1758_v17 }
 0x65c   : > { %4173 = vrcp.f32 %v1756_v41  ;;  %v1087_v41 = vpop.f32.mrf.mxu1 }
 0x65f   : > { %v4168_v52 = vpop.eup %4167 }
 0x660   : > { %v4170_v40 = vpop.eup %4169  ;;  %v1793_v55 = vmul.f32 %v4168_v52, %v4882_v53 }
 0x661   : > { %v1794_v54 = vmul.f32 %v4170_v40, %v4889_v50  ;;  %v1754_v1 = vpop.xlane.xlu0 %1753  ;;  %v4172_v23 = vpop.eup %4171 }
 0x662   : > { %v1746_v56 = vpop.xlane.xlu2 %1745  ;;  %v4174_v57 = vpop.eup %4173  ;;  %4175 = vrcp.f32 %v1754_v1  ;;  %v1792_v42 = vmul.f32 %v4172_v23, %v4874_v31  ;;  %v3899_v31 = vld [vmem:[%s4580_s22 + $0x38] sm:$0xff] }
 0x663   : > { %v1802_v4 = vpack.c.bf16 %v1794_v54, %v1793_v55  ;;  %4177 = vrcp.f32 %v1752_v32  ;;  %v1791_v27 = vmul.f32 %v4174_v57, %v4871_v45  ;;  %v1750_v30 = vpop.xlane.xlu1 %1749  ;;  %1111 = vmatmul.bf16.gmra.mxu1 %v3899_v31  ;;  %v4959_v32 = vpop.f32.mrf.mxu0 }
 0x664   : > { %4179 = vrcp.f32 %v1750_v30  ;;  %v4966_v54 = vpop.f32.mrf.mxu3 }
 0x665   : > { %1815 = vmatpush.bf16.xpose.msrb.mxu1 %v1802_v4  ;;  %v1801_v53 = vpack.c.bf16 %v1792_v42, %v1791_v27  ;;  %4181 = vrcp.f32 %v1748_v48 }
 0x668   : > { %v4176_v10 = vpop.eup %4175 }
 0x669   : > { %v4178_v50 = vpop.eup %4177  ;;  %v1790_v12 = vmul.f32 %v4176_v10, %v4895_v6  ;;  %v1744_v22 = vpop.xlane.xlu0 %1743 }
 0x66a   : > { %v1736_v8 = vpop.xlane.xlu2 %1735  ;;  %v1789_v5 = vmul.f32 %v4178_v50, %v4878_v38  ;;  %v4180_v39 = vpop.eup %4179  ;;  %4183 = vrcp.f32 %v1744_v22 }
 0x66b   : > { %v4182_v18 = vpop.eup %4181  ;;  %v1740_v19 = vpop.xlane.xlu1 %1739  ;;  %v1788_v45 = vmul.f32 %v4180_v39, %v4897_v3  ;;  %4185 = vrcp.f32 %v1746_v56 }
 0x66c   : > { %v1800_v25 = vpack.c.bf16 %v1790_v12, %v1789_v5  ;;  %v1787_v6 = vmul.f32 %v4182_v18, %v4885_v47  ;;  %v4963_v55 = vpop.f32.mrf.mxu0 }
 0x66d   : > { %1816 = vmatpush.bf16.xpose.msrb.mxu1 %v1801_v53 }
 0x66e   : > { %v1799_v29 = vpack.c.bf16 %v1788_v45, %v1787_v6 }
 0x670   : > { %v4184_v38 = vpop.eup %4183 }
 0x671   : > { %v4186_v34 = vpop.eup %4185  ;;  %v1785_v35 = vmul.f32 %v4184_v38, %v4907_v9 }
 0x672   : > { %v1734_v0 = vpop.xlane.xlu2 %1733  ;;  %v1742_v11 = vpop.xlane.xlu0 %1741  ;;  %v1786_v3 = vmul.f32 %v4186_v34, %v4899_v36 }
 0x673   : > { %4187 = vrcp.f32 %v1742_v11  ;;  %v1738_v43 = vpop.xlane.xlu1 %1737 }
 0x674   : > { %4189 = vrcp.f32 %v1740_v19  ;;  %v1798_v2 = vpack.c.bf16 %v1786_v3, %v1785_v35  ;;  %v2235_v31 = vpop.f32.mrf.mxu0 }
 0x675   : > { %1817 = vmatpush.bf16.xpose.msrb.mxu1 %v1800_v25  ;;  %4191 = vrcp.f32 %v1738_v43 }
 0x676   : > { %4193 = vrcp.f32 %v1736_v8 }
 0x679   : > { %v4188_v60 = vpop.eup %4187 }
 0x67a   : > { %v4952_v33 = vpop.permute.xlu2 %972  ;;  %v1732_v17 = vpop.xlane.xlu0 %1731  ;;  %v1784_v14 = vmul.f32 %v4188_v60, %v4921_v26 }
 0x67b   : > { %v4190_v47 = vpop.eup %4189  ;;  %4195 = vrcp.f32 %v1732_v17  ;;  %v1089_v26 = vpop.f32.mrf.mxu1  ;;  %v4978_v17 = vld [vmem:[%s4570_s30 + $0x3] ss:$0 sm:$0xff] }
 0x67c   : > { %v1783_v9 = vmul.f32 %v4190_v47, %v4909_v21  ;;  %v4192_v52 = vpop.eup %4191  ;;  %4197 = vrcp.f32 %v1734_v0  ;;  %v2238_v47 = vpop.f32.mrf.mxu0 }
 0x67d   : > { %1818 = vmatpush.bf16.xpose.msrb.mxu1 %v1799_v29  ;;  %v4194_v36 = vpop.eup %4193  ;;  %v1782_v56 = vmul.f32 %v4192_v52, %v4919_v20 }
 0x67e   : > { %v1797_v49 = vpack.c.bf16 %v1784_v14, %v1783_v9  ;;  %v1781_v61 = vmul.f32 %v4194_v36, %v4911_v24 }
 0x680   : > { %v1796_v23 = vpack.c.bf16 %v1782_v56, %v1781_v61 }
 0x681   : > { %v4196_v57 = vpop.eup %4195 }
 0x682   : > { %v804_v16 = vpop.permute.xlu2 %803  ;;  %v4198_v8 = vpop.eup %4197  ;;  %v1779_v50 = vmul.f32 %v4196_v57, %v4926_v51 }
 0x683   : > { %v904_v27 = vadd.f32 %v4833_v37, %v804_v16  ;;  %v1780_v24 = vmul.f32 %v4198_v8, %v4917_v7  ;;  %v1875_v37 = vpop.f32.mrf.mxu3  ;;  %v1092_v18 = vpop.f32.mrf.mxu1  ;;  %v2234_v8 = vadd.f32 %v4978_v17, %v4963_v55  ;;  %v2239_v55 = vadd.f32 %v4978_v17, %v2238_v47 }
 0x684   : > { %v1093_v52 = vadd.f32 %v1092_v18, %v4952_v33 }
 0x685   : > { %1819 = vmatpush.bf16.xpose.msrb.mxu1 %v1798_v2  ;;  %v922_v0 = vpack.c.bf16 %v904_v27, %v904_v27  ;;  %v1795_v45 = vpack.c.bf16 %v1780_v24, %v1779_v50 }
 0x687   : > { %v2282_v11 = vunpack.c.l.b16 %v922_v0 }
 0x689   : > { %v963_v48 = vpop.permute.xlu1 %962 }
 0x68a   : > { %v794_v13 = vpop.permute.xlu2 %793  ;;  %v1088_v12 = vadd.f32 %v1087_v41, %v963_v48 }
 0x68b   : > { %v899_v51 = vadd.f32 %v4827_v62, %v794_v13  ;;  %v1094_v2 = vpop.f32.mrf.mxu1  ;;  %v1878_v62 = vpop.f32.mrf.mxu3  ;;  %v2231_v13 = vadd.f32 %v4978_v17, %v4959_v32 }
 0x68c   : > { %v1121_v6 = vpack.c.bf16 %v1088_v12, %v1088_v12 }
 0x68d   : > { %v968_v40 = vpop.permute.xlu0 %967  ;;  %1820 = vmatpush.bf16.xpose.msrb.mxu1 %v1797_v49 }
 0x68e   : > { %v1090_v20 = vadd.f32 %v1089_v26, %v968_v40  ;;  %v1807_v34 = vunpack.c.l.b16 %v1121_v6 }
 0x690   : > { %v1122_v39 = vpack.c.bf16 %v1090_v20, %v1090_v20  ;;  %v4992_v20 = vld [vmem:[%s4570_s30 + $0x2] ss:$0 sm:$0xff] }
 0x691   : > { %v978_v1 = vpop.permute.xlu1 %977  ;;  %v1874_v50 = vadd.f32 %v4992_v20, %v4966_v54 }
 0x692   : > { %v789_v4 = vpop.permute.xlu2 %788  ;;  %v1808_v7 = vunpack.c.l.b16 %v1122_v39  ;;  %v1095_v9 = vadd.f32 %v1094_v2, %v978_v1  ;;  %v1879_v39 = vadd.f32 %v4992_v20, %v1878_v62 }
 0x693   : > { %v896_v21 = vadd.f32 %v4823_v59, %v789_v4  ;;  %v1880_v57 = vpop.f32.mrf.mxu3 }
 0x694   : > { %v1811_v16 = vpack.c.b16 %v1808_v7, %v1807_v34  ;;  %v1124_v4 = vpack.c.bf16 %v1095_v9, %v1095_v9 }
 0x695   : > { %v784_v42 = vpop.permute.xlu0 %783  ;;  %v919_v30 = vpack.c.bf16 %v896_v21, %v896_v21  ;;  %1821 = vmatpush.bf16.xpose.msrb.mxu1 %v1796_v23  ;;  %v2240_v23 = vpop.f32.mrf.mxu0 }
 0x696   : > { %v894_v53 = vadd.f32 %v4819_v58, %v784_v42  ;;  %v1810_v21 = vunpack.c.l.b16 %v1124_v4  ;;  %v2241_v0 = vadd.f32 %v4978_v17, %v2240_v23 }
 0x697   : > { %v1928_v59 = vunpack.c.l.b16 %v919_v30 }
 0x698   : > { %v918_v10 = vpack.c.bf16 %v894_v53, %v894_v53 }
 0x699   : > { %v809_v22 = vpop.permute.xlu1 %808 }
 0x69a   : > { %v1927_v5 = vunpack.c.l.b16 %v918_v10  ;;  %v906_v25 = vadd.f32 %v4835_v28, %v809_v22  ;;  %v920_v28 = vpack.c.bf16 %v899_v51, %v899_v51  ;;  %v1876_v10 = vadd.f32 %v4992_v20, %v1875_v37  ;;  %v5004_v37 = vpop.f32.mrf.mxu1 }
 0x69b   : > { %v1883_v30 = vpop.f32.mrf.mxu3 }
 0x69c   : > { %v1930_v19 = vpack.c.b16 %v1928_v59, %v1927_v5  ;;  %v923_v58 = vpack.c.bf16 %v906_v25, %v906_v25  ;;  %v2280_v41 = vunpack.c.l.b16 %v920_v28  ;;  %v1913_v12 = vpack.c.bf16 %v1876_v10, %v1874_v50 }
 0x69d   : > { %1822 = vmatpush.bf16.xpose.msrb.mxu1 %v1795_v45  ;;  %v779_v3 = vpop.permute.xlu0 %778  ;;  %v2243_v27 = vpop.f32.mrf.mxu0  ;;  %v2270_v59 = vpack.c.bf16 %v2241_v0, %v2239_v55 }
 0x69e   : > { %v2283_v29 = vunpack.c.l.b16 %v923_v58  ;;  %v891_v14 = vadd.f32 %v4817_v15, %v779_v3  ;;  %v1123_v15 = vpack.c.bf16 %v1093_v52, %v1093_v52  ;;  %v2244_v45 = vadd.f32 %v4978_v17, %v2243_v27 }
 0x6a0   : > { %v2285_v38 = vpack.c.b16 %v2283_v29, %v2282_v11  ;;  %v917_v36 = vpack.c.bf16 %v891_v14, %v891_v14  ;;  %v1809_v42 = vunpack.c.l.b16 %v1123_v15  ;;  %v1884_v29 = vadd.f32 %v4992_v20, %v1883_v30 }
 0x6a1   : > { %v799_v35 = vpop.permute.xlu1 %798 }
 0x6a2   : > { %v901_v43 = vadd.f32 %v4829_v63, %v799_v35  ;;  %2318 = vmatpush.bf16.msrb.mxu3 %v2285_v38  ;;  %v2229_v63 = vadd.f32 %v4978_v17, %v4955_v46  ;;  %v1926_v32 = vunpack.c.l.b16 %v917_v36  ;;  %v1812_v33 = vpack.c.b16 %v1810_v21, %v1809_v42  ;;  %v5009_v11 = vpop.f32.mrf.mxu1 }
 0x6a3   : > { %v1885_v24 = vpop.f32.mrf.mxu3 }
 0x6a4   : > { %v921_v60 = vpack.c.bf16 %v901_v43, %v901_v43  ;;  %1823 = vmatmul.bf16.vlgmr.msrb.gmra.mxu1 %v1811_v16  ;;  %v2268_v26 = vpack.c.bf16 %v2231_v13, %v2229_v63  ;;  %v1886_v51 = vadd.f32 %v4992_v20, %v1885_v24 }
 0x6a5   : > { %1963 = vmatpush.bf16.msra.mxu1 %v1930_v19  ;;  %v2245_v22 = vpop.f32.mrf.mxu0 }
 0x6a6   : > { %v2281_v48 = vunpack.c.l.b16 %v921_v60  ;;  %v2246_v18 = vadd.f32 %v4978_v17, %v2245_v22  ;;  %v1915_v34 = vpack.c.bf16 %v1886_v51, %v1884_v29 }
 0x6a8   : > { %v2284_v49 = vpack.c.b16 %v2281_v48, %v2280_v41  ;;  %v2271_v6 = vpack.c.bf16 %v2246_v18, %v2244_v45 }
 0x6a9   : > { %v774_v40 = vpop.permute.xlu1 %773 }
 0x6aa   : > { %v889_v56 = vadd.f32 %v4813_v44, %v774_v40  ;;  %2319 = vmatpush.bf16.msrb.mxu3 %v2284_v49  ;;  %v2236_v44 = vadd.f32 %v4978_v17, %v2235_v31  ;;  %v1881_v31 = vadd.f32 %v4992_v20, %v1880_v57  ;;  %v5015_v35 = vpop.f32.mrf.mxu1 }
 0x6ab   : > { %v1888_v25 = vpop.f32.mrf.mxu3 }
 0x6ac   : > { %v916_v61 = vpack.c.bf16 %v889_v56, %v889_v56  ;;  %v2269_v53 = vpack.c.bf16 %v2236_v44, %v2234_v8  ;;  %v1914_v54 = vpack.c.bf16 %v1881_v31, %v1879_v39  ;;  %v1889_v62 = vadd.f32 %v4992_v20, %v1888_v25 }
 0x6ad   : > { %3733 = vmatmul.msk.bf16.vlgmr.msrb.gmra.mxu3 %vm1222_vm0, %v2268_v26  ;;  %v2248_v5 = vpop.f32.mrf.mxu0 }
 0x6ae   : > { %v1925_v1 = vunpack.c.l.b16 %v916_v61  ;;  %v2249_v43 = vadd.f32 %v4978_v17, %v2248_v5 }
 0x6b0   : > { %v1929_v46 = vpack.c.b16 %v1926_v32, %v1925_v1 }
 0x6b2   : > { %1964 = vmatpush.bf16.msra.mxu1 %v1929_v46  ;;  %v5021_v47 = vpop.f32.mrf.mxu1 }
 0x6b3   : > { %v1890_v58 = vpop.f32.mrf.mxu3 }
 0x6b4   : > { %1828 = vmatmul.bf16.gmra.mxu1 %v1812_v33  ;;  %v1891_v60 = vadd.f32 %v4992_v20, %v1890_v58 }
 0x6b5   : > { %v2250_v19 = vpop.f32.mrf.mxu0 }
 0x6b6   : > { %v2251_v28 = vadd.f32 %v4978_v17, %v2250_v19  ;;  %v1916_v41 = vpack.c.bf16 %v1891_v60, %v1889_v62 }
 0x6b8   : > { %v2272_v16 = vpack.c.bf16 %v2251_v28, %v2249_v43 }
 0x6ba   : > { %v5027_v49 = vpop.f32.mrf.mxu1 }
 0x6bb   : > { %v1893_v38 = vpop.f32.mrf.mxu3 }
 0x6bc   : > { %v1894_v56 = vadd.f32 %v4992_v20, %v1893_v38 }
 0x6bd   : > { %3734 = vmatmul.msk.bf16.gmra.mxu3 %vm1222_vm0, %v2269_v53  ;;  %v2253_v7 = vpop.f32.mrf.mxu0 }
 0x6be   : > { %v2254_v9 = vadd.f32 %v4978_v17, %v2253_v7 }
 0x6c2   : > { %v5032_v4 = vpop.f32.mrf.mxu1 }
 0x6c3   : > { %v1895_v2 = vpop.f32.mrf.mxu3 }
 0x6c4   : > { %3712 = vmatmul.msk.bf16.vlgmr.msra.gmra.mxu1 %vm1222_vm0, %v1913_v12  ;;  %v1896_v52 = vadd.f32 %v4992_v20, %v1895_v2 }
 0x6c5   : > { %v2255_v3 = vpop.f32.mrf.mxu0 }
 0x6c6   : > { %v2256_v13 = vadd.f32 %v4978_v17, %v2255_v3  ;;  %v1917_v26 = vpack.c.bf16 %v1896_v52, %v1894_v56 }
 0x6c8   : > { %v2273_v63 = vpack.c.bf16 %v2256_v13, %v2254_v9 }
 0x6cb   : > { %v1898_v48 = vpop.f32.mrf.mxu3 }
 0x6cc   : > { %v1899_v46 = vadd.f32 %v4992_v20, %v1898_v48 }
 0x6cd   : > { %3735 = vmatmul.msk.bf16.gmra.mxu3 %vm1222_vm0, %v2270_v59  ;;  %v2258_v14 = vpop.f32.mrf.mxu0 }
 0x6ce   : > { %v2259_v15 = vadd.f32 %v4978_v17, %v2258_v14 }
 0x6d3   : > { %v1900_v36 = vpop.f32.mrf.mxu3 }
 0x6d4   : > { %3713 = vmatmul.msk.bf16.gmra.mxu1 %vm1222_vm0, %v1914_v54  ;;  %v1901_v57 = vadd.f32 %v4992_v20, %v1900_v36 }
 0x6d5   : > { %v2260_v40 = vpop.f32.mrf.mxu0 }
 0x6d6   : > { %v2261_v61 = vadd.f32 %v4978_v17, %v2260_v40  ;;  %v1918_v42 = vpack.c.bf16 %v1901_v57, %v1899_v46 }
 0x6d8   : > { %v2274_v21 = vpack.c.bf16 %v2261_v61, %v2259_v15 }
 0x6db   : > { %v1903_v1 = vpop.f32.mrf.mxu3 }
 0x6dc   : > { %v1904_v12 = vadd.f32 %v4992_v20, %v1903_v1 }
 0x6dd   : > { %3736 = vmatmul.msk.bf16.gmra.mxu3 %vm1222_vm0, %v2271_v6  ;;  %v2263_v32 = vpop.f32.mrf.mxu0 }
 0x6de   : > { %v2264_v30 = vadd.f32 %v4978_v17, %v2263_v32 }
 0x6e0   : > { %v5038_v23 = vpop.f32.mrf.mxu1 }
 0x6e3   : > { %v1905_v44 = vpop.f32.mrf.mxu3 }
 0x6e4   : > { %3714 = vmatmul.msk.bf16.gmra.mxu1 %vm1222_vm0, %v1915_v34  ;;  %v1906_v50 = vadd.f32 %v4992_v20, %v1905_v44 }
 0x6e5   : > { %v2265_v33 = vpop.f32.mrf.mxu0 }
 0x6e6   : > { %v2266_v8 = vadd.f32 %v4978_v17, %v2265_v33  ;;  %v1919_v24 = vpack.c.bf16 %v1906_v50, %v1904_v12 }
 0x6e8   : > { %v5044_v27 = vpop.f32.mrf.mxu1  ;;  %v2275_v53 = vpack.c.bf16 %v2266_v8, %v2264_v30 }
 0x6eb   : > { %v1908_v10 = vpop.f32.mrf.mxu3 }
 0x6ec   : > { %v1909_v17 = vadd.f32 %v4992_v20, %v1908_v10 }
 0x6ed   : > { %3737 = vmatmul.msk.bf16.gmra.mxu3 %vm1222_vm0, %v2272_v16 }
 0x6f3   : > { %v1910_v0 = vpop.f32.mrf.mxu3 }
 0x6f4   : > { %3715 = vmatmul.msk.bf16.gmra.mxu1 %vm1222_vm0, %v1916_v41  ;;  %v1911_v5 = vadd.f32 %v4992_v20, %v1910_v0 }
 0x6f6   : > { %v1920_v39 = vpack.c.bf16 %v1911_v5, %v1909_v17 }
 0x6fd   : > { %3738 = vmatmul.msk.bf16.gmra.mxu3 %vm1222_vm0, %v2273_v63 }
 0x704   : > { %3716 = vmatmul.msk.bf16.gmra.mxu1 %vm1222_vm0, %v1917_v26 }
 0x70d   : > { %3739 = vmatmul.msk.bf16.gmra.mxu3 %vm1222_vm0, %v2274_v21 }
 0x714   : > { %3717 = vmatmul.msk.bf16.gmra.mxu1 %vm1222_vm0, %v1918_v42 }
 0x71d   : > { %3740 = vmatmul.msk.bf16.gmra.mxu3 %vm1222_vm0, %v2275_v53 }
 0x721   : > { %v1824_v22 = vpop.f32.mrf.mxu1 }
 0x724   : > { %3718 = vmatmul.msk.bf16.gmra.mxu1 %vm1222_vm0, %v1919_v24 }
 0x729   : > { %v1826_v55 = vpop.f32.mrf.mxu1 }
 0x72a   : > { %v3954_v59 = vpack.c.bf16 %v1826_v55, %v1824_v22 }
 0x72c   : > { %3982 = vst [vmem:[#allocation3 + $0x10] sm:$0xff] %v3954_v59  }
 0x730   : > { %v5052_v25 = vpop.f32.mrf.mxu3 }
 0x731   : > { %2361 = vmax.xlane.f32.xlu0 %v5052_v25  ;;  %v1829_v31 = vpop.f32.mrf.mxu1 }
 0x734   : > { %3719 = vmatmul.msk.bf16.gmra.mxu1 %vm1222_vm0, %v1920_v39 }
 0x738   : > { %v5057_v54 = vpop.f32.mrf.mxu3 }
 0x739   : > { %2363 = vmax.xlane.f32.xlu2 %v5057_v54  ;;  %v1831_v18 = vpop.f32.mrf.mxu1 }
 0x73a   : > { %v3959_v19 = vpack.c.bf16 %v1831_v18, %v1829_v31 }
 0x73c   : > { %3983 = vst [vmem:[#allocation3 + $0x20] sm:$0xff] %v3959_v19  }
 0x740   : > { %v5060_v58 = vpop.f32.mrf.mxu3 }
 0x741   : > { %2365 = vmax.xlane.f32.xlu2 %v5060_v58  ;;  %v5090_v2 = vpop.f32.mrf.mxu1 }
 0x748   : > { %v5063_v45 = vpop.f32.mrf.mxu3 }
 0x749   : > { %2367 = vmax.xlane.f32.xlu1 %v5063_v45  ;;  %v5092_v62 = vpop.f32.mrf.mxu1 }
 0x750   : > { %v5066_v20 = vpop.f32.mrf.mxu3 }
 0x751   : > { %2369 = vmax.xlane.f32.xlu0 %v5066_v20  ;;  %v5094_v41 = vpop.f32.mrf.mxu1 }
 0x758   : > { %v5069_v6 = vpop.f32.mrf.mxu3 }
 0x759   : > { %2371 = vmax.xlane.f32.xlu2 %v5069_v6  ;;  %v5096_v14 = vpop.f32.mrf.mxu1 }
 0x760   : > { %v5072_v51 = vpop.f32.mrf.mxu3 }
 0x761   : > { %2373 = vmax.xlane.f32.xlu1 %v5072_v51  ;;  %v5098_v48 = vpop.f32.mrf.mxu1 }
 0x768   : > { %v5075_v29 = vpop.f32.mrf.mxu3 }
 0x769   : > { %2375 = vmax.xlane.f32.xlu0 %v5075_v29  ;;  %v5100_v13 = vpop.f32.mrf.mxu1 }
 0x770   : > { %v5078_v7 = vpop.f32.mrf.mxu3 }
 0x771   : > { %2377 = vmax.xlane.f32.xlu2 %v5078_v7  ;;  %v5102_v9 = vpop.f32.mrf.mxu1 }
 0x778   : > { %v5081_v38 = vpop.f32.mrf.mxu3 }
 0x779   : > { %2379 = vmax.xlane.f32.xlu1 %v5081_v38  ;;  %v5104_v63 = vpop.f32.mrf.mxu1 }
 0x780   : > { %v5084_v34 = vpop.f32.mrf.mxu3 }
 0x781   : > { %2381 = vmax.xlane.f32.xlu0 %v5084_v34  ;;  %v5112_v56 = vpop.f32.mrf.mxu1 }
 0x788   : > { %v5087_v28 = vpop.f32.mrf.mxu3 }
 0x789   : > { %2383 = vmax.xlane.f32.xlu2 %v5087_v28  ;;  %v5118_v32 = vpop.f32.mrf.mxu1 }
 0x790   : > { %v2351_v43 = vpop.f32.mrf.mxu3 }
 0x791   : > { %2385 = vmax.xlane.f32.xlu1 %v2351_v43  ;;  %v5126_v44 = vpop.f32.mrf.mxu1 }
 0x798   : > { %v2353_v16 = vpop.f32.mrf.mxu3 }
 0x799   : > { %2387 = vmax.xlane.f32.xlu0 %v2353_v16  ;;  %v5130_v22 = vpop.f32.mrf.mxu1 }
 0x7a0   : > { %v2356_v3 = vpop.f32.mrf.mxu3 }
 0x7a1   : > { %2389 = vmax.xlane.f32.xlu2 %v2356_v3  ;;  %v5137_v17 = vpop.f32.mrf.mxu1 }
 0x7a4   : > { %v5108_v40 = vpop.xlane.xlu0 %2361 }
 0x7a8   : > { %v2358_v60 = vpop.f32.mrf.mxu3 }
 0x7a9   : > { %2391 = vmax.xlane.f32.xlu1 %v2358_v60 }
 0x7ac   : > { %v5106_v52 = vpop.xlane.xlu2 %2363 }
 0x7b4   : > { %v5114_v26 = vpop.xlane.xlu2 %2365 }
 0x7bc   : > { %v5110_v36 = vpop.xlane.xlu1 %2367 }
 0x7c4   : > { %v5116_v61 = vpop.xlane.xlu0 %2369 }
 0x7cc   : > { %v5120_v1 = vpop.xlane.xlu2 %2371 }
 0x7d4   : > { %v2374_v15 = vpop.xlane.xlu1 %2373 }
 0x7dc   : > { %v5122_v21 = vpop.xlane.xlu0 %2375 }
 0x7e4   : > { %v5124_v46 = vpop.xlane.xlu2 %2377 }
 0x7ec   : > { %v2380_v57 = vpop.xlane.xlu1 %2379 }
 0x7f4   : > { %v2382_v42 = vpop.xlane.xlu0 %2381 }
 0x7fc   : > { %v2384_v53 = vpop.xlane.xlu2 %2383 }
 0x804   : > { %v2386_v33 = vpop.xlane.xlu1 %2385 }
 0x805   : > { %v2405_v8 = vsub.f32 %v2351_v43, %v2386_v33  ;;  %v5143_v43 = vpop.f32.mrf.mxu1 }
 0x807   : > { %v2433_v30 = vmul.f32 1.442695, %v2405_v8 }
 0x809   : > { %4199 = vpow2.f32 %v2433_v30  ;;  %v2399_v30 = vsub.f32 %v5072_v51, %v2374_v15  ;;  %v2400_v51 = vsub.f32 %v5075_v29, %v5122_v21  ;;  %v2401_v29 = vsub.f32 %v5078_v7, %v5124_v46 }
 0x80b   : > { %v2423_v15 = vmul.f32 1.442695, %v2400_v51  ;;  %v2425_v21 = vmul.f32 1.442695, %v2401_v29 }
 0x80c   : > { %v2388_v10 = vpop.xlane.xlu0 %2387 }
 0x80d   : > { %v2406_v50 = vsub.f32 %v2353_v16, %v2388_v10  ;;  %v2421_v10 = vmul.f32 1.442695, %v2399_v30 }
 0x80f   : > { %v5128_v12 = vpop.eup %4199  ;;  %v2435_v24 = vmul.f32 1.442695, %v2406_v50 }
 0x810   : > { %2465 = vadd.xlane.f32.xlu2 %v5128_v12 }
 0x811   : > { %4201 = vpow2.f32 %v2435_v24 }
 0x814   : > { %v2390_v0 = vpop.xlane.xlu2 %2389 }
 0x815   : > { %v2407_v55 = vsub.f32 %v2356_v3, %v2390_v0  ;;  %v5150_v3 = vpop.f32.mrf.mxu1 }
 0x817   : > { %v5133_v59 = vpop.eup %4201  ;;  %v2437_v5 = vmul.f32 1.442695, %v2407_v55 }
 0x818   : > { %2012 = vmax.xlane.f32.xlu2 %v5096_v14  ;;  %2467 = vadd.xlane.f32.xlu1 %v5133_v59 }
 0x819   : > { %4203 = vpow2.f32 %v2437_v5 }
 0x81c   : > { %v2392_v31 = vpop.xlane.xlu1 %2391 }
 0x81d   : > { %v2408_v39 = vsub.f32 %v2358_v60, %v2392_v31  ;;  %v2402_v60 = vsub.f32 %v5081_v38, %v2380_v57  ;;  %v5156_v8 = vpop.f32.mrf.mxu1  ;;  %v2403_v38 = vsub.f32 %v5084_v34, %v2382_v42  ;;  %v2397_v34 = vsub.f32 %v5066_v20, %v5116_v61 }
 0x81e   : > { %v2404_v42 = vsub.f32 %v5087_v28, %v2384_v53  ;;  %v2398_v28 = vsub.f32 %v5069_v6, %v5120_v1 }
 0x81f   : > { %v5139_v18 = vpop.eup %4203  ;;  %v2439_v19 = vmul.f32 1.442695, %v2408_v39  ;;  %v2427_v33 = vmul.f32 1.442695, %v2402_v60  ;;  %v2429_v57 = vmul.f32 1.442695, %v2403_v38 }
 0x820   : > { %2018 = vmax.xlane.f32.xlu2 %v5102_v9  ;;  %2469 = vadd.xlane.f32.xlu1 %v5139_v18  ;;  %v2417_v55 = vmul.f32 1.442695, %v2397_v34  ;;  %v2431_v5 = vmul.f32 1.442695, %v2404_v42  ;;  %v2419_v53 = vmul.f32 1.442695, %v2398_v28 }
 0x821   : > { %4205 = vpow2.f32 %v2439_v19 }
 0x822   : > { %4207 = vpow2.f32 %v2427_v33 }
 0x823   : > { %4209 = vpow2.f32 %v2421_v10 }
 0x824   : > { %4211 = vpow2.f32 %v2429_v57 }
 0x825   : > { %4213 = vpow2.f32 %v2423_v15 }
 0x826   : > { %4215 = vpow2.f32 %v2417_v55 }
 0x827   : > { %v5145_v16 = vpop.eup %4205  ;;  %4217 = vpow2.f32 %v2431_v5 }
 0x828   : > { %2024 = vmax.xlane.f32.xlu2 %v5118_v32  ;;  %2006 = vmax.xlane.f32.xlu1 %v5090_v2  ;;  %v5162_v50 = vpop.eup %4207  ;;  %4219 = vpow2.f32 %v2425_v21 }
 0x829   : > { %2471 = vadd.xlane.f32.xlu0 %v5145_v16  ;;  %v5168_v24 = vpop.eup %4209  ;;  %4221 = vpow2.f32 %v2419_v53 }
 0x82a   : > { %v5175_v0 = vpop.eup %4211 }
 0x82b   : > { %v5182_v31 = vpop.eup %4213 }
 0x82c   : > { %v5188_v20 = vpop.eup %4215 }
 0x82d   : > { %v5190_v61 = vpop.eup %4217 }
 0x82e   : > { %v5196_v39 = vpop.eup %4219 }
 0x82f   : > { %v5199_v7 = vpop.eup %4221 }
 0x830   : > { %2030 = vmax.xlane.f32.xlu2 %v5137_v17  ;;  %2014 = vmax.xlane.f32.xlu1 %v5098_v48 }
 0x831   : > { %2008 = vmax.xlane.f32.xlu0 %v5092_v62 }
 0x838   : > { %2036 = vmax.xlane.f32.xlu2 %v5156_v8  ;;  %2020 = vmax.xlane.f32.xlu1 %v5104_v63 }
 0x839   : > { %2010 = vmax.xlane.f32.xlu0 %v5094_v41 }
 0x840   : > { %2459 = vadd.xlane.f32.xlu2 %v5162_v50  ;;  %2026 = vmax.xlane.f32.xlu1 %v5126_v44 }
 0x841   : > { %2016 = vmax.xlane.f32.xlu0 %v5100_v13 }
 0x848   : > { %2453 = vadd.xlane.f32.xlu2 %v5168_v24  ;;  %2032 = vmax.xlane.f32.xlu1 %v5143_v43 }
 0x849   : > { %2022 = vmax.xlane.f32.xlu0 %v5112_v56 }
 0x850   : > { %2461 = vadd.xlane.f32.xlu1 %v5175_v0 }
 0x851   : > { %2028 = vmax.xlane.f32.xlu0 %v5130_v22 }
 0x858   : > { %2455 = vadd.xlane.f32.xlu1 %v5182_v31 }
 0x859   : > { %2034 = vmax.xlane.f32.xlu0 %v5150_v3 }
 0x860   : > { %2449 = vadd.xlane.f32.xlu1 %v5188_v20 }
 0x861   : > { %2463 = vadd.xlane.f32.xlu0 %v5190_v61 }
 0x869   : > { %2457 = vadd.xlane.f32.xlu0 %v5196_v39 }
 0x871   : > { %2451 = vadd.xlane.f32.xlu0 %v5199_v7 }
 0x883   : > { %v2466_v46 = vpop.xlane.xlu2 %2465 }
 0x88b   : > { %v2013_v19 = vpop.xlane.xlu2 %2012  ;;  %v2468_v60 = vpop.xlane.xlu1 %2467 }
 0x893   : > { %v2019_v33 = vpop.xlane.xlu2 %2018  ;;  %v2470_v30 = vpop.xlane.xlu1 %2469 }
 0x894   : > { %v2044_v10 = vsub.f32 %v5102_v9, %v2019_v33 }
 0x896   : > { %v2066_v38 = vmul.f32 1.442695, %v2044_v10 }
 0x898   : > { %4223 = vpow2.f32 %v2066_v38 }
 0x899   : > { %4225 = vrcp.f32 %v2470_v30 }
 0x89b   : > { %v2025_v6 = vpop.xlane.xlu2 %2024  ;;  %v2007_v1 = vpop.xlane.xlu1 %2006 }
 0x89c   : > { %v2047_v57 = vsub.f32 %v5118_v32, %v2025_v6  ;;  %v2472_v51 = vpop.xlane.xlu0 %2471 }
 0x89d   : > { %4227 = vrcp.f32 %v2472_v51 }
 0x89e   : > { %v5204_v15 = vpop.eup %4223  ;;  %v2072_v34 = vmul.f32 1.442695, %v2047_v57 }
 0x89f   : > { %2098 = vadd.xlane.f32.xlu0 %v5204_v15  ;;  %v4226_v42 = vpop.eup %4225 }
 0x8a0   : > { %4229 = vpow2.f32 %v2072_v34  ;;  %v2503_v29 = vmul.f32 %v4226_v42, %v5139_v18 }
 0x8a1   : > { %4231 = vrcp.f32 %v2468_v60 }
 0x8a2   : > { %4233 = vrcp.f32 %v2466_v46  ;;  %v2395_v46 = vsub.f32 %v5060_v58, %v5114_v26 }
 0x8a3   : > { %v4228_v55 = vpop.eup %4227  ;;  %v2031_v9 = vpop.xlane.xlu2 %2030 }
 0x8a4   : > { %v5207_v5 = vpop.xlane.xlu1 %2014  ;;  %v2504_v21 = vmul.f32 %v4228_v55, %v5145_v16  ;;  %v2050_v32 = vsub.f32 %v5137_v17, %v2031_v9  ;;  %v5212_v28 = vpop.xlane.xlu0 %2008  ;;  %v2413_v38 = vmul.f32 1.442695, %v2395_v46  ;;  %v2041_v55 = vsub.f32 %v5096_v14, %v2013_v19 }
 0x8a6   : > { %v5214_v53 = vpop.eup %4229  ;;  %v2078_v33 = vmul.f32 1.442695, %v2050_v32  ;;  %v2512_v30 = vpack.c.bf16 %v2504_v21, %v2503_v29  ;;  %v2060_v58 = vmul.f32 1.442695, %v2041_v55 }
 0x8a7   : > { %v4232_v10 = vpop.eup %4231  ;;  %2104 = vadd.xlane.f32.xlu0 %v5214_v53 }
 0x8a8   : > { %4235 = vpow2.f32 %v2078_v33  ;;  %2525 = vmatpush.bf16.xpose.msrb.mxu1 %v2512_v30  ;;  %v4234_v60 = vpop.eup %4233  ;;  %v2502_v18 = vmul.f32 %v4232_v10, %v5133_v59 }
 0x8a9   : > { %v2501_v57 = vmul.f32 %v4234_v60, %v5128_v12  ;;  %4237 = vpow2.f32 %v2413_v38  ;;  %v2038_v12 = vsub.f32 %v5090_v2, %v2007_v1 }
 0x8ab   : > { %v2511_v42 = vpack.c.bf16 %v2502_v18, %v2501_v57  ;;  %v2054_v14 = vmul.f32 1.442695, %v2038_v12  ;;  %v2037_v18 = vpop.xlane.xlu2 %2036 }
 0x8ac   : > { %v2021_v16 = vpop.xlane.xlu1 %2020  ;;  %v5220_v17 = vpop.xlane.xlu0 %2010 }
 0x8ad   : > { %v2045_v6 = vsub.f32 %v5104_v63, %v2021_v16 }
 0x8ae   : > { %v5224_v51 = vpop.eup %4235 }
 0x8af   : > { %v2068_v34 = vmul.f32 1.442695, %v2045_v6  ;;  %2110 = vadd.xlane.f32.xlu0 %v5224_v51  ;;  %v5229_v29 = vpop.eup %4237  ;;  %v2053_v6 = vsub.f32 %v5156_v8, %v2037_v18 }
 0x8b0   : > { %2526 = vmatpush.bf16.xpose.msrb.mxu1 %v2511_v42 }
 0x8b1   : > { %4239 = vpow2.f32 %v2068_v34  ;;  %v2084_v57 = vmul.f32 1.442695, %v2053_v6 }
 0x8b2   : > { %4241 = vpow2.f32 %v2060_v58  ;;  %v2042_v58 = vsub.f32 %v5098_v48, %v5207_v5  ;;  %v2396_v48 = vsub.f32 %v5063_v45, %v5110_v36 }
 0x8b4   : > { %v2027_v26 = vpop.xlane.xlu1 %2026  ;;  %v2017_v59 = vpop.xlane.xlu0 %2016 }
 0x8b5   : > { %v2048_v9 = vsub.f32 %v5126_v44, %v2027_v26  ;;  %v2043_v8 = vsub.f32 %v5100_v13, %v2017_v59  ;;  %v3563_v13 = vld [vmem:[%s4600_s3 + $0xe8] sm:$0xff]  ;;  %v2040_v59 = vsub.f32 %v5094_v41, %v5220_v17  ;;  %v2393_v41 = vsub.f32 %v5052_v25, %v5108_v40 }
 0x8b6   : > { %v3559_v17 = vld [vmem:[%s4600_s3 + $0xc8] sm:$0xff] }
 0x8b7   : > { %v2074_v63 = vmul.f32 1.442695, %v2048_v9  ;;  %2445 = vadd.xlane.f32.xlu0 %v5229_v29  ;;  %v5233_v21 = vpop.eup %4239  ;;  %v2062_v9 = vmul.f32 1.442695, %v2042_v58  ;;  %v2064_v12 = vmul.f32 1.442695, %v2043_v8 }
 0x8b8   : > { %2100 = vadd.xlane.f32.xlu2 %v5233_v21  ;;  %v5237_v30 = vpop.eup %4241  ;;  %v2058_v36 = vmul.f32 1.442695, %v2040_v59 }
 0x8b9   : > { %4243 = vpow2.f32 %v2074_v63 }
 0x8ba   : > { %4245 = vpow2.f32 %v2054_v14 }
 0x8bc   : > { %v2033_v19 = vpop.xlane.xlu1 %2032  ;;  %v2023_v32 = vpop.xlane.xlu0 %2022 }
 0x8bd   : > { %v2051_v33 = vsub.f32 %v5143_v43, %v2033_v19  ;;  %v2046_v44 = vsub.f32 %v5112_v56, %v2023_v32  ;;  %v2460_v19 = vpop.xlane.xlu2 %2459 }
 0x8bf   : > { %v5240_v10 = vpop.eup %4243  ;;  %v2080_v46 = vmul.f32 1.442695, %v2051_v33  ;;  %v2070_v2 = vmul.f32 1.442695, %v2046_v44  ;;  %2092 = vadd.xlane.f32.xlu0 %v5237_v30  ;;  %v2415_v33 = vmul.f32 1.442695, %v2396_v48 }
 0x8c0   : > { %2106 = vadd.xlane.f32.xlu2 %v5240_v10  ;;  %v5244_v60 = vpop.eup %4245 }
 0x8c1   : > { %4247 = vpow2.f32 %v2080_v46 }
 0x8c2   : > { %4249 = vpow2.f32 %v2070_v2 }
 0x8c4   : > { %v2029_v1 = vpop.xlane.xlu0 %2028  ;;  %v2462_v26 = vpop.xlane.xlu1 %2461 }
 0x8c5   : > { %v2049_v43 = vsub.f32 %v5130_v22, %v2029_v1 }
 0x8c7   : > { %v5247_v16 = vpop.eup %4247  ;;  %v2076_v38 = vmul.f32 1.442695, %v2049_v43  ;;  %2086 = vadd.xlane.f32.xlu0 %v5244_v60 }
 0x8c8   : > { %v5249_v56 = vpop.eup %4249  ;;  %2112 = vadd.xlane.f32.xlu2 %v5247_v16 }
 0x8c9   : > { %2102 = vadd.xlane.f32.xlu1 %v5249_v56  ;;  %4251 = vpow2.f32 %v2076_v38  ;;  %v2454_v38 = vpop.xlane.xlu2 %2453 }
 0x8ca   : > { %4253 = vpow2.f32 %v2084_v57  ;;  %v2409_v57 = vmul.f32 1.442695, %v2393_v41  ;;  %v2879_v41 = vld [vmem:[%s4605_s4 + $0x70] sm:$0xff] }
 0x8cc   : > { %v2035_v34 = vpop.xlane.xlu0 %2034  ;;  %v2456_v43 = vpop.xlane.xlu1 %2455 }
 0x8cd   : > { %v2052_v42 = vsub.f32 %v5150_v3, %v2035_v34 }
 0x8cf   : > { %v5256_v55 = vpop.eup %4251  ;;  %v2082_v22 = vmul.f32 1.442695, %v2052_v42 }
 0x8d0   : > { %v5262_v3 = vpop.eup %4253 }
 0x8d1   : > { %2108 = vadd.xlane.f32.xlu1 %v5256_v55  ;;  %4255 = vpow2.f32 %v2082_v22 }
 0x8d2   : > { %4257 = vrcp.f32 %v2462_v26  ;;  %v3560_v26 = vld [vmem:[%s4600_s3 + $0xd0] sm:$0xff] }
 0x8d4   : > { %v2464_v63 = vpop.xlane.xlu0 %2463 }
 0x8d5   : > { %4259 = vrcp.f32 %v2464_v63 }
 0x8d6   : > { %4261 = vpow2.f32 %v2062_v9 }
 0x8d7   : > { %v5264_v14 = vpop.eup %4255  ;;  %4263 = vpow2.f32 %v2064_v12 }
 0x8d8   : > { %2114 = vadd.xlane.f32.xlu2 %v5264_v14  ;;  %v4258_v5 = vpop.eup %4257  ;;  %4265 = vrcp.f32 %v2460_v19 }
 0x8d9   : > { %2116 = vadd.xlane.f32.xlu1 %v5262_v3  ;;  %v2499_v46 = vmul.f32 %v4258_v5, %v5175_v0 }
 0x8db   : > { %v4260_v32 = vpop.eup %4259  ;;  %1007 = vperm.xlu0 %4066, %v3563_v13  }
 0x8dc   : > { %v2458_v44 = vpop.xlane.xlu0 %2457  ;;  %v2500_v45 = vmul.f32 %v4260_v32, %v5190_v61  ;;  %v5275_v2 = vpop.eup %4261  ;;  %v2394_v61 = vsub.f32 %v5057_v54, %v5106_v52 }
 0x8dd   : > { %4267 = vrcp.f32 %v2458_v44  ;;  %v5277_v18 = vpop.eup %4263  ;;  %v3575_v44 = vld [vmem:[%s4600_s3 + $0x148] sm:$0xff] }
 0x8de   : > { %v2510_v1 = vpack.c.bf16 %v2500_v45, %v2499_v46  ;;  %4269 = vpow2.f32 %v2415_v33  ;;  %v4266_v0 = vpop.eup %4265  ;;  %v2411_v34 = vmul.f32 1.442695, %v2394_v61  ;;  %v3576_v33 = vld [vmem:[%s4600_s3 + $0x150] sm:$0xff]  ;;  %v3562_v46 = vld [vmem:[%s4600_s3 + $0xe0] sm:$0xff]  ;;  %v2878_v61 = vld [vmem:[%s4605_s4 + $0x68] sm:$0xff] }
 0x8df   : > { %4271 = vpow2.f32 %v2058_v36  ;;  %v2498_v40 = vmul.f32 %v4266_v0, %v5162_v50  ;;  %v2450_v50 = vpop.xlane.xlu1 %2449  ;;  %v3570_v45 = vld [vmem:[%s4600_s3 + $0x120] sm:$0xff]  ;;  %v3569_v36 = vld [vmem:[%s4600_s3 + $0x118] sm:$0xff] }
 0x8e0   : > { %2094 = vadd.xlane.f32.xlu2 %v5275_v2  ;;  %2527 = vmatpush.bf16.xpose.msrb.mxu1 %v2510_v1  ;;  %4273 = vrcp.f32 %v2456_v43  ;;  %v3565_v1 = vld [vmem:[%s4600_s3 + $0xf8] sm:$0xff]  ;;  %v3578_v0 = vld [vmem:[%s4600_s3 + $0x160] sm:$0xff] }
 0x8e1   : > { %2096 = vadd.xlane.f32.xlu1 %v5277_v18  ;;  %4275 = vrcp.f32 %v2454_v38  ;;  %v3561_v43 = vld [vmem:[%s4600_s3 + $0xd8] sm:$0xff]  ;;  %v3579_v38 = vld [vmem:[%s4600_s3 + $0x168] sm:$0xff] }
 0x8e2   : > { %4277 = vpow2.f32 %v2409_v57  ;;  %v2873_v57 = vld [vmem:[%s4605_s4 + $0x40] sm:$0xff] }
 0x8e3   : > { %v4268_v6 = vpop.eup %4267  ;;  %987 = vperm.xlu0 %4066, %v3559_v17   ;;  %4279 = vpow2.f32 %v2411_v34  ;;  %v3580_v17 = vld [vmem:[%s4600_s3 + $0x170] sm:$0xff] }
 0x8e4   : > { %v2497_v25 = vmul.f32 %v4268_v6, %v5196_v39  ;;  %v5288_v42 = vpop.eup %4269  ;;  %v2452_v54 = vpop.xlane.xlu0 %2451  ;;  %v2039_v39 = vsub.f32 %v5092_v62, %v5212_v28  ;;  %v3581_v62 = vld [vmem:[%s4600_s3 + $0x178] sm:$0xff] }
 0x8e5   : > { %v5290_v58 = vpop.eup %4271  ;;  %4281 = vrcp.f32 %v2452_v54  ;;  %v3577_v6 = vld [vmem:[%s4600_s3 + $0x158] sm:$0xff] }
 0x8e6   : > { %v2509_v22 = vpack.c.bf16 %v2498_v40, %v2497_v25  ;;  %v4274_v52 = vpop.eup %4273  ;;  %4283 = vrcp.f32 %v2450_v50  ;;  %v2056_v63 = vmul.f32 1.442695, %v2039_v39  ;;  %v3574_v25 = vld [vmem:[%s4600_s3 + $0x140] sm:$0xff]  ;;  %v3572_v40 = vld [vmem:[%s4600_s3 + $0x130] sm:$0xff]  ;;  %v3573_v54 = vld [vmem:[%s4600_s3 + $0x138] sm:$0xff] }
 0x8e7   : > { %v4276_v8 = vpop.eup %4275  ;;  %v2496_v9 = vmul.f32 %v4274_v52, %v5182_v31  ;;  %v3571_v52 = vld [vmem:[%s4600_s3 + $0x128] sm:$0xff]  ;;  %v2867_v39 = vld [vmem:[%s4605_s4 + $0x10] sm:$0xff] }
 0x8e8   : > { %2447 = vadd.xlane.f32.xlu2 %v5288_v42  ;;  %2528 = vmatpush.bf16.xpose.msrb.mxu1 %v2509_v22  ;;  %v2495_v12 = vmul.f32 %v4276_v8, %v5168_v24  ;;  %v5299_v19 = vpop.eup %4277  ;;  %4285 = vpow2.f32 %v2056_v63  ;;  %v2872_v22 = vld [vmem:[%s4605_s4 + $0x38] sm:$0xff]  ;;  %v3566_v63 = vld [vmem:[%s4600_s3 + $0x100] sm:$0xff] }
 0x8e9   : > { %2090 = vadd.xlane.f32.xlu1 %v5290_v58  ;;  %v5301_v48 = vpop.eup %4279 }
 0x8ea   : > { %v2508_v13 = vpack.c.bf16 %v2496_v9, %v2495_v12  ;;  %v3568_v9 = vld [vmem:[%s4600_s3 + $0x110] sm:$0xff]  ;;  %v2866_v12 = vld [vmem:[%s4605_s4 + $0x8] sm:$0xff] }
 0x8eb   : > { %992 = vperm.xlu0 %4066, %v3560_v26   ;;  %v4282_v5 = vpop.eup %4281 }
 0x8ec   : > { %v4284_v31 = vpop.eup %4283  ;;  %v2494_v24 = vmul.f32 %v4282_v5, %v5199_v7  ;;  %v3564_v7 = vld [vmem:[%s4600_s3 + $0xf0] sm:$0xff] }
 0x8ed   : > { %v2493_v28 = vmul.f32 %v4284_v31, %v5188_v20  ;;  %v3558_v20 = vld [vmem:[%s4600_s3 + $0xc0] sm:$0xff]  ;;  %v3567_v31 = vld [vmem:[%s4600_s3 + $0x108] sm:$0xff] }
 0x8ee   : > { %v5308_v59 = vpop.eup %4285 }
 0x8ef   : > { %v2507_v32 = vpack.c.bf16 %v2494_v24, %v2493_v28  ;;  %v2880_v24 = vld [vmem:[%s4605_s4 + $0x78] sm:$0xff]  ;;  %v3584_v28 = vld [vmem:[%s4600_s3 + $0x190] sm:$0xff] }
 0x8f0   : > { %2441 = vadd.xlane.f32.xlu2 %v5299_v19  ;;  %2529 = vmatpush.bf16.xpose.msrb.mxu1 %v2508_v13 }
 0x8f1   : > { %2443 = vadd.xlane.f32.xlu1 %v5301_v48 }
 0x8f3   : > { %2661 = vperm.xlu0 %4066, %v3581_v62  }
 0x8f8   : > { %2088 = vadd.xlane.f32.xlu2 %v5308_v59  ;;  %2530 = vmatpush.bf16.xpose.msrb.mxu1 %v2507_v32 }
 0x8fb   : > { %2636 = vperm.xlu0 %4066, %v3576_v33  }
 0x903   : > { %2631 = vperm.xlu0 %4066, %v3575_v44  }
 0x90a   : > { %1002 = vperm.xlu1 %4064, %v3562_v46   ;;  %v2877_v46 = vld [vmem:[%s4605_s4 + $0x60] sm:$0xff] }
 0x90b   : > { %2606 = vperm.xlu0 %4066, %v3570_v45   ;;  %v2875_v45 = vld [vmem:[%s4605_s4 + $0x50] sm:$0xff] }
 0x910   : > { %982 = vperm.xlu2 %4065, %v3558_v20   ;;  %v3587_v20 = vld [vmem:[%s4600_s3 + $0x1a8] sm:$0xff] }
 0x912   : > { %1012 = vperm.xlu1 %4064, %v3564_v7   ;;  %v5334_v26 = vpop.xlane.xlu0 %2098 }
 0x913   : > { %2601 = vperm.xlu0 %4066, %v3569_v36  }
 0x918   : > { %1017 = vperm.xlu2 %4065, %v3565_v1  }
 0x91a   : > { %997 = vperm.xlu1 %4064, %v3561_v43   ;;  %v2105_v13 = vpop.xlane.xlu0 %2104 }
 0x91b   : > { %2953 = vperm.xlu0 %4066, %v2879_v41  }
 0x920   : > { %2656 = vperm.xlu2 %4065, %v3580_v17  }
 0x922   : > { %2646 = vperm.xlu1 %4064, %v3578_v0   ;;  %v2111_v44 = vpop.xlane.xlu0 %2110  ;;  %v2876_v0 = vld [vmem:[%s4605_s4 + $0x58] sm:$0xff] }
 0x923   : > { %2948 = vperm.xlu0 %4066, %v2878_v61  }
 0x928   : > { %2651 = vperm.xlu2 %4065, %v3579_v38   ;;  %v2874_v38 = vld [vmem:[%s4605_s4 + $0x48] sm:$0xff] }
 0x92a   : > { %2641 = vperm.xlu1 %4064, %v3577_v6  }
 0x92b   : > { %2923 = vperm.xlu0 %4066, %v2873_v57   ;;  %v5329_v34 = vpop.xlane.xlu2 %2100  ;;  %v2446_v57 = vpop.xlane.xlu0 %2445 }
 0x930   : > { %2626 = vperm.xlu2 %4065, %v3574_v25   ;;  %v3590_v25 = vld [vmem:[%s4600_s3 + $0x1c0] sm:$0xff] }
 0x932   : > { %2616 = vperm.xlu1 %4064, %v3572_v40  }
 0x933   : > { %2918 = vperm.xlu0 %4066, %v2872_v22   ;;  %v2107_v50 = vpop.xlane.xlu2 %2106 }
 0x938   : > { %2621 = vperm.xlu2 %4065, %v3573_v54  }
 0x93a   : > { %2611 = vperm.xlu1 %4064, %v3571_v52   ;;  %v2871_v52 = vld [vmem:[%s4605_s4 + $0x30] sm:$0xff] }
 0x93b   : > { %2893 = vperm.xlu0 %4066, %v2867_v39   ;;  %v2113_v5 = vpop.xlane.xlu2 %2112 }
 0x93c   : > { %v5337_v8 = vpop.xlane.xlu1 %2102 }
 0x940   : > { %2596 = vperm.xlu2 %4065, %v3568_v9   ;;  %v2869_v9 = vld [vmem:[%s4605_s4 + $0x20] sm:$0xff] }
 0x942   : > { %2586 = vperm.xlu1 %4064, %v3566_v63  }
 0x943   : > { %2888 = vperm.xlu0 %4066, %v2866_v12  }
 0x944   : > { %v2109_v62 = vpop.xlane.xlu1 %2108 }
 0x948   : > { %2591 = vperm.xlu2 %4065, %v3567_v31  }
 0x94a   : > { %2958 = vperm.xlu1 %4064, %v2880_v24  }
 0x94b   : > { %v2115_v32 = vpop.xlane.xlu2 %2114  ;;  %3110 = vperm.xlu0 %4066, %v3584_v28  }
 0x94c   : > { %v2117_v33 = vpop.xlane.xlu1 %2116  ;;  %4287 = vrcp.f32 %v2115_v32 }
 0x94d   : > { %4289 = vrcp.f32 %v2117_v33 }
 0x94e   : > { %4291 = vrcp.f32 %v2113_v5  ;;  %v3593_v5 = vld [vmem:[%s4600_s3 + $0x1d8] sm:$0xff] }
 0x94f   : > { %4293 = vrcp.f32 %v2111_v44  ;;  %v2870_v44 = vld [vmem:[%s4605_s4 + $0x28] sm:$0xff] }
 0x950   : > { %2943 = vperm.xlu2 %4065, %v2877_v46   ;;  %4295 = vrcp.f32 %v2109_v62 }
 0x951   : > { %4297 = vrcp.f32 %v2446_v57 }
 0x952   : > { %2933 = vperm.xlu1 %4064, %v2875_v45   ;;  %v4288_v7 = vpop.eup %4287  ;;  %4299 = vrcp.f32 %v2107_v50  ;;  %v2093_v50 = vpop.xlane.xlu0 %2092  ;;  %v2868_v45 = vld [vmem:[%s4605_s4 + $0x18] sm:$0xff] }
 0x953   : > { %v4290_v36 = vpop.eup %4289  ;;  %v2148_v1 = vmul.f32 %v4288_v7, %v5264_v14  ;;  %v5349_v43 = vpop.xlane.xlu2 %2094  ;;  %3125 = vperm.xlu0 %4066, %v3587_v20  }
 0x954   : > { %v5351_v41 = vpop.xlane.xlu1 %2096  ;;  %v2149_v17 = vmul.f32 %v4290_v36, %v5262_v3  ;;  %v4292_v6 = vpop.eup %4291 }
 0x955   : > { %v4294_v40 = vpop.eup %4293  ;;  %v2147_v14 = vmul.f32 %v4292_v6, %v5247_v16 }
 0x956   : > { %v2157_v61 = vpack.c.bf16 %v2149_v17, %v2148_v1  ;;  %v2146_v54 = vmul.f32 %v4294_v40, %v5224_v51  ;;  %v4296_v63 = vpop.eup %4295  ;;  %v3583_v40 = vld [vmem:[%s4600_s3 + $0x188] sm:$0xff] }
 0x957   : > { %v4298_v12 = vpop.eup %4297  ;;  %v2145_v31 = vmul.f32 %v4296_v63, %v5256_v55  ;;  %v3596_v55 = vld [vmem:[%s4600_s3 + $0x1f0] sm:$0xff] }
 0x958   : > { %2170 = vmatpush.bf16.xpose.msrb.mxu2 %v2157_v61  ;;  %2938 = vperm.xlu2 %4065, %v2876_v0   ;;  %v2156_v39 = vpack.c.bf16 %v2147_v14, %v2146_v54  ;;  %v4300_v62 = vpop.eup %4299  ;;  %v2491_v28 = vmul.f32 %v4298_v12, %v5229_v29  ;;  %v3585_v14 = vld [vmem:[%s4600_s3 + $0x198] sm:$0xff]  ;;  %v3586_v12 = vld [vmem:[%s4600_s3 + $0x1a0] sm:$0xff] }
 0x959   : > { %v2144_v33 = vmul.f32 %v4300_v62, %v5240_v10 }
 0x95a   : > { %2928 = vperm.xlu1 %4064, %v2874_v38   ;;  %v2087_v17 = vpop.xlane.xlu0 %2086  ;;  %v2865_v38 = vld [vmem:[%s4605_s4] sm:$0xff] }
 0x95b   : > { %v2448_v22 = vpop.xlane.xlu2 %2447  ;;  %3140 = vperm.xlu0 %4066, %v3590_v25   ;;  %v2155_v46 = vpack.c.bf16 %v2145_v31, %v2144_v33 }
 0x95c   : > { %v5358_v3 = vpop.xlane.xlu1 %2090  ;;  %4301 = vrcp.f32 %v2448_v22 }
 0x95d   : > { %4303 = vrcp.f32 %v5337_v8 }
 0x95e   : > { %4305 = vrcp.f32 %v2105_v13 }
 0x960   : > { %2171 = vmatpush.bf16.xpose.msrb.mxu2 %v2156_v39  ;;  %2913 = vperm.xlu2 %4065, %v2871_v52  }
 0x962   : > { %2903 = vperm.xlu1 %4064, %v2869_v9   ;;  %v4302_v16 = vpop.eup %4301 }
 0x963   : > { %v2442_v51 = vpop.xlane.xlu2 %2441  ;;  %3155 = vperm.xlu0 %4066, %v3593_v5   ;;  %v2492_v32 = vmul.f32 %v4302_v16, %v5288_v42  ;;  %v4304_v20 = vpop.eup %4303  ;;  %v3588_v5 = vld [vmem:[%s4600_s3 + $0x1b0] sm:$0xff] }
 0x964   : > { %v2444_v24 = vpop.xlane.xlu1 %2443  ;;  %4307 = vrcp.f32 %v2442_v51  ;;  %v4306_v13 = vpop.eup %4305  ;;  %v2142_v42 = vmul.f32 %v4304_v20, %v5249_v56 }
 0x965   : > { %4309 = vrcp.f32 %v2444_v24  ;;  %v2506_v8 = vpack.c.bf16 %v2492_v32, %v2491_v28  ;;  %v2143_v36 = vmul.f32 %v4306_v13, %v5214_v53  ;;  %v3589_v28 = vld [vmem:[%s4600_s3 + $0x1b8] sm:$0xff]  ;;  %v3591_v32 = vld [vmem:[%s4600_s3 + $0x1c8] sm:$0xff] }
 0x966   : > { %4311 = vrcp.f32 %v5329_v34  ;;  %v3582_v34 = vld [vmem:[%s4600_s3 + $0x180] sm:$0xff] }
 0x967   : > { %2531 = vmatpush.bf16.xpose.msrb.mxu1 %v2506_v8  ;;  %4313 = vrcp.f32 %v5334_v26  ;;  %v2154_v0 = vpack.c.bf16 %v2143_v36, %v2142_v42  ;;  %v1008_v26 = vpop.permute.xlu0 %1007 }
 0x968   : > { %2172 = vmatpush.bf16.xpose.msrb.mxu2 %v2155_v46  ;;  %2908 = vperm.xlu2 %4065, %v2870_v44   ;;  %4315 = vrcp.f32 %v5349_v43  ;;  %v1110_v43 = vadd.f32 %v5032_v4, %v1008_v26 }
 0x969   : > { %4317 = vrcp.f32 %v5351_v41 }
 0x96a   : > { %2898 = vperm.xlu1 %4064, %v2868_v45   ;;  %v4308_v29 = vpop.eup %4307  ;;  %4319 = vrcp.f32 %v5358_v3  ;;  %v1130_v52 = vpack.c.bf16 %v1110_v43, %v1110_v43 }
 0x96b   : > { %v4310_v10 = vpop.eup %4309  ;;  %3170 = vperm.xlu0 %4066, %v3596_v55   ;;  %v2489_v7 = vmul.f32 %v4308_v29, %v5299_v19  ;;  %v2089_v19 = vpop.xlane.xlu2 %2088  ;;  %4321 = vrcp.f32 %v2093_v50 }
 0x96c   : > { %v2490_v1 = vmul.f32 %v4310_v10, %v5301_v48  ;;  %v4312_v6 = vpop.eup %4311  ;;  %v2518_v62 = vunpack.c.l.b16 %v1130_v52  ;;  %4323 = vrcp.f32 %v2089_v19  ;;  %v3594_v10 = vld [vmem:[%s4600_s3 + $0x1e0] sm:$0xff] }
 0x96d   : > { %v4314_v56 = vpop.eup %4313  ;;  %v2141_v53 = vmul.f32 %v4312_v6, %v5233_v21  ;;  %4325 = vrcp.f32 %v2087_v17 }
 0x96e   : > { %v2505_v61 = vpack.c.bf16 %v2490_v1, %v2489_v7  ;;  %v2140_v48 = vmul.f32 %v4314_v56, %v5204_v15  ;;  %v4316_v57 = vpop.eup %4315 }
 0x96f   : > { %v4318_v22 = vpop.eup %4317  ;;  %v2138_v41 = vmul.f32 %v4316_v57, %v5275_v2  ;;  %v988_v8 = vpop.permute.xlu0 %987 }
 0x970   : > { %2173 = vmatpush.bf16.xpose.msrb.mxu2 %v2154_v0  ;;  %2532 = vmatpush.bf16.xpose.msrb.mxu1 %v2505_v61  ;;  %v2153_v25 = vpack.c.bf16 %v2141_v53, %v2140_v48  ;;  %v2139_v21 = vmul.f32 %v4318_v22, %v5277_v18  ;;  %v4320_v4 = vpop.eup %4319  ;;  %v3595_v0 = vld [vmem:[%s4600_s3 + $0x1e8] sm:$0xff] }
 0x971   : > { %2883 = vperm.xlu2 %4065, %v2865_v38   ;;  %v4322_v16 = vpop.eup %4321  ;;  %v2136_v18 = vmul.f32 %v4320_v4, %v5290_v58  ;;  %v3916_v4 = vld [vmem:[#allocation3 + $0x28] sm:$0xff] }
 0x972   : > { %3100 = vperm.xlu1 %4064, %v3582_v34   ;;  %v2152_v63 = vpack.c.bf16 %v2139_v21, %v2138_v41  ;;  %v4324_v33 = vpop.eup %4323 }
 0x973   : > { %v983_v15 = vpop.permute.xlu2 %982  ;;  %v4326_v46 = vpop.eup %4325 }
 0x974   : > { %v1098_v58 = vadd.f32 %v5004_v37, %v983_v15  ;;  %v2134_v55 = vmul.f32 %v4326_v46, %v5244_v60  ;;  %v3597_v60 = vld [vmem:[%s4600_s3 + $0x1f8] sm:$0xff] }
 0x976   : > { %v1125_v13 = vpack.c.bf16 %v1098_v58, %v1098_v58 }
 0x977   : > { %v993_v61 = vpop.permute.xlu0 %992 }
 0x978   : > { %2174 = vmatpush.bf16.xpose.msrb.mxu2 %v2153_v25  ;;  %v2162_v37 = vunpack.c.l.b16 %v1125_v13  ;;  %v1103_v34 = vadd.f32 %v5015_v35, %v993_v61 }
 0x979   : > { %3105 = vperm.xlu2 %4065, %v3583_v40  }
 0x97a   : > { %3115 = vperm.xlu1 %4064, %v3585_v14   ;;  %v1127_v56 = vpack.c.bf16 %v1103_v34, %v1103_v34 }
 0x97b   : > { %v1018_v31 = vpop.permute.xlu2 %1017 }
 0x97c   : > { %v1003_v54 = vpop.permute.xlu1 %1002  ;;  %v1115_v44 = vadd.f32 %v5044_v27, %v1018_v31  ;;  %v3592_v27 = vld [vmem:[%s4600_s3 + $0x1d0] sm:$0xff]  ;;  %v2164_v53 = vunpack.c.l.b16 %v1127_v56  ;;  %v3915_v31 = vld [vmem:[%s4585_s19 + $0x38] sm:$0xff] }
 0x97d   : > { %v1108_v39 = vadd.f32 %v5027_v49, %v1003_v54  ;;  %v2137_v49 = vmul.f32 %v4322_v16, %v5237_v30  ;;  %v2135_v30 = vmul.f32 %v4324_v33, %v5308_v59  ;;  %v3910_v16 = vld [vmem:[%s4585_s19 + $0x10] sm:$0xff] }
 0x97e   : > { %v1132_v20 = vpack.c.bf16 %v1115_v44, %v1115_v44 }
 0x97f   : > { %v1129_v9 = vpack.c.bf16 %v1108_v39, %v1108_v39  ;;  %v2151_v24 = vpack.c.bf16 %v2137_v49, %v2136_v18  ;;  %v2150_v42 = vpack.c.bf16 %v2135_v30, %v2134_v55  ;;  %v3912_v18 = vld [vmem:[%s4585_s19 + $0x20] sm:$0xff]  ;;  %v3914_v49 = vld [vmem:[%s4585_s19 + $0x30] sm:$0xff]  ;;  %v2662_v13 = vpop.permute.xlu0 %2661 }
 0x980   : > { %2175 = vmatpush.bf16.xpose.msrb.mxu2 %v2152_v63  ;;  %v2520_v36 = vunpack.c.l.b16 %v1132_v20  ;;  %v3919_v63 = vld [vmem:[#allocation3 + $0x20] sm:$0xff] }
 0x981   : > { %v2517_v3 = vunpack.c.l.b16 %v1129_v9  ;;  %3120 = vperm.xlu2 %4065, %v3586_v12   ;;  %v3918_v12 = vld [vmem:[#allocation3 + $0x10] sm:$0xff] }
 0x982   : > { %3130 = vperm.xlu1 %4064, %v3588_v5   ;;  %v3917_v5 = vld [vmem:[#allocation3] sm:$0xff] }
 0x983   : > { %v2521_v2 = vpack.c.b16 %v2518_v62, %v2517_v3  ;;  %v3908_v62 = vld [vmem:[%s4585_s19] sm:$0xff]  ;;  %v3909_v3 = vld [vmem:[%s4585_s19 + $0x8] sm:$0xff]  ;;  %v2657_v20 = vpop.permute.xlu2 %2656 }
 0x984   : > { %v1013_v50 = vpop.permute.xlu1 %1012 }
 0x985   : > { %2533 = vmatmul.bf16.vlgmr.msrb.gmra.mxu1 %v2521_v2  ;;  %v1113_v51 = vadd.f32 %v5038_v23, %v1013_v50  ;;  %v1100_v23 = vadd.f32 %v5009_v11, %v988_v8  ;;  %v3911_v2 = vld [vmem:[%s4585_s19 + $0x18] sm:$0xff]  ;;  %v3913_v50 = vld [vmem:[%s4585_s19 + $0x28] sm:$0xff] }
 0x987   : > { %v1131_v45 = vpack.c.bf16 %v1113_v51, %v1113_v51  ;;  %v1126_v7 = vpack.c.bf16 %v1100_v23, %v1100_v23 }
 0x988   : > { %2176 = vmatpush.bf16.xpose.msrb.mxu2 %v2151_v24 }
 0x989   : > { %3135 = vperm.xlu2 %4065, %v3589_v28   ;;  %v2519_v29 = vunpack.c.l.b16 %v1131_v45  ;;  %v2163_v59 = vunpack.c.l.b16 %v1126_v7 }
 0x98a   : > { %3145 = vperm.xlu1 %4064, %v3591_v32  }
 0x98b   : > { %v2522_v1 = vpack.c.b16 %v2520_v36, %v2519_v29  ;;  %v2166_v11 = vpack.c.b16 %v2163_v59, %v2162_v37  ;;  %v2652_v29 = vpop.permute.xlu2 %2651 }
 0x98c   : > { %v998_v17 = vpop.permute.xlu1 %997 }
 0x98d   : > { %v1105_v38 = vadd.f32 %v5021_v47, %v998_v17 }
 0x98f   : > { %v1128_v6 = vpack.c.bf16 %v1105_v38, %v1105_v38  ;;  %v2822_v38 = vld [vmem:[#allocation2 + $0x70] sm:$0xff] }
 0x990   : > { %2177 = vmatpush.bf16.xpose.msrb.mxu2 %v2150_v42 }
 0x991   : > { %3150 = vperm.xlu2 %4065, %v3592_v27   ;;  %v2165_v19 = vunpack.c.l.b16 %v1128_v6 }
 0x992   : > { %3160 = vperm.xlu1 %4064, %v3594_v10   ;;  %v2637_v10 = vpop.permute.xlu0 %2636 }
 0x993   : > { %v2167_v48 = vpack.c.b16 %v2165_v19, %v2164_v53  ;;  %v2627_v36 = vpop.permute.xlu2 %2626  ;;  %v2821_v53 = vld [vmem:[#allocation2 + $0x60] sm:$0xff] }
 0x994   : > { %v2647_v27 = vpop.permute.xlu1 %2646 }
 0x995   : > { %2538 = vmatmul.bf16.gmra.mxu1 %v2522_v1 }
 0x997   : > { %2178 = vmatmul.bf16.vlgmr.msrb.gmra.mxu2 %v2166_v11  ;;  %v2823_v11 = vld [vmem:[#allocation2 + $0x78] sm:$0xff] }
 0x999   : > { %3165 = vperm.xlu2 %4065, %v3595_v0   ;;  %v2824_v0 = vld [vmem:[#allocation2 + $0x28] sm:$0xff] }
 0x99a   : > { %3175 = vperm.xlu1 %4064, %v3597_v60   ;;  %v2632_v59 = vpop.permute.xlu0 %2631 }
 0x99b   : > { %v2622_v19 = vpop.permute.xlu2 %2621 }
 0x99c   : > { %v2642_v37 = vpop.permute.xlu1 %2641 }
 0x9a7   : > { %2183 = vmatmul.bf16.gmra.mxu2 %v2167_v48 }
 0xa02   : > { %v2534_v26 = vpop.f32.mrf.mxu1 }
 0xa0a   : > { %v2536_v57 = vpop.f32.mrf.mxu1 }
 0xa0b   : > { %v3974_v25 = vpack.c.bf16 %v2536_v57, %v2534_v26 }
 0xa0d   : > { %3986 = vst [vmem:[#allocation3 + $0x38] sm:$0xff] %v3974_v25   ;;  %v2617_v25 = vpop.permute.xlu1 %2616 }
 0xa12   : > { %v2539_v40 = vpop.f32.mrf.mxu1 }
 0xa14   : > { %v3922_v35 = vld [vmem:[#allocation3 + $0x38] sm:$0xff] }
 0xa1a   : > { %v2541_v14 = vpop.f32.mrf.mxu1  ;;  %v2179_v22 = vpop.f32.mrf.mxu2 }
 0xa1b   : > { %v3979_v43 = vpack.c.bf16 %v2541_v14, %v2539_v40  ;;  %v2820_v40 = vld [vmem:[#allocation2 + $0x38] sm:$0xff] }
 0xa1d   : > { %3987 = vst [vmem:[#allocation3 + $0x30] sm:$0xff] %v3979_v43   ;;  %v2819_v43 = vld [vmem:[#allocation2 + $0x10] sm:$0xff] }
 0xa22   : > { %v2181_v47 = vpop.f32.mrf.mxu2 }
 0xa23   : > { %v3964_v41 = vpack.c.bf16 %v2181_v47, %v2179_v22 }
 0xa24   : > { %v3923_v21 = vld [vmem:[#allocation3 + $0x30] sm:$0xff] }
 0xa25   : > { %3984 = vst [vmem:[#allocation3 + $0x18] sm:$0xff] %v3964_v41   ;;  %2760 = vmatpush.bf16.msra.mxu2 %v3923_v21 }
 0xa29   : > { %2761 = vmatpush.bf16.msra.mxu2 %v3922_v35  ;;  %v2607_v35 = vpop.permute.xlu0 %2606 }
 0xa2a   : > { %v2184_v15 = vpop.f32.mrf.mxu2 }
 0xa2c   : > { %v3920_v9 = vld [vmem:[#allocation3 + $0x18] sm:$0xff] }
 0xa32   : > { %v2186_v54 = vpop.f32.mrf.mxu2 }
 0xa33   : > { %v3969_v52 = vpack.c.bf16 %v2186_v54, %v2184_v15  ;;  %v2818_v15 = vld [vmem:[#allocation2 + $0x20] sm:$0xff] }
 0xa35   : > { %3985 = vst [vmem:[#allocation3 + $0x8] sm:$0xff] %v3969_v52  }
 0xa3c   : > { %v3921_v39 = vld [vmem:[#allocation3 + $0x8] sm:$0xff] }
 0xa3d   : > { %2762 = vmatpush.bf16.msra.mxu2 %v3921_v39  ;;  %v2817_v39 = vld [vmem:[#allocation2 + $0x40] sm:$0xff] }
 0xa41   : > { %2763 = vmatpush.bf16.msra.mxu2 %v3920_v9 }
 0xa45   : > { %2764 = vmatpush.bf16.msra.mxu2 %v3919_v63 }
 0xa49   : > { %2765 = vmatpush.bf16.msra.mxu2 %v3918_v12 }
 0xa4d   : > { %2766 = vmatpush.bf16.msra.mxu2 %v3917_v5  ;;  %v2597_v5 = vpop.permute.xlu2 %2596 }
 0xa51   : > { %2767 = vmatpush.bf16.msra.mxu2 %v3916_v4  ;;  %v2816_v4 = vld [vmem:[#allocation2 + $0x48] sm:$0xff] }
 0xa54   : > { %2768 = vmatmul.bf16.vlgmr.msra.gmra.mxu2 %v3908_v62 }
 0xa64   : > { %2773 = vmatmul.bf16.gmra.mxu2 %v3909_v3 }
 0xa74   : > { %2778 = vmatmul.bf16.gmra.mxu2 %v3910_v16  ;;  %v2612_v16 = vpop.permute.xlu1 %2611 }
 0xa84   : > { %2783 = vmatmul.bf16.gmra.mxu2 %v3911_v2  ;;  %v2815_v2 = vld [vmem:[#allocation2 + $0x8] sm:$0xff] }
 0xa94   : > { %2788 = vmatmul.bf16.gmra.mxu2 %v3912_v18 }
 0xaa4   : > { %2793 = vmatmul.bf16.gmra.mxu2 %v3913_v50 }
 0xab4   : > { %2798 = vmatmul.bf16.gmra.mxu2 %v3914_v49 }
 0xac4   : > { %2803 = vmatmul.bf16.gmra.mxu2 %v3915_v31  ;;  %v2814_v31 = vld [vmem:[#allocation2 + $0x68] sm:$0xff] }
 0xad7   : > { %v5417_v51 = vpop.f32.mrf.mxu2 }
 0xadf   : > { %v5419_v24 = vpop.f32.mrf.mxu2 }
 0xae7   : > { %v5421_v28 = vpop.f32.mrf.mxu2 }
 0xaef   : > { %v5423_v32 = vpop.f32.mrf.mxu2 }
 0xaf7   : > { %v5425_v33 = vpop.f32.mrf.mxu2 }
 0xaff   : > { %v2781_v8 = vpop.f32.mrf.mxu2 }
 0xb00   : > { %v2782_v18 = vadd.f32 %v2781_v8, %v2612_v16 }
 0xb07   : > { %v2784_v44 = vpop.f32.mrf.mxu2 }
 0xb08   : > { %v2785_v62 = vadd.f32 %v2784_v44, %v2617_v25 }
 0xb0f   : > { %v2786_v46 = vpop.f32.mrf.mxu2 }
 0xb10   : > { %v2787_v9 = vadd.f32 %v2786_v46, %v2622_v19  ;;  %v2780_v46 = vadd.f32 %v5425_v33, %v2607_v35  ;;  %v2811_v33 = vld [vmem:[#allocation2 + $0x58] sm:$0xff] }
 0xb12   : > { %v5449_v50 = vadd.f32 %v2816_v4, %v2787_v9 }
 0xb17   : > { %v2789_v58 = vpop.f32.mrf.mxu2 }
 0xb18   : > { %v2790_v54 = vadd.f32 %v2789_v58, %v2627_v36  ;;  %v5454_v58 = vadd.f32 %v2815_v2, %v2785_v62 }
 0xb1a   : > { %v5447_v3 = vadd.f32 %v2817_v39, %v2790_v54  ;;  %v2860_v8 = vpack.c.bf16 %v5449_v50, %v5454_v58 }
 0xb1f   : > { %v2791_v45 = vpop.f32.mrf.mxu2 }
 0xb20   : > { %v2792_v47 = vadd.f32 %v2791_v45, %v2632_v59  ;;  %v2602_v45 = vpop.permute.xlu0 %2601 }
 0xb21   : > { %v2777_v44 = vadd.f32 %v5423_v32, %v2602_v45 }
 0xb22   : > { %v5443_v63 = vadd.f32 %v2818_v15, %v2792_v47 }
 0xb24   : > { %v2861_v49 = vpack.c.bf16 %v5443_v63, %v5447_v3 }
 0xb27   : > { %v2794_v30 = vpop.f32.mrf.mxu2 }
 0xb28   : > { %v2795_v14 = vadd.f32 %v2794_v30, %v2637_v10  ;;  %v2813_v30 = vld [vmem:[#allocation2 + $0x50] sm:$0xff]  ;;  %v2587_v10 = vpop.permute.xlu1 %2586 }
 0xb29   : > { %v2770_v36 = vadd.f32 %v5417_v51, %v2587_v10  ;;  %v3924_v51 = vld [vmem:[%s4590_s13] sm:$0xff] }
 0xb2a   : > { %v5441_v52 = vadd.f32 %v2819_v43, %v2795_v14 }
 0xb2f   : > { %v2796_v23 = vpop.f32.mrf.mxu2 }
 0xb30   : > { %v2797_v48 = vadd.f32 %v2796_v23, %v2642_v37  ;;  %v5457_v23 = vadd.f32 %v2814_v31, %v2782_v18  ;;  %v2809_v37 = vld [vmem:[#allocation2 + $0x30] sm:$0xff]  ;;  %v2959_v14 = vpop.permute.xlu1 %2958 }
 0xb31   : > { %v5476_v59 = vadd.f32 %v2809_v37, %v2770_v36 }
 0xb32   : > { %v5437_v41 = vadd.f32 %v2820_v40, %v2797_v48  ;;  %v3931_v40 = vld [vmem:[%s4590_s13 + $0x38] sm:$0xff] }
 0xb34   : > { %v2862_v12 = vpack.c.bf16 %v5437_v41, %v5441_v52 }
 0xb37   : > { %v2799_v55 = vpop.f32.mrf.mxu2 }
 0xb38   : > { %v2800_v34 = vadd.f32 %v2799_v55, %v2647_v27  ;;  %v2775_v55 = vadd.f32 %v5421_v28, %v2597_v5 }
 0xb3a   : > { %v5435_v22 = vadd.f32 %v2821_v53, %v2800_v34  ;;  %v5470_v28 = vadd.f32 %v2811_v33, %v2775_v55  ;;  %v2954_v34 = vpop.permute.xlu0 %2953  ;;  %v3930_v53 = vld [vmem:[%s4590_s13 + $0x30] sm:$0xff] }
 0xb3f   : > { %v2801_v42 = vpop.f32.mrf.mxu2 }
 0xb40   : > { %v2802_v60 = vadd.f32 %v2801_v42, %v2652_v29  ;;  %v2592_v29 = vpop.permute.xlu2 %2591 }
 0xb41   : > { %v2772_v42 = vadd.f32 %v5419_v24, %v2592_v29 }
 0xb42   : > { %v5431_v26 = vadd.f32 %v2822_v38, %v2802_v60  ;;  %v3927_v60 = vld [vmem:[%s4590_s13 + $0x18] sm:$0xff]  ;;  %v3929_v38 = vld [vmem:[%s4590_s13 + $0x28] sm:$0xff]  ;;  %v2949_v48 = vpop.permute.xlu0 %2948 }
 0xb44   : > { %v2863_v21 = vpack.c.bf16 %v5431_v26, %v5435_v22 }
 0xb47   : > { %v2804_v7 = vpop.f32.mrf.mxu2 }
 0xb48   : > { %v2805_v1 = vadd.f32 %v2804_v7, %v2657_v20  ;;  %v2812_v20 = vld [vmem:[#allocation2 + $0x18] sm:$0xff]  ;;  %v2810_v7 = vld [vmem:[#allocation2] sm:$0xff]  ;;  %v2944_v19 = vpop.permute.xlu2 %2943 }
 0xb49   : > { %v5465_v27 = vadd.f32 %v2812_v20, %v2777_v44 }
 0xb4a   : > { %v5427_v6 = vadd.f32 %v2823_v11, %v2805_v1  ;;  %v5472_v1 = vadd.f32 %v2810_v7, %v2772_v42  ;;  %v5487_v25 = vpop.permute.xlu0 %2923 }
 0xb4b   : > { %v2858_v24 = vpack.c.bf16 %v5465_v27, %v5470_v28 }
 0xb4c   : > { %v2857_v11 = vpack.c.bf16 %v5472_v1, %v5476_v59 }
 0xb4f   : > { %v2806_v17 = vpop.f32.mrf.mxu2 }
 0xb50   : > { %v2807_v61 = vadd.f32 %v2806_v17, %v2662_v13  ;;  %v5462_v13 = vadd.f32 %v2813_v30, %v2780_v46  ;;  %v3925_v17 = vld [vmem:[%s4590_s13 + $0x8] sm:$0xff] }
 0xb52   : > { %v5429_v56 = vadd.f32 %v2824_v0, %v2807_v61  ;;  %v2859_v32 = vpack.c.bf16 %v5457_v23, %v5462_v13  ;;  %v3926_v0 = vld [vmem:[%s4590_s13 + $0x10] sm:$0xff]  ;;  %v3928_v61 = vld [vmem:[%s4590_s13 + $0x20] sm:$0xff]  ;;  %v2919_v47 = vpop.permute.xlu0 %2918 }
 0xb54   : > { %v2864_v57 = vpack.c.bf16 %v5429_v56, %v5427_v6 }
 0xb56   : > { %3009 = vmatpush.bf16.msra.mxu1 %v2864_v57  ;;  %v2939_v57 = vpop.permute.xlu2 %2938 }
 0xb5a   : > { %3010 = vmatpush.bf16.msra.mxu1 %v2863_v21  ;;  %v2934_v21 = vpop.permute.xlu1 %2933  ;;  %v2894_v15 = vpop.permute.xlu0 %2893 }
 0xb5e   : > { %3011 = vmatpush.bf16.msra.mxu1 %v2862_v12  ;;  %v2914_v43 = vpop.permute.xlu2 %2913 }
 0xb62   : > { %3012 = vmatpush.bf16.msra.mxu1 %v2861_v49  ;;  %v2929_v39 = vpop.permute.xlu1 %2928  ;;  %v2889_v5 = vpop.permute.xlu0 %2888 }
 0xb66   : > { %3013 = vmatpush.bf16.msra.mxu1 %v2860_v8  ;;  %v2909_v35 = vpop.permute.xlu2 %2908 }
 0xb6a   : > { %3014 = vmatpush.bf16.msra.mxu1 %v2859_v32  ;;  %v2904_v49 = vpop.permute.xlu1 %2903 }
 0xb6e   : > { %3015 = vmatpush.bf16.msra.mxu1 %v2858_v24  ;;  %v2884_v9 = vpop.permute.xlu2 %2883 }
 0xb72   : > { %3016 = vmatpush.bf16.msra.mxu1 %v2857_v11  ;;  %v2899_v45 = vpop.permute.xlu1 %2898 }
 0xb75   : > { %3017 = vmatmul.bf16.vlgmr.msra.gmra.mxu1 %v3924_v51 }
 0xb85   : > { %3022 = vmatmul.bf16.gmra.mxu1 %v3925_v17 }
 0xb95   : > { %3027 = vmatmul.bf16.gmra.mxu1 %v3926_v0 }
 0xba5   : > { %3032 = vmatmul.bf16.gmra.mxu1 %v3927_v60 }
 0xbb5   : > { %3037 = vmatmul.bf16.gmra.mxu1 %v3928_v61 }
 0xbc5   : > { %3042 = vmatmul.bf16.gmra.mxu1 %v3929_v38 }
 0xbd5   : > { %3047 = vmatmul.bf16.gmra.mxu1 %v3930_v53 }
 0xbe5   : > { %3052 = vmatmul.bf16.gmra.mxu1 %v3931_v40 }
 0xbf2   : > { %v3018_v54 = vpop.f32.mrf.mxu1 }
 0xbf3   : > { %v3019_v12 = vadd.f32 %v3018_v54, %v2884_v9 }
 0xbf5   : > { %v3058_v16 = vmax.f32 %v3019_v12, 0.0 }
 0xbfa   : > { %v3020_v4 = vpop.f32.mrf.mxu1 }
 0xbfb   : > { %v3021_v62 = vadd.f32 %v3020_v4, %v2889_v5 }
 0xbfd   : > { %v3059_v2 = vmax.f32 %v3021_v62, 0.0 }
 0xbff   : > { %v3090_v18 = vpack.c.bf16 %v3059_v2, %v3058_v16 }
 0xc02   : > { %v3023_v31 = vpop.f32.mrf.mxu1 }
 0xc03   : > { %v3024_v46 = vadd.f32 %v3023_v31, %v2894_v15 }
 0xc05   : > { %v3060_v8 = vmax.f32 %v3024_v46, 0.0 }
 0xc0a   : > { %v3025_v30 = vpop.f32.mrf.mxu1 }
 0xc0b   : > { %v3026_v44 = vadd.f32 %v3025_v30, %v2899_v45 }
 0xc0d   : > { %v3061_v20 = vmax.f32 %v3026_v44, 0.0 }
 0xc0f   : > { %v3091_v55 = vpack.c.bf16 %v3061_v20, %v3060_v8  ;;  %v3935_v20 = vld [vmem:[%s4595_s10 + $0x18] sm:$0xff] }
 0xc12   : > { %v3028_v29 = vpop.f32.mrf.mxu1 }
 0xc13   : > { %v3029_v33 = vadd.f32 %v3028_v29, %v2904_v49  ;;  %v3936_v29 = vld [vmem:[%s4595_s10 + $0x20] sm:$0xff] }
 0xc15   : > { %v3062_v10 = vmax.f32 %v3029_v33, 0.0  ;;  %v3937_v33 = vld [vmem:[%s4595_s10 + $0x28] sm:$0xff] }
 0xc1a   : > { %v3030_v42 = vpop.f32.mrf.mxu1 }
 0xc1b   : > { %v3031_v32 = vadd.f32 %v3030_v42, %v2909_v35  ;;  %v3938_v42 = vld [vmem:[%s4595_s10 + $0x30] sm:$0xff] }
 0xc1d   : > { %v3063_v7 = vmax.f32 %v3031_v32, 0.0  ;;  %v3939_v32 = vld [vmem:[%s4595_s10 + $0x38] sm:$0xff] }
 0xc1f   : > { %v3092_v36 = vpack.c.bf16 %v3063_v7, %v3062_v10  ;;  %v3101_v10 = vpop.permute.xlu1 %3100 }
 0xc22   : > { %v3033_v37 = vpop.f32.mrf.mxu1 }
 0xc23   : > { %v3034_v24 = vadd.f32 %v3033_v37, %v2914_v43 }
 0xc25   : > { %v3064_v17 = vmax.f32 %v3034_v24, 0.0 }
 0xc2a   : > { %v3035_v11 = vpop.f32.mrf.mxu1 }
 0xc2b   : > { %v3036_v51 = vadd.f32 %v3035_v11, %v2919_v47 }
 0xc2d   : > { %v3065_v0 = vmax.f32 %v3036_v51, 0.0  ;;  %v3111_v51 = vpop.permute.xlu0 %3110 }
 0xc2f   : > { %v3093_v60 = vpack.c.bf16 %v3065_v0, %v3064_v17 }
 0xc32   : > { %v3038_v61 = vpop.f32.mrf.mxu1 }
 0xc33   : > { %v3039_v8 = vadd.f32 %v3038_v61, %v5487_v25  ;;  %v3933_v25 = vld [vmem:[%s4595_s10 + $0x8] sm:$0xff] }
 0xc3a   : > { %v3040_v38 = vpop.f32.mrf.mxu1 }
 0xc3b   : > { %v3041_v45 = vadd.f32 %v3040_v38, %v2929_v39  ;;  %v3934_v39 = vld [vmem:[%s4595_s10 + $0x10] sm:$0xff] }
 0xc42   : > { %v3043_v53 = vpop.f32.mrf.mxu1 }
 0xc43   : > { %v3044_v31 = vadd.f32 %v3043_v53, %v2934_v21  ;;  %v3932_v21 = vld [vmem:[%s4595_s10] sm:$0xff] }
 0xc4a   : > { %v3045_v40 = vpop.f32.mrf.mxu1 }
 0xc4b   : > { %v3046_v43 = vadd.f32 %v3045_v40, %v2939_v57 }
 0xc4d   : > { %v3069_v30 = vmax.f32 %v3046_v43, 0.0 }
 0xc52   : > { %v3048_v15 = vpop.f32.mrf.mxu1 }
 0xc53   : > { %v3049_v62 = vadd.f32 %v3048_v15, %v2944_v19 }
 0xc55   : > { %v3070_v46 = vmax.f32 %v3049_v62, 0.0 }
 0xc5a   : > { %v3050_v54 = vpop.f32.mrf.mxu1 }
 0xc5b   : > { %v3051_v35 = vadd.f32 %v3050_v54, %v2949_v48  ;;  %v3067_v48 = vmax.f32 %v3041_v45, 0.0 }
 0xc5d   : > { %v3071_v49 = vmax.f32 %v3051_v35, 0.0 }
 0xc5f   : > { %v3096_v44 = vpack.c.bf16 %v3071_v49, %v3070_v46 }
 0xc62   : > { %v3053_v9 = vpop.f32.mrf.mxu1 }
 0xc63   : > { %v3054_v12 = vadd.f32 %v3053_v9, %v2954_v34  ;;  %v3068_v34 = vmax.f32 %v3044_v31, 0.0  ;;  %v3126_v9 = vpop.permute.xlu0 %3125 }
 0xc65   : > { %v3072_v16 = vmax.f32 %v3054_v12, 0.0  ;;  %v3095_v19 = vpack.c.bf16 %v3069_v30, %v3068_v34 }
 0xc6a   : > { %v3055_v5 = vpop.f32.mrf.mxu1 }
 0xc6b   : > { %v3056_v4 = vadd.f32 %v3055_v5, %v2959_v14  ;;  %v3066_v14 = vmax.f32 %v3039_v8, 0.0 }
 0xc6d   : > { %v3073_v2 = vmax.f32 %v3056_v4, 0.0  ;;  %v3094_v57 = vpack.c.bf16 %v3067_v48, %v3066_v14 }
 0xc6f   : > { %v3097_v47 = vpack.c.bf16 %v3073_v2, %v3072_v16 }
 0xc71   : > { %3226 = vmatpush.bf16.msrb.mxu0 %v3097_v47 }
 0xc75   : > { %3227 = vmatpush.bf16.msrb.mxu0 %v3096_v44 }
 0xc79   : > { %3228 = vmatpush.bf16.msrb.mxu0 %v3095_v19 }
 0xc7d   : > { %3229 = vmatpush.bf16.msrb.mxu0 %v3094_v57 }
 0xc81   : > { %3230 = vmatpush.bf16.msrb.mxu0 %v3093_v60 }
 0xc85   : > { %3231 = vmatpush.bf16.msrb.mxu0 %v3092_v36  ;;  %v3106_v36 = vpop.permute.xlu2 %3105 }
 0xc89   : > { %3232 = vmatpush.bf16.msrb.mxu0 %v3091_v55 }
 0xc8d   : > { %3233 = vmatpush.bf16.msrb.mxu0 %v3090_v18 }
 0xc90   : > { %3234 = vmatmul.bf16.vlgmr.msrb.gmra.mxu0 %v3932_v21 }
 0xca0   : > { %3239 = vmatmul.bf16.gmra.mxu0 %v3933_v25 }
 0xcb0   : > { %3244 = vmatmul.bf16.gmra.mxu0 %v3934_v39 }
 0xcc0   : > { %3249 = vmatmul.bf16.gmra.mxu0 %v3935_v20 }
 0xcd0   : > { %3254 = vmatmul.bf16.gmra.mxu0 %v3936_v29 }
 0xce0   : > { %3259 = vmatmul.bf16.gmra.mxu0 %v3937_v33 }
 0xcf0   : > { %3264 = vmatmul.bf16.gmra.mxu0 %v3938_v42 }
 0xd00   : > { %3269 = vmatmul.bf16.gmra.mxu0 %v3939_v32 }
 0xd0d   : > { %v3235_v55 = vpop.f32.mrf.mxu0 }
 0xd0e   : > { %v3236_v7 = vadd.f32 %v3235_v55, %v3101_v10 }
 0xd10   : > { %v5500_v18 = vadd.f32 %v3236_v7, %v5476_v59  ;;  %v3116_v59 = vpop.permute.xlu1 %3115 }
 0xd12   : > { %3291 = vst [vmem:[#allocation2 + $0x30] sm:$0xff] %v5500_v18 }
 0xd15   : > { %v3237_v37 = vpop.f32.mrf.mxu0 }
 0xd16   : > { %v3238_v24 = vadd.f32 %v3237_v37, %v3106_v36 }
 0xd18   : > { %v5504_v11 = vadd.f32 %v3238_v24, %v5472_v1  ;;  %v3121_v1 = vpop.permute.xlu2 %3120  ;;  %v3131_v35 = vpop.permute.xlu1 %3130 }
 0xd1a   : > { %3292 = vst [vmem:[#allocation2] sm:$0xff] %v5504_v11 }
 0xd1d   : > { %v3240_v17 = vpop.f32.mrf.mxu0 }
 0xd1e   : > { %v3241_v0 = vadd.f32 %v3240_v17, %v3111_v51 }
 0xd20   : > { %v5508_v60 = vadd.f32 %v3241_v0, %v5470_v28  ;;  %v3136_v16 = vpop.permute.xlu2 %3135 }
 0xd22   : > { %3293 = vst [vmem:[#allocation2 + $0x58] sm:$0xff] %v5508_v60 }
 0xd25   : > { %v3242_v61 = vpop.f32.mrf.mxu0 }
 0xd26   : > { %v3243_v38 = vadd.f32 %v3242_v61, %v3116_v59 }
 0xd28   : > { %v5512_v53 = vadd.f32 %v3243_v38, %v5465_v27 }
 0xd2a   : > { %3294 = vst [vmem:[#allocation2 + $0x18] sm:$0xff] %v5512_v53 }
 0xd2d   : > { %v3245_v40 = vpop.f32.mrf.mxu0 }
 0xd2e   : > { %v3246_v15 = vadd.f32 %v3245_v40, %v3121_v1 }
 0xd30   : > { %v3279_v54 = vadd.f32 %v3246_v15, %v5462_v13  ;;  %v3141_v13 = vpop.permute.xlu0 %3140 }
 0xd32   : > { %3295 = vst [vmem:[#allocation2 + $0x50] sm:$0xff] %v3279_v54 }
 0xd35   : > { %v3247_v12 = vpop.f32.mrf.mxu0 }
 0xd36   : > { %v3248_v28 = vadd.f32 %v3247_v12, %v3126_v9 }
 0xd38   : > { %v3280_v5 = vadd.f32 %v3248_v28, %v5457_v23  ;;  %v3146_v23 = vpop.permute.xlu1 %3145 }
 0xd3a   : > { %3296 = vst [vmem:[#allocation2 + $0x68] sm:$0xff] %v3280_v5 }
 0xd3d   : > { %v3250_v4 = vpop.f32.mrf.mxu0 }
 0xd3e   : > { %v3251_v62 = vadd.f32 %v3250_v4, %v3131_v35 }
 0xd40   : > { %v3281_v27 = vadd.f32 %v3251_v62, %v5454_v58  ;;  %v3151_v58 = vpop.permute.xlu2 %3150 }
 0xd42   : > { %3297 = vst [vmem:[#allocation2 + $0x8] sm:$0xff] %v3281_v27 }
 0xd45   : > { %v3252_v2 = vpop.f32.mrf.mxu0 }
 0xd46   : > { %v3253_v43 = vadd.f32 %v3252_v2, %v3136_v16 }
 0xd48   : > { %v3282_v49 = vadd.f32 %v3253_v43, %v5449_v50  ;;  %v3156_v50 = vpop.permute.xlu0 %3155 }
 0xd4a   : > { %3298 = vst [vmem:[#allocation2 + $0x48] sm:$0xff] %v3282_v49 }
 0xd4d   : > { %v3255_v47 = vpop.f32.mrf.mxu0 }
 0xd4e   : > { %v3256_v31 = vadd.f32 %v3255_v47, %v3141_v13 }
 0xd50   : > { %v3283_v46 = vadd.f32 %v3256_v31, %v5447_v3  ;;  %v3161_v3 = vpop.permute.xlu1 %3160 }
 0xd52   : > { %3299 = vst [vmem:[#allocation2 + $0x40] sm:$0xff] %v3283_v46 }
 0xd55   : > { %v3257_v45 = vpop.f32.mrf.mxu0 }
 0xd56   : > { %v3258_v30 = vadd.f32 %v3257_v45, %v3146_v23 }
 0xd58   : > { %v3284_v44 = vadd.f32 %v3258_v30, %v5443_v63  ;;  %v3166_v63 = vpop.permute.xlu2 %3165 }
 0xd5a   : > { %3300 = vst [vmem:[#allocation2 + $0x20] sm:$0xff] %v3284_v44 }
 0xd5d   : > { %v3260_v8 = vpop.f32.mrf.mxu0 }
 0xd5e   : > { %v3261_v34 = vadd.f32 %v3260_v8, %v3151_v58 }
 0xd60   : > { %v3285_v48 = vadd.f32 %v3261_v34, %v5441_v52  ;;  %v3171_v52 = vpop.permute.xlu0 %3170 }
 0xd62   : > { %3301 = vst [vmem:[#allocation2 + $0x10] sm:$0xff] %v3285_v48 }
 0xd65   : > { %v3262_v19 = vpop.f32.mrf.mxu0 }
 0xd66   : > { %v3263_v14 = vadd.f32 %v3262_v19, %v3156_v50 }
 0xd68   : > { %v3286_v57 = vadd.f32 %v3263_v14, %v5437_v41  ;;  %v3176_v41 = vpop.permute.xlu1 %3175 }
 0xd6a   : > { %3302 = vst [vmem:[#allocation2 + $0x38] sm:$0xff] %v3286_v57 }
 0xd6d   : > { %v3265_v21 = vpop.f32.mrf.mxu0 }
 0xd6e   : > { %v3266_v25 = vadd.f32 %v3265_v21, %v3161_v3 }
 0xd70   : > { %v3287_v39 = vadd.f32 %v3266_v25, %v5435_v22 }
 0xd72   : > { %3303 = vst [vmem:[#allocation2 + $0x60] sm:$0xff] %v3287_v39 }
 0xd75   : > { %v3267_v20 = vpop.f32.mrf.mxu0 }
 0xd76   : > { %v3268_v29 = vadd.f32 %v3267_v20, %v3166_v63 }
 0xd78   : > { %v3288_v33 = vadd.f32 %v3268_v29, %v5431_v26 }
 0xd7a   : > { %3304 = vst [vmem:[#allocation2 + $0x70] sm:$0xff] %v3288_v33 }
 0xd7d   : > { %v3270_v42 = vpop.f32.mrf.mxu0 }
 0xd7e   : > { %v3271_v32 = vadd.f32 %v3270_v42, %v3171_v52 }
 0xd80   : > { %v3289_v10 = vadd.f32 %v3271_v32, %v5427_v6 }
 0xd82   : > { %3305 = vst [vmem:[#allocation2 + $0x78] sm:$0xff] %v3289_v10 }
 0xd85   : > { %v3272_v55 = vpop.f32.mrf.mxu0 }
 0xd86   : > { %v3273_v7 = vadd.f32 %v3272_v55, %v3176_v41  ;;  %3310 = sbr.rel (%p3869_p1) target bundleno = 3483 (0xd9b), region = 68 }
 0xd88   : > { %v3290_v36 = vadd.f32 %v3273_v7, %v5429_v56 }
 0xd8a   : > { %3306 = vst [vmem:[#allocation2 + $0x28] sm:$0xff] %v3290_v36 }
 0xd8b   : > { %3311 = vst [vmem:[%s4607_s1] sm:$0xff] %v5500_v18 }
 0xd8c   : > { %3312 = vst [vmem:[%s4607_s1 + $0x8] sm:$0xff] %v5504_v11 }
 0xd8d   : > { %3313 = vst [vmem:[%s4607_s1 + $0x10] sm:$0xff] %v5508_v60 }
 0xd8e   : > { %3314 = vst [vmem:[%s4607_s1 + $0x18] sm:$0xff] %v5512_v53 }
 0xd8f   : > { %3315 = vst [vmem:[%s4607_s1 + $0x20] sm:$0xff] %v3279_v54 }
 0xd90   : > { %3316 = vst [vmem:[%s4607_s1 + $0x28] sm:$0xff] %v3280_v5 }
 0xd91   : > { %3317 = vst [vmem:[%s4607_s1 + $0x30] sm:$0xff] %v3281_v27 }
 0xd92   : > { %3318 = vst [vmem:[%s4607_s1 + $0x38] sm:$0xff] %v3282_v49 }
 0xd93   : > { %3319 = vst [vmem:[%s4607_s1 + $0x40] sm:$0xff] %v3283_v46 }
 0xd94   : > { %3320 = vst [vmem:[%s4607_s1 + $0x48] sm:$0xff] %v3284_v44 }
 0xd95   : > { %3321 = vst [vmem:[%s4607_s1 + $0x50] sm:$0xff] %v3285_v48 }
 0xd96   : > { %3322 = vst [vmem:[%s4607_s1 + $0x58] sm:$0xff] %v3286_v57 }
 0xd97   : > { %3323 = vst [vmem:[%s4607_s1 + $0x60] sm:$0xff] %v3287_v39 }
 0xd98   : > { %3324 = vst [vmem:[%s4607_s1 + $0x68] sm:$0xff] %v3288_v33 }
 0xd99   : > { %3325 = vst [vmem:[%s4607_s1 + $0x70] sm:$0xff] %v3289_v10 }
 0xd9a   : > { %3326 = vst [vmem:[%s4607_s1 + $0x78] sm:$0xff] %v3290_v36 }
 0xd9b PF: > { %s3940_s3 = sshll.u32 %s4409_s17, 7  ;;  %s5640_s25 = sld [smem:[#allocation22_spill]] }
 0xd9c   : > { %s3340_s30 = sshll.u32 %s4607_s1, 4  ;;  %s5641_s21 = sand.u32 1, %s4397_s14   ;;  %s3341_s30 = int_to_ptr.vmem [resolvable:$true] %s3340_s30 }
 0xd9d   : > { %s3328_s27 = scalar_lea.sflag [#allocation5], %s5641_s21 }
 0xda1   : > { %s3339_s29 = scalar_lea.hbm %s5640_s25, %s3940_s3  ;;  %s4347_s17 = scalar_lea.hbm %s5640_s25, 256 }
 0xda2   : > { %s3342_s11 = sshll.u32 %s3339_s29, 4  ;;  %s3343_s11 = int_to_ptr.hbm [resolvable:$true] %s3342_s11 }
 0xda3   : > { %s4341_s28 = sshra.s32 %s3343_s11, 4  ;;  %s4342_s28 = int_to_ptr.hbm [resolvable:$true] %s4341_s28 }
 0xda4   : > { %s4343_s12 = scalar_lea.hbm %s4342_s28, 128  ;;  %p4348_p6 = scmp.lt.s32.totalorder %s4342_s28, %s5640_s25 }
 0xda5   : > { %p4344_p2 = scmp.ne.s32.totalorder %s4342_s28, %s4343_s12  ;;  %p4349_p7 = scmp.lt.s32.totalorder %s4347_s17, %s4343_s12 }
 0xda7   : > { %p4345_p4 = pnand %p4344_p2, %p4530_p3  ;;  %p4350_p8 = por %p4349_p7, %p4348_p6 }
 0xda9   : > { %p4346_p5 = pneg %p4345_p4 }
 0xdab   : > { %p4351_p10 = pnand %p4350_p8, %p4346_p5 }
 0xdad   : > { %4354 = shalt.err (!%p4351_p10)
}
 0xdae   : > { %s4424_s26 = smov 128   ;;  %s4425_s10 = smov 8  }
 0xdaf   : > { %3990 = dma.vmem_to_hbm [thread:$0]  (%p4530_p3), %s3341_s30, 2048, %s3343_s11, %s3328_s27, %s4424_s26, %s4424_s26, %s4425_s10  }
 0xdb0 PF: > { %s5642_s20 = sld [smem:[#allocation11_spill]] }
 0xdb1   : > { %s5643_s23 = sld [smem:[#allocation7_spill]] }
 0xdb6   : > { %p3996_p11 = scmp.ge.s32.totalorder %s5642_s20, 2 }
 0xdb7   : > { %s3357_s0 = sand.u32 1, %s5643_s23  }
 0xdb8   : > { %p3993_p12 = pnand %p3996_p11, %p4540_p9  ;;  %s3358_s18 = scalar_lea.sflag [#allocation5], %s3357_s0 }
 0xdba   : > { %p3994_p13 = pneg %p3993_p12 }
 0xdbc   : > { %4388 = dma.done.wait (%p3994_p13), %s3358_s18, 2048  }
 0xdbd   : > { %4390 = vsyncadd (%p3994_p13), %s3358_s18, 4294965248  ;;  %s23_s20 = sadd.s32 1, %s5642_s20   ;;  %s5645_s1 = sld [smem:[#allocation8_spill]] }
 0xdbe   : > { %p20_p0 = scmp.ge.s32.totalorder %s23_s20, 8   ;;  %s5646_s15 = sld [smem:[#allocation16_spill]] }
 0xdbf   : > { %s5647_s16 = sld [smem:[#allocation9_spill]]  ;;  %s5651_s13 = smov %s4397_s14 }
 0xdc0   : > { %s5648_s17 = sld [smem:[#allocation10_spill]]  ;;  %22 = sbr.rel (!%p20_p0) target bundleno = 12 (0xc), region = 139 }
 0xdc1   : > { %s5649_s18 = sld [smem:[#allocation12_spill]] }
 0xdc2   : > { %s5650_s19 = sld [smem:[#allocation14_spill]] }
 0xdc3   : > { %s5652_s14 = smov %s5645_s1 }
 0xdc5   :  { %3364 = vsyncpa [#allocation5], 1 }
 0xdc6   :  { %3366 = vsyncpa [#allocation5 + $0x1], 1 }

</bundles_post_ra>
